<compile_context>
chip_gen: v7x
topology: tpu7x:2x2x1
jax: 0.10.0
libtpu: 0.0.40
codegen_flags: <defaults>
</compile_context>

<pallas_src>
import jax
import jax.numpy as jnp
from jax.experimental import pallas as pl
from jax.experimental.pallas import tpu as pltpu

H = 32                            # stands in for hidden_dim = 768
R = 16                            # relation_dim (pretrained_embeddings.shape[1])
R_PAD = pl.cdiv(R, 128) * 128     # lane-dense padded relation dim
NUM_STEPS = 5                     # 5 question reformulations
NUM_LAYERS = 2                    # lstm_layer_size


def _cell_from_gates(gates, c_prev):
    """PyTorch nn.LSTM cell elementwise part; gate order (i, f, g, o).

    NOTE: at the toy H=32 these gate slices are not 128-lane aligned; at the
    real H=768 every slice boundary is a multiple of 128 (lane-aligned, free).
    """
    i = jax.nn.sigmoid(gates[:, 0 * H:1 * H])
    f = jax.nn.sigmoid(gates[:, 1 * H:2 * H])
    g = jnp.tanh(gates[:, 2 * H:3 * H])
    o = jax.nn.sigmoid(gates[:, 3 * H:4 * H])
    c = f * c_prev + i * g
    h = o * jnp.tanh(c)
    return h, c


def imitator_kernel(x_ref,
                    w_ih0_ref, w_hh0_ref, b0_ref,
                    w_ih1_ref, w_hh1_ref, b1_ref,
                    w_rel_ref, b_rel_ref,
                    out_ref):
    bblk = x_ref.shape[1]            # batch rows handled by this grid step
    bf16 = jnp.bfloat16

    # Weights (bf16) and biases (f32) — resident in VMEM, single-buffered
    # (their blocks never change across grid steps).
    w_ih0 = w_ih0_ref[...]
    w_hh0 = w_hh0_ref[...]
    w_ih1 = w_ih1_ref[...]
    w_hh1 = w_hh1_ref[...]
    w_rel = w_rel_ref[...]
    b0 = b0_ref[...]                 # (1, 4H) f32, b_ih0 + b_hh0
    b1 = b1_ref[...]                 # (1, 4H) f32, b_ih1 + b_hh1
    b_rel = b_rel_ref[...]           # (1, R_PAD) f32

    # Zero initial (h, c) for both LSTM layers, as in the PyTorch forward.
    h0 = jnp.zeros((bblk, H), jnp.float32)
    c0 = jnp.zeros((bblk, H), jnp.float32)
    h1 = jnp.zeros((bblk, H), jnp.float32)
    c1 = jnp.zeros((bblk, H), jnp.float32)

    h1_steps = []
    # 5 reformulation steps; state (h, c) carried across steps exactly like
    # feeding (h_i, c_i) of call i into call i+1 in the PyTorch code.
    for t in range(NUM_STEPS):
        x_t = x_ref[t]               # (bblk, H) bf16
        # LSTM layer 0.  x_t @ w_ih0 is off the recurrent h-dependency, so the
        # scheduler overlaps it with the previous step's elementwise math; no
        # precomputed f32 xproj slab needed.
        gates0 = (jnp.dot(x_t, w_ih0, preferred_element_type=jnp.float32)
                  + jnp.dot(h0.astype(bf16), w_hh0,
                            preferred_element_type=jnp.float32)
                  + b0)
        h0, c0 = _cell_from_gates(gates0, c0)

        # LSTM layer 1: two independent matmuls accumulate into the same f32
        # gates — no per-step concat copy on the recurrent critical path.
        gates1 = (jnp.dot(h0.astype(bf16), w_ih1,
                          preferred_element_type=jnp.float32)
                  + jnp.dot(h1.astype(bf16), w_hh1,
                            preferred_element_type=jnp.float32)
                  + b1)
        h1, c1 = _cell_from_gates(gates1, c1)
        h1_steps.append(h1)

    # ---- Batched hidden2rel Linear + single lane-dense output store --------
    h_all = jnp.concatenate(h1_steps, axis=0).astype(bf16)          # (T*Bblk, H)
    rel_all = (jnp.dot(h_all, w_rel, preferred_element_type=jnp.float32)
               + b_rel)                                             # (T*Bblk, R_PAD)
    out_ref[...] = rel_all.reshape(NUM_STEPS, bblk, R_PAD).astype(out_ref.dtype)


def _vmem_limit_bytes(tb):
    """Scoped-VMEM budget computed from the actual resident buffers and clamped
    to the device's physical VMEM (64 MiB/TC on v7x, 128 MiB on v5e/v6e)."""
    bf, f32 = 2, 4
    # constant operands, single-buffered
    w_bytes = 4 * (H * 4 * H) * bf + (H * R_PAD) * bf + (2 * 4 * H + R_PAD) * f32
    # streaming operands, double-buffered by the pipeline
    x_bytes = 2 * NUM_STEPS * tb * H * bf
    o_bytes = 2 * NUM_STEPS * tb * R_PAD * f32
    # live in-kernel f32 activations (gates, h/c state, h1 history, rel slab)
    act_bytes = (4 * tb * 4 * H + 6 * tb * H
                 + NUM_STEPS * tb * H + NUM_STEPS * tb * R_PAD) * f32
    budget = int(1.4 * (w_bytes + x_bytes + o_bytes + act_bytes)) + (16 << 20)
    try:
        cap = int(pltpu.get_tpu_info().vmem_capacity_bytes)
    except Exception:                   # conservative fallback: v7x per-TC VMEM
        cap = 64 << 20
    return max(32 << 20, min(budget, cap - (8 << 20)))


def _make_call(tb, grid_b, b_pad, single_buffer_weights):
    const_kw = ({"pipeline_mode": pl.Buffered(1)} if single_buffer_weights
                else {})

    def wspec(shape):
        # constant operand: block index never changes -> single-buffer it
        return pl.BlockSpec(shape, lambda i: (0, 0), **const_kw)

    return pl.pallas_call(
        imitator_kernel,
        out_shape=jax.ShapeDtypeStruct((NUM_STEPS, b_pad, R_PAD), jnp.float32),
        grid=(grid_b,),
        in_specs=[
            pl.BlockSpec((NUM_STEPS, tb, H), lambda i: (0, i, 0)),   # x (bf16)
            wspec((H, 4 * H)),                                       # w_ih0
            wspec((H, 4 * H)),                                       # w_hh0
            wspec((1, 4 * H)),                                       # b0
            wspec((H, 4 * H)),                                       # w_ih1
            wspec((H, 4 * H)),                                       # w_hh1
            wspec((1, 4 * H)),                                       # b1
            wspec((H, R_PAD)),                                       # w_rel (padded)
            wspec((1, R_PAD)),                                       # b_rel (padded)
        ],
        out_specs=pl.BlockSpec((NUM_STEPS, tb, R_PAD), lambda i: (0, i, 0)),
        compiler_params=pltpu.CompilerParams(
            # batch tiles are independent -> shard across v7x's 2 TensorCores
            dimension_semantics=("parallel",),
            vmem_limit_bytes=_vmem_limit_bytes(tb),
        ),
    )


def reformulation_imitator(q_cls, packed_params, *, batch_block=256):
    """q_cls: [B, NUM_STEPS, H] post-transformer CLS embeddings.

    Returns a tuple of NUM_STEPS arrays of shape [B, R] (rel_embedding1..5).
    """
    # TODO(synk): for small serving batches the kernel is weight-DMA/latency
    # bound; a cross-call VMEM/semaphore weight prefetch (P10) hidden behind
    # the upstream encoder would remove the dominant cost in that regime.
    B = q_cls.shape[0]
    tb = min(B, batch_block)
    # Guarantee >= 2 grid tiles (v7x dual-TensorCore sharding) whenever the
    # batch allows two full 256-row MXU tiles.
    if B // tb < 2 and B >= 512:
        tb = max(256, ((B // 2) // 256) * 256)
    grid_b = pl.cdiv(B, tb)
    b_pad = grid_b * tb

    # (T, B, H) layout so per-step rows are contiguous; bf16 cast fused with
    # the transpose (halves the pre-kernel HBM pass and per-tile DMA).  Pad the
    # batch to the tile instead of asserting divisibility.
    x = jnp.transpose(q_cls, (1, 0, 2)).astype(jnp.bfloat16)
    if b_pad != B:
        x = jnp.pad(x, ((0, 0), (0, b_pad - B), (0, 0)))

    try:
        out = _make_call(tb, grid_b, b_pad, True)(x, *packed_params)
    except Exception:
        # Fallback: default (double-buffered) weight BlockSpecs if this jax
        # build rejects single-buffered pipeline_mode.
        out = _make_call(tb, grid_b, b_pad, False)(x, *packed_params)

    out = out[:, :B, :R]             # drop batch padding + lane padding
    return tuple(out[t] for t in range(NUM_STEPS))


def init_params(key):
    """Deterministic PyTorch-style U(-1/sqrt(H), 1/sqrt(H)) nn.LSTM / Linear
    init, stored in f32, [in, out] layout, separate biases (so an exact fp32
    ground-truth reference can be evaluated)."""
    ks = jax.random.split(key, 10)
    bound = 1.0 / (H ** 0.5)

    def u(k, shape):
        return jax.random.uniform(k, shape, jnp.float32, -bound, bound)

    return dict(
        w_ih0=u(ks[0], (H, 4 * H)), w_hh0=u(ks[1], (H, 4 * H)),
        b_ih0=u(ks[2], (1, 4 * H)), b_hh0=u(ks[3], (1, 4 * H)),
        w_ih1=u(ks[4], (H, 4 * H)), w_hh1=u(ks[5], (H, 4 * H)),
        b_ih1=u(ks[6], (1, 4 * H)), b_hh1=u(ks[7], (1, 4 * H)),
        w_rel=u(ks[8], (H, R)), b_rel=u(ks[9], (1, R)),
    )


def pack_params(p):
    """Pack f32 params for the kernel: matmul operands cast to bf16 (MXU
    native), biases fused (b_ih + b_hh, kept f32), relation dim zero-padded to
    a lane-dense multiple of 128."""
    bf = jnp.bfloat16
    b0 = p["b_ih0"] + p["b_hh0"]
    b1 = p["b_ih1"] + p["b_hh1"]
    w_rel_p = jnp.zeros((H, R_PAD), jnp.float32).at[:, :R].set(p["w_rel"])
    b_rel_p = jnp.zeros((1, R_PAD), jnp.float32).at[:, :R].set(p["b_rel"])
    return (p["w_ih0"].astype(bf), p["w_hh0"].astype(bf), b0,
            p["w_ih1"].astype(bf), p["w_hh1"].astype(bf), b1,
            w_rel_p.astype(bf), b_rel_p)


def reference_bf16(q_cls, packed):
    """Pure-JAX reference with the kernel's exact numerics (bf16 matmul
    operands, f32 accumulation / state)."""
    w_ih0, w_hh0, b0, w_ih1, w_hh1, b1, w_rel, b_rel = packed
    bf = jnp.bfloat16
    B = q_cls.shape[0]
    x = q_cls.astype(bf)
    h0 = c0 = h1 = c1 = jnp.zeros((B, H), jnp.float32)
    outs = []
    for t in range(NUM_STEPS):
        g0 = (jnp.dot(x[:, t, :], w_ih0, preferred_element_type=jnp.float32)
              + jnp.dot(h0.astype(bf), w_hh0, preferred_element_type=jnp.float32)
              + b0)
        h0, c0 = _cell_from_gates(g0, c0)
        g1 = (jnp.dot(h0.astype(bf), w_ih1, preferred_element_type=jnp.float32)
              + jnp.dot(h1.astype(bf), w_hh1, preferred_element_type=jnp.float32)
              + b1)
        h1, c1 = _cell_from_gates(g1, c1)
        rel = (jnp.dot(h1.astype(bf), w_rel, preferred_element_type=jnp.float32)
               + b_rel)
        outs.append(rel[:, :R])
    return tuple(outs)


def reference_f32(q_cls, p):
    """Full-precision f32 ground truth matching the PyTorch nn.LSTM math."""
    B = q_cls.shape[0]
    h0 = c0 = h1 = c1 = jnp.zeros((B, H), jnp.float32)
    outs = []
    for t in range(NUM_STEPS):
        x_t = q_cls[:, t, :]
        g0 = x_t @ p["w_ih0"] + h0 @ p["w_hh0"] + p["b_ih0"] + p["b_hh0"]
        h0, c0 = _cell_from_gates(g0, c0)
        g1 = h0 @ p["w_ih1"] + h1 @ p["w_hh1"] + p["b_ih1"] + p["b_hh1"]
        h1, c1 = _cell_from_gates(g1, c1)
        outs.append(h1 @ p["w_rel"] + p["b_rel"])
    return tuple(outs)


if __name__ == "__main__":
    key = jax.random.PRNGKey(0)
    k_q, k_p = jax.random.split(key)
    B = 2
    # Synthetic post-transformer CLS embeddings for the 5 reformulations.
    q_cls = jax.random.normal(k_q, (B, NUM_STEPS, H), jnp.float32)
    params_f32 = init_params(k_p)
    packed = pack_params(params_f32)

    outs = reformulation_imitator(q_cls, packed)
    outs = jax.block_until_ready(outs)

    refs_same = reference_bf16(q_cls, packed)        # identical numerics
    refs_true = reference_f32(q_cls, params_f32)     # fp32 ground truth
    assert len(outs) == NUM_STEPS
    for o, rs, rt in zip(outs, refs_same, refs_true):
        assert o.shape == (B, R), o.shape
        err_same = float(jnp.max(jnp.abs(o - rs)))
        err_true = float(jnp.max(jnp.abs(o - rt)))
        assert jnp.allclose(o, rs, atol=5e-3, rtol=5e-3), err_same
        assert jnp.allclose(o, rt, atol=5e-2, rtol=5e-2), err_true

    print("KERNEL_OK")
</pallas_src>

<mosaic_0001>
module attributes {stable_mosaic.version = 11 : i64} {
  func.func @imitator_kernel(%arg0: i32, %arg1: memref<5x2x32xbf16, #tpu.memory_space<vmem>>, %arg2: memref<32x128xbf16, #tpu.memory_space<vmem>>, %arg3: memref<32x128xbf16, #tpu.memory_space<vmem>>, %arg4: memref<1x128xf32, #tpu.memory_space<vmem>>, %arg5: memref<32x128xbf16, #tpu.memory_space<vmem>>, %arg6: memref<32x128xbf16, #tpu.memory_space<vmem>>, %arg7: memref<1x128xf32, #tpu.memory_space<vmem>>, %arg8: memref<32x128xbf16, #tpu.memory_space<vmem>>, %arg9: memref<1x128xf32, #tpu.memory_space<vmem>>, %arg10: memref<5x2x128xf32, #tpu.memory_space<vmem>>) attributes {dimension_semantics = [#tpu.dimension_semantics<parallel>], iteration_bounds = array<i64: 1>, scalar_prefetch = 0 : i64, scratch_operands = 0 : i64, tpu.core_type = #tpu.core_type<tc>, window_params = [{transform_indices = @transform_0, window_bounds = array<i64: 5, 2, 32>}, {pipeline_mode = #tpu.pipeline_mode<synchronous>, transform_indices = @transform_1, window_bounds = array<i64: 32, 128>}, {pipeline_mode = #tpu.pipeline_mode<synchronous>, transform_indices = @transform_2, window_bounds = array<i64: 32, 128>}, {pipeline_mode = #tpu.pipeline_mode<synchronous>, transform_indices = @transform_3, window_bounds = array<i64: 1, 128>}, {pipeline_mode = #tpu.pipeline_mode<synchronous>, transform_indices = @transform_4, window_bounds = array<i64: 32, 128>}, {pipeline_mode = #tpu.pipeline_mode<synchronous>, transform_indices = @transform_5, window_bounds = array<i64: 32, 128>}, {pipeline_mode = #tpu.pipeline_mode<synchronous>, transform_indices = @transform_6, window_bounds = array<i64: 1, 128>}, {pipeline_mode = #tpu.pipeline_mode<synchronous>, transform_indices = @transform_7, window_bounds = array<i64: 32, 128>}, {pipeline_mode = #tpu.pipeline_mode<synchronous>, transform_indices = @transform_8, window_bounds = array<i64: 1, 128>}, {transform_indices = @transform_9, window_bounds = array<i64: 5, 2, 128>}]} {
    %c0 = arith.constant 0 : index
    %c0_0 = arith.constant 0 : index
    %0 = vector.load %arg2[%c0, %c0_0] : memref<32x128xbf16, #tpu.memory_space<vmem>>, vector<32x128xbf16>
    %c0_1 = arith.constant 0 : index
    %c0_2 = arith.constant 0 : index
    %1 = vector.load %arg3[%c0_1, %c0_2] : memref<32x128xbf16, #tpu.memory_space<vmem>>, vector<32x128xbf16>
    %c0_3 = arith.constant 0 : index
    %c0_4 = arith.constant 0 : index
    %2 = vector.load %arg5[%c0_3, %c0_4] : memref<32x128xbf16, #tpu.memory_space<vmem>>, vector<32x128xbf16>
    %c0_5 = arith.constant 0 : index
    %c0_6 = arith.constant 0 : index
    %3 = vector.load %arg6[%c0_5, %c0_6] : memref<32x128xbf16, #tpu.memory_space<vmem>>, vector<32x128xbf16>
    %c0_7 = arith.constant 0 : index
    %c0_8 = arith.constant 0 : index
    %4 = vector.load %arg8[%c0_7, %c0_8] : memref<32x128xbf16, #tpu.memory_space<vmem>>, vector<32x128xbf16>
    %c0_9 = arith.constant 0 : index
    %c0_10 = arith.constant 0 : index
    %5 = vector.load %arg4[%c0_9, %c0_10] : memref<1x128xf32, #tpu.memory_space<vmem>>, vector<1x128xf32>
    %c0_11 = arith.constant 0 : index
    %c0_12 = arith.constant 0 : index
    %6 = vector.load %arg7[%c0_11, %c0_12] : memref<1x128xf32, #tpu.memory_space<vmem>>, vector<1x128xf32>
    %c0_13 = arith.constant 0 : index
    %c0_14 = arith.constant 0 : index
    %7 = vector.load %arg9[%c0_13, %c0_14] : memref<1x128xf32, #tpu.memory_space<vmem>>, vector<1x128xf32>
    %cst = arith.constant 0.000000e+00 : f32
    %8 = vector.broadcast %cst : f32 to vector<2x32xf32>
    %cst_15 = arith.constant 0.000000e+00 : f32
    %9 = vector.broadcast %cst_15 : f32 to vector<2x32xf32>
    %cst_16 = arith.constant 0.000000e+00 : f32
    %10 = vector.broadcast %cst_16 : f32 to vector<2x32xf32>
    %cst_17 = arith.constant 0.000000e+00 : f32
    %11 = vector.broadcast %cst_17 : f32 to vector<2x32xf32>
    %c0_18 = arith.constant 0 : index
    %c0_19 = arith.constant 0 : index
    %c0_20 = arith.constant 0 : index
    %12 = vector.load %arg1[%c0_18, %c0_19, %c0_20] : memref<5x2x32xbf16, #tpu.memory_space<vmem>>, vector<1x2x32xbf16>
    %13 = vector.shape_cast %12 : vector<1x2x32xbf16> to vector<2x32xbf16>
    %cst_21 = arith.constant dense<0.000000e+00> : vector<2x128xf32>
    %14 = tpu.matmul %13, %0, %cst_21 {dimension_numbers = #tpu.dot_dimension_numbers<[1], [0], [0], [1], [0, 0, 1, 1], [], []>} : vector<2x32xbf16>, vector<32x128xbf16>, vector<2x128xf32> -> vector<2x128xf32>
    %15 = arith.truncf %8 : vector<2x32xf32> to vector<2x32xbf16>
    %cst_22 = arith.constant dense<0.000000e+00> : vector<2x128xf32>
    %16 = tpu.matmul %15, %1, %cst_22 {dimension_numbers = #tpu.dot_dimension_numbers<[1], [0], [0], [1], [0, 0, 1, 1], [], []>} : vector<2x32xbf16>, vector<32x128xbf16>, vector<2x128xf32> -> vector<2x128xf32>
    %17 = arith.addf %14, %16 : vector<2x128xf32>
    %18 = vector.broadcast %5 : vector<1x128xf32> to vector<2x128xf32>
    %19 = arith.addf %17, %18 : vector<2x128xf32>
    %20 = vector.extract_strided_slice %19 {offsets = [0, 0], sizes = [2, 32], strides = [1, 1]} : vector<2x128xf32> to vector<2x32xf32>
    %21 = arith.negf %20 : vector<2x32xf32>
    %22 = math.exp %21 : vector<2x32xf32>
    %cst_23 = arith.constant 1.000000e+00 : f32
    %23 = vector.broadcast %cst_23 : f32 to vector<2x32xf32>
    %24 = arith.addf %23, %22 : vector<2x32xf32>
    %25 = arith.divf %23, %24 : vector<2x32xf32>
    %26 = vector.extract_strided_slice %19 {offsets = [0, 32], sizes = [2, 32], strides = [1, 1]} : vector<2x128xf32> to vector<2x32xf32>
    %27 = arith.negf %26 : vector<2x32xf32>
    %28 = math.exp %27 : vector<2x32xf32>
    %cst_24 = arith.constant 1.000000e+00 : f32
    %29 = vector.broadcast %cst_24 : f32 to vector<2x32xf32>
    %30 = arith.addf %29, %28 : vector<2x32xf32>
    %31 = arith.divf %29, %30 : vector<2x32xf32>
    %32 = vector.extract_strided_slice %19 {offsets = [0, 64], sizes = [2, 32], strides = [1, 1]} : vector<2x128xf32> to vector<2x32xf32>
    %33 = math.tanh %32 : vector<2x32xf32>
    %34 = vector.extract_strided_slice %19 {offsets = [0, 96], sizes = [2, 32], strides = [1, 1]} : vector<2x128xf32> to vector<2x32xf32>
    %35 = arith.negf %34 : vector<2x32xf32>
    %36 = math.exp %35 : vector<2x32xf32>
    %cst_25 = arith.constant 1.000000e+00 : f32
    %37 = vector.broadcast %cst_25 : f32 to vector<2x32xf32>
    %38 = arith.addf %37, %36 : vector<2x32xf32>
    %39 = arith.divf %37, %38 : vector<2x32xf32>
    %40 = arith.mulf %31, %9 : vector<2x32xf32>
    %41 = arith.mulf %25, %33 : vector<2x32xf32>
    %42 = arith.addf %40, %41 : vector<2x32xf32>
    %43 = math.tanh %42 : vector<2x32xf32>
    %44 = arith.mulf %39, %43 : vector<2x32xf32>
    %45 = arith.truncf %44 : vector<2x32xf32> to vector<2x32xbf16>
    %cst_26 = arith.constant dense<0.000000e+00> : vector<2x128xf32>
    %46 = tpu.matmul %45, %2, %cst_26 {dimension_numbers = #tpu.dot_dimension_numbers<[1], [0], [0], [1], [0, 0, 1, 1], [], []>} : vector<2x32xbf16>, vector<32x128xbf16>, vector<2x128xf32> -> vector<2x128xf32>
    %47 = arith.truncf %10 : vector<2x32xf32> to vector<2x32xbf16>
    %cst_27 = arith.constant dense<0.000000e+00> : vector<2x128xf32>
    %48 = tpu.matmul %47, %3, %cst_27 {dimension_numbers = #tpu.dot_dimension_numbers<[1], [0], [0], [1], [0, 0, 1, 1], [], []>} : vector<2x32xbf16>, vector<32x128xbf16>, vector<2x128xf32> -> vector<2x128xf32>
    %49 = arith.addf %46, %48 : vector<2x128xf32>
    %50 = vector.broadcast %6 : vector<1x128xf32> to vector<2x128xf32>
    %51 = arith.addf %49, %50 : vector<2x128xf32>
    %52 = vector.extract_strided_slice %51 {offsets = [0, 0], sizes = [2, 32], strides = [1, 1]} : vector<2x128xf32> to vector<2x32xf32>
    %53 = arith.negf %52 : vector<2x32xf32>
    %54 = math.exp %53 : vector<2x32xf32>
    %cst_28 = arith.constant 1.000000e+00 : f32
    %55 = vector.broadcast %cst_28 : f32 to vector<2x32xf32>
    %56 = arith.addf %55, %54 : vector<2x32xf32>
    %57 = arith.divf %55, %56 : vector<2x32xf32>
    %58 = vector.extract_strided_slice %51 {offsets = [0, 32], sizes = [2, 32], strides = [1, 1]} : vector<2x128xf32> to vector<2x32xf32>
    %59 = arith.negf %58 : vector<2x32xf32>
    %60 = math.exp %59 : vector<2x32xf32>
    %cst_29 = arith.constant 1.000000e+00 : f32
    %61 = vector.broadcast %cst_29 : f32 to vector<2x32xf32>
    %62 = arith.addf %61, %60 : vector<2x32xf32>
    %63 = arith.divf %61, %62 : vector<2x32xf32>
    %64 = vector.extract_strided_slice %51 {offsets = [0, 64], sizes = [2, 32], strides = [1, 1]} : vector<2x128xf32> to vector<2x32xf32>
    %65 = math.tanh %64 : vector<2x32xf32>
    %66 = vector.extract_strided_slice %51 {offsets = [0, 96], sizes = [2, 32], strides = [1, 1]} : vector<2x128xf32> to vector<2x32xf32>
    %67 = arith.negf %66 : vector<2x32xf32>
    %68 = math.exp %67 : vector<2x32xf32>
    %cst_30 = arith.constant 1.000000e+00 : f32
    %69 = vector.broadcast %cst_30 : f32 to vector<2x32xf32>
    %70 = arith.addf %69, %68 : vector<2x32xf32>
    %71 = arith.divf %69, %70 : vector<2x32xf32>
    %72 = arith.mulf %63, %11 : vector<2x32xf32>
    %73 = arith.mulf %57, %65 : vector<2x32xf32>
    %74 = arith.addf %72, %73 : vector<2x32xf32>
    %75 = math.tanh %74 : vector<2x32xf32>
    %76 = arith.mulf %71, %75 : vector<2x32xf32>
    %c1 = arith.constant 1 : index
    %c0_31 = arith.constant 0 : index
    %c0_32 = arith.constant 0 : index
    %77 = vector.load %arg1[%c1, %c0_31, %c0_32] : memref<5x2x32xbf16, #tpu.memory_space<vmem>>, vector<1x2x32xbf16>
    %78 = vector.shape_cast %77 : vector<1x2x32xbf16> to vector<2x32xbf16>
    %cst_33 = arith.constant dense<0.000000e+00> : vector<2x128xf32>
    %79 = tpu.matmul %78, %0, %cst_33 {dimension_numbers = #tpu.dot_dimension_numbers<[1], [0], [0], [1], [0, 0, 1, 1], [], []>} : vector<2x32xbf16>, vector<32x128xbf16>, vector<2x128xf32> -> vector<2x128xf32>
    %80 = arith.truncf %44 : vector<2x32xf32> to vector<2x32xbf16>
    %cst_34 = arith.constant dense<0.000000e+00> : vector<2x128xf32>
    %81 = tpu.matmul %80, %1, %cst_34 {dimension_numbers = #tpu.dot_dimension_numbers<[1], [0], [0], [1], [0, 0, 1, 1], [], []>} : vector<2x32xbf16>, vector<32x128xbf16>, vector<2x128xf32> -> vector<2x128xf32>
    %82 = arith.addf %79, %81 : vector<2x128xf32>
    %83 = vector.broadcast %5 : vector<1x128xf32> to vector<2x128xf32>
    %84 = arith.addf %82, %83 : vector<2x128xf32>
    %85 = vector.extract_strided_slice %84 {offsets = [0, 0], sizes = [2, 32], strides = [1, 1]} : vector<2x128xf32> to vector<2x32xf32>
    %86 = arith.negf %85 : vector<2x32xf32>
    %87 = math.exp %86 : vector<2x32xf32>
    %cst_35 = arith.constant 1.000000e+00 : f32
    %88 = vector.broadcast %cst_35 : f32 to vector<2x32xf32>
    %89 = arith.addf %88, %87 : vector<2x32xf32>
    %90 = arith.divf %88, %89 : vector<2x32xf32>
    %91 = vector.extract_strided_slice %84 {offsets = [0, 32], sizes = [2, 32], strides = [1, 1]} : vector<2x128xf32> to vector<2x32xf32>
    %92 = arith.negf %91 : vector<2x32xf32>
    %93 = math.exp %92 : vector<2x32xf32>
    %cst_36 = arith.constant 1.000000e+00 : f32
    %94 = vector.broadcast %cst_36 : f32 to vector<2x32xf32>
    %95 = arith.addf %94, %93 : vector<2x32xf32>
    %96 = arith.divf %94, %95 : vector<2x32xf32>
    %97 = vector.extract_strided_slice %84 {offsets = [0, 64], sizes = [2, 32], strides = [1, 1]} : vector<2x128xf32> to vector<2x32xf32>
    %98 = math.tanh %97 : vector<2x32xf32>
    %99 = vector.extract_strided_slice %84 {offsets = [0, 96], sizes = [2, 32], strides = [1, 1]} : vector<2x128xf32> to vector<2x32xf32>
    %100 = arith.negf %99 : vector<2x32xf32>
    %101 = math.exp %100 : vector<2x32xf32>
    %cst_37 = arith.constant 1.000000e+00 : f32
    %102 = vector.broadcast %cst_37 : f32 to vector<2x32xf32>
    %103 = arith.addf %102, %101 : vector<2x32xf32>
    %104 = arith.divf %102, %103 : vector<2x32xf32>
    %105 = arith.mulf %96, %42 : vector<2x32xf32>
    %106 = arith.mulf %90, %98 : vector<2x32xf32>
    %107 = arith.addf %105, %106 : vector<2x32xf32>
    %108 = math.tanh %107 : vector<2x32xf32>
    %109 = arith.mulf %104, %108 : vector<2x32xf32>
    %110 = arith.truncf %109 : vector<2x32xf32> to vector<2x32xbf16>
    %cst_38 = arith.constant dense<0.000000e+00> : vector<2x128xf32>
    %111 = tpu.matmul %110, %2, %cst_38 {dimension_numbers = #tpu.dot_dimension_numbers<[1], [0], [0], [1], [0, 0, 1, 1], [], []>} : vector<2x32xbf16>, vector<32x128xbf16>, vector<2x128xf32> -> vector<2x128xf32>
    %112 = arith.truncf %76 : vector<2x32xf32> to vector<2x32xbf16>
    %cst_39 = arith.constant dense<0.000000e+00> : vector<2x128xf32>
    %113 = tpu.matmul %112, %3, %cst_39 {dimension_numbers = #tpu.dot_dimension_numbers<[1], [0], [0], [1], [0, 0, 1, 1], [], []>} : vector<2x32xbf16>, vector<32x128xbf16>, vector<2x128xf32> -> vector<2x128xf32>
    %114 = arith.addf %111, %113 : vector<2x128xf32>
    %115 = vector.broadcast %6 : vector<1x128xf32> to vector<2x128xf32>
    %116 = arith.addf %114, %115 : vector<2x128xf32>
    %117 = vector.extract_strided_slice %116 {offsets = [0, 0], sizes = [2, 32], strides = [1, 1]} : vector<2x128xf32> to vector<2x32xf32>
    %118 = arith.negf %117 : vector<2x32xf32>
    %119 = math.exp %118 : vector<2x32xf32>
    %cst_40 = arith.constant 1.000000e+00 : f32
    %120 = vector.broadcast %cst_40 : f32 to vector<2x32xf32>
    %121 = arith.addf %120, %119 : vector<2x32xf32>
    %122 = arith.divf %120, %121 : vector<2x32xf32>
    %123 = vector.extract_strided_slice %116 {offsets = [0, 32], sizes = [2, 32], strides = [1, 1]} : vector<2x128xf32> to vector<2x32xf32>
    %124 = arith.negf %123 : vector<2x32xf32>
    %125 = math.exp %124 : vector<2x32xf32>
    %cst_41 = arith.constant 1.000000e+00 : f32
    %126 = vector.broadcast %cst_41 : f32 to vector<2x32xf32>
    %127 = arith.addf %126, %125 : vector<2x32xf32>
    %128 = arith.divf %126, %127 : vector<2x32xf32>
    %129 = vector.extract_strided_slice %116 {offsets = [0, 64], sizes = [2, 32], strides = [1, 1]} : vector<2x128xf32> to vector<2x32xf32>
    %130 = math.tanh %129 : vector<2x32xf32>
    %131 = vector.extract_strided_slice %116 {offsets = [0, 96], sizes = [2, 32], strides = [1, 1]} : vector<2x128xf32> to vector<2x32xf32>
    %132 = arith.negf %131 : vector<2x32xf32>
    %133 = math.exp %132 : vector<2x32xf32>
    %cst_42 = arith.constant 1.000000e+00 : f32
    %134 = vector.broadcast %cst_42 : f32 to vector<2x32xf32>
    %135 = arith.addf %134, %133 : vector<2x32xf32>
    %136 = arith.divf %134, %135 : vector<2x32xf32>
    %137 = arith.mulf %128, %74 : vector<2x32xf32>
    %138 = arith.mulf %122, %130 : vector<2x32xf32>
    %139 = arith.addf %137, %138 : vector<2x32xf32>
    %140 = math.tanh %139 : vector<2x32xf32>
    %141 = arith.mulf %136, %140 : vector<2x32xf32>
    %c2 = arith.constant 2 : index
    %c0_43 = arith.constant 0 : index
    %c0_44 = arith.constant 0 : index
    %142 = vector.load %arg1[%c2, %c0_43, %c0_44] : memref<5x2x32xbf16, #tpu.memory_space<vmem>>, vector<1x2x32xbf16>
    %143 = vector.shape_cast %142 : vector<1x2x32xbf16> to vector<2x32xbf16>
    %cst_45 = arith.constant dense<0.000000e+00> : vector<2x128xf32>
    %144 = tpu.matmul %143, %0, %cst_45 {dimension_numbers = #tpu.dot_dimension_numbers<[1], [0], [0], [1], [0, 0, 1, 1], [], []>} : vector<2x32xbf16>, vector<32x128xbf16>, vector<2x128xf32> -> vector<2x128xf32>
    %145 = arith.truncf %109 : vector<2x32xf32> to vector<2x32xbf16>
    %cst_46 = arith.constant dense<0.000000e+00> : vector<2x128xf32>
    %146 = tpu.matmul %145, %1, %cst_46 {dimension_numbers = #tpu.dot_dimension_numbers<[1], [0], [0], [1], [0, 0, 1, 1], [], []>} : vector<2x32xbf16>, vector<32x128xbf16>, vector<2x128xf32> -> vector<2x128xf32>
    %147 = arith.addf %144, %146 : vector<2x128xf32>
    %148 = vector.broadcast %5 : vector<1x128xf32> to vector<2x128xf32>
    %149 = arith.addf %147, %148 : vector<2x128xf32>
    %150 = vector.extract_strided_slice %149 {offsets = [0, 0], sizes = [2, 32], strides = [1, 1]} : vector<2x128xf32> to vector<2x32xf32>
    %151 = arith.negf %150 : vector<2x32xf32>
    %152 = math.exp %151 : vector<2x32xf32>
    %cst_47 = arith.constant 1.000000e+00 : f32
    %153 = vector.broadcast %cst_47 : f32 to vector<2x32xf32>
    %154 = arith.addf %153, %152 : vector<2x32xf32>
    %155 = arith.divf %153, %154 : vector<2x32xf32>
    %156 = vector.extract_strided_slice %149 {offsets = [0, 32], sizes = [2, 32], strides = [1, 1]} : vector<2x128xf32> to vector<2x32xf32>
    %157 = arith.negf %156 : vector<2x32xf32>
    %158 = math.exp %157 : vector<2x32xf32>
    %cst_48 = arith.constant 1.000000e+00 : f32
    %159 = vector.broadcast %cst_48 : f32 to vector<2x32xf32>
    %160 = arith.addf %159, %158 : vector<2x32xf32>
    %161 = arith.divf %159, %160 : vector<2x32xf32>
    %162 = vector.extract_strided_slice %149 {offsets = [0, 64], sizes = [2, 32], strides = [1, 1]} : vector<2x128xf32> to vector<2x32xf32>
    %163 = math.tanh %162 : vector<2x32xf32>
    %164 = vector.extract_strided_slice %149 {offsets = [0, 96], sizes = [2, 32], strides = [1, 1]} : vector<2x128xf32> to vector<2x32xf32>
    %165 = arith.negf %164 : vector<2x32xf32>
    %166 = math.exp %165 : vector<2x32xf32>
    %cst_49 = arith.constant 1.000000e+00 : f32
    %167 = vector.broadcast %cst_49 : f32 to vector<2x32xf32>
    %168 = arith.addf %167, %166 : vector<2x32xf32>
    %169 = arith.divf %167, %168 : vector<2x32xf32>
    %170 = arith.mulf %161, %107 : vector<2x32xf32>
    %171 = arith.mulf %155, %163 : vector<2x32xf32>
    %172 = arith.addf %170, %171 : vector<2x32xf32>
    %173 = math.tanh %172 : vector<2x32xf32>
    %174 = arith.mulf %169, %173 : vector<2x32xf32>
    %175 = arith.truncf %174 : vector<2x32xf32> to vector<2x32xbf16>
    %cst_50 = arith.constant dense<0.000000e+00> : vector<2x128xf32>
    %176 = tpu.matmul %175, %2, %cst_50 {dimension_numbers = #tpu.dot_dimension_numbers<[1], [0], [0], [1], [0, 0, 1, 1], [], []>} : vector<2x32xbf16>, vector<32x128xbf16>, vector<2x128xf32> -> vector<2x128xf32>
    %177 = arith.truncf %141 : vector<2x32xf32> to vector<2x32xbf16>
    %cst_51 = arith.constant dense<0.000000e+00> : vector<2x128xf32>
    %178 = tpu.matmul %177, %3, %cst_51 {dimension_numbers = #tpu.dot_dimension_numbers<[1], [0], [0], [1], [0, 0, 1, 1], [], []>} : vector<2x32xbf16>, vector<32x128xbf16>, vector<2x128xf32> -> vector<2x128xf32>
    %179 = arith.addf %176, %178 : vector<2x128xf32>
    %180 = vector.broadcast %6 : vector<1x128xf32> to vector<2x128xf32>
    %181 = arith.addf %179, %180 : vector<2x128xf32>
    %182 = vector.extract_strided_slice %181 {offsets = [0, 0], sizes = [2, 32], strides = [1, 1]} : vector<2x128xf32> to vector<2x32xf32>
    %183 = arith.negf %182 : vector<2x32xf32>
    %184 = math.exp %183 : vector<2x32xf32>
    %cst_52 = arith.constant 1.000000e+00 : f32
    %185 = vector.broadcast %cst_52 : f32 to vector<2x32xf32>
    %186 = arith.addf %185, %184 : vector<2x32xf32>
    %187 = arith.divf %185, %186 : vector<2x32xf32>
    %188 = vector.extract_strided_slice %181 {offsets = [0, 32], sizes = [2, 32], strides = [1, 1]} : vector<2x128xf32> to vector<2x32xf32>
    %189 = arith.negf %188 : vector<2x32xf32>
    %190 = math.exp %189 : vector<2x32xf32>
    %cst_53 = arith.constant 1.000000e+00 : f32
    %191 = vector.broadcast %cst_53 : f32 to vector<2x32xf32>
    %192 = arith.addf %191, %190 : vector<2x32xf32>
    %193 = arith.divf %191, %192 : vector<2x32xf32>
    %194 = vector.extract_strided_slice %181 {offsets = [0, 64], sizes = [2, 32], strides = [1, 1]} : vector<2x128xf32> to vector<2x32xf32>
    %195 = math.tanh %194 : vector<2x32xf32>
    %196 = vector.extract_strided_slice %181 {offsets = [0, 96], sizes = [2, 32], strides = [1, 1]} : vector<2x128xf32> to vector<2x32xf32>
    %197 = arith.negf %196 : vector<2x32xf32>
    %198 = math.exp %197 : vector<2x32xf32>
    %cst_54 = arith.constant 1.000000e+00 : f32
    %199 = vector.broadcast %cst_54 : f32 to vector<2x32xf32>
    %200 = arith.addf %199, %198 : vector<2x32xf32>
    %201 = arith.divf %199, %200 : vector<2x32xf32>
    %202 = arith.mulf %193, %139 : vector<2x32xf32>
    %203 = arith.mulf %187, %195 : vector<2x32xf32>
    %204 = arith.addf %202, %203 : vector<2x32xf32>
    %205 = math.tanh %204 : vector<2x32xf32>
    %206 = arith.mulf %201, %205 : vector<2x32xf32>
    %c3 = arith.constant 3 : index
    %c0_55 = arith.constant 0 : index
    %c0_56 = arith.constant 0 : index
    %207 = vector.load %arg1[%c3, %c0_55, %c0_56] : memref<5x2x32xbf16, #tpu.memory_space<vmem>>, vector<1x2x32xbf16>
    %208 = vector.shape_cast %207 : vector<1x2x32xbf16> to vector<2x32xbf16>
    %cst_57 = arith.constant dense<0.000000e+00> : vector<2x128xf32>
    %209 = tpu.matmul %208, %0, %cst_57 {dimension_numbers = #tpu.dot_dimension_numbers<[1], [0], [0], [1], [0, 0, 1, 1], [], []>} : vector<2x32xbf16>, vector<32x128xbf16>, vector<2x128xf32> -> vector<2x128xf32>
    %210 = arith.truncf %174 : vector<2x32xf32> to vector<2x32xbf16>
    %cst_58 = arith.constant dense<0.000000e+00> : vector<2x128xf32>
    %211 = tpu.matmul %210, %1, %cst_58 {dimension_numbers = #tpu.dot_dimension_numbers<[1], [0], [0], [1], [0, 0, 1, 1], [], []>} : vector<2x32xbf16>, vector<32x128xbf16>, vector<2x128xf32> -> vector<2x128xf32>
    %212 = arith.addf %209, %211 : vector<2x128xf32>
    %213 = vector.broadcast %5 : vector<1x128xf32> to vector<2x128xf32>
    %214 = arith.addf %212, %213 : vector<2x128xf32>
    %215 = vector.extract_strided_slice %214 {offsets = [0, 0], sizes = [2, 32], strides = [1, 1]} : vector<2x128xf32> to vector<2x32xf32>
    %216 = arith.negf %215 : vector<2x32xf32>
    %217 = math.exp %216 : vector<2x32xf32>
    %cst_59 = arith.constant 1.000000e+00 : f32
    %218 = vector.broadcast %cst_59 : f32 to vector<2x32xf32>
    %219 = arith.addf %218, %217 : vector<2x32xf32>
    %220 = arith.divf %218, %219 : vector<2x32xf32>
    %221 = vector.extract_strided_slice %214 {offsets = [0, 32], sizes = [2, 32], strides = [1, 1]} : vector<2x128xf32> to vector<2x32xf32>
    %222 = arith.negf %221 : vector<2x32xf32>
    %223 = math.exp %222 : vector<2x32xf32>
    %cst_60 = arith.constant 1.000000e+00 : f32
    %224 = vector.broadcast %cst_60 : f32 to vector<2x32xf32>
    %225 = arith.addf %224, %223 : vector<2x32xf32>
    %226 = arith.divf %224, %225 : vector<2x32xf32>
    %227 = vector.extract_strided_slice %214 {offsets = [0, 64], sizes = [2, 32], strides = [1, 1]} : vector<2x128xf32> to vector<2x32xf32>
    %228 = math.tanh %227 : vector<2x32xf32>
    %229 = vector.extract_strided_slice %214 {offsets = [0, 96], sizes = [2, 32], strides = [1, 1]} : vector<2x128xf32> to vector<2x32xf32>
    %230 = arith.negf %229 : vector<2x32xf32>
    %231 = math.exp %230 : vector<2x32xf32>
    %cst_61 = arith.constant 1.000000e+00 : f32
    %232 = vector.broadcast %cst_61 : f32 to vector<2x32xf32>
    %233 = arith.addf %232, %231 : vector<2x32xf32>
    %234 = arith.divf %232, %233 : vector<2x32xf32>
    %235 = arith.mulf %226, %172 : vector<2x32xf32>
    %236 = arith.mulf %220, %228 : vector<2x32xf32>
    %237 = arith.addf %235, %236 : vector<2x32xf32>
    %238 = math.tanh %237 : vector<2x32xf32>
    %239 = arith.mulf %234, %238 : vector<2x32xf32>
    %240 = arith.truncf %239 : vector<2x32xf32> to vector<2x32xbf16>
    %cst_62 = arith.constant dense<0.000000e+00> : vector<2x128xf32>
    %241 = tpu.matmul %240, %2, %cst_62 {dimension_numbers = #tpu.dot_dimension_numbers<[1], [0], [0], [1], [0, 0, 1, 1], [], []>} : vector<2x32xbf16>, vector<32x128xbf16>, vector<2x128xf32> -> vector<2x128xf32>
    %242 = arith.truncf %206 : vector<2x32xf32> to vector<2x32xbf16>
    %cst_63 = arith.constant dense<0.000000e+00> : vector<2x128xf32>
    %243 = tpu.matmul %242, %3, %cst_63 {dimension_numbers = #tpu.dot_dimension_numbers<[1], [0], [0], [1], [0, 0, 1, 1], [], []>} : vector<2x32xbf16>, vector<32x128xbf16>, vector<2x128xf32> -> vector<2x128xf32>
    %244 = arith.addf %241, %243 : vector<2x128xf32>
    %245 = vector.broadcast %6 : vector<1x128xf32> to vector<2x128xf32>
    %246 = arith.addf %244, %245 : vector<2x128xf32>
    %247 = vector.extract_strided_slice %246 {offsets = [0, 0], sizes = [2, 32], strides = [1, 1]} : vector<2x128xf32> to vector<2x32xf32>
    %248 = arith.negf %247 : vector<2x32xf32>
    %249 = math.exp %248 : vector<2x32xf32>
    %cst_64 = arith.constant 1.000000e+00 : f32
    %250 = vector.broadcast %cst_64 : f32 to vector<2x32xf32>
    %251 = arith.addf %250, %249 : vector<2x32xf32>
    %252 = arith.divf %250, %251 : vector<2x32xf32>
    %253 = vector.extract_strided_slice %246 {offsets = [0, 32], sizes = [2, 32], strides = [1, 1]} : vector<2x128xf32> to vector<2x32xf32>
    %254 = arith.negf %253 : vector<2x32xf32>
    %255 = math.exp %254 : vector<2x32xf32>
    %cst_65 = arith.constant 1.000000e+00 : f32
    %256 = vector.broadcast %cst_65 : f32 to vector<2x32xf32>
    %257 = arith.addf %256, %255 : vector<2x32xf32>
    %258 = arith.divf %256, %257 : vector<2x32xf32>
    %259 = vector.extract_strided_slice %246 {offsets = [0, 64], sizes = [2, 32], strides = [1, 1]} : vector<2x128xf32> to vector<2x32xf32>
    %260 = math.tanh %259 : vector<2x32xf32>
    %261 = vector.extract_strided_slice %246 {offsets = [0, 96], sizes = [2, 32], strides = [1, 1]} : vector<2x128xf32> to vector<2x32xf32>
    %262 = arith.negf %261 : vector<2x32xf32>
    %263 = math.exp %262 : vector<2x32xf32>
    %cst_66 = arith.constant 1.000000e+00 : f32
    %264 = vector.broadcast %cst_66 : f32 to vector<2x32xf32>
    %265 = arith.addf %264, %263 : vector<2x32xf32>
    %266 = arith.divf %264, %265 : vector<2x32xf32>
    %267 = arith.mulf %258, %204 : vector<2x32xf32>
    %268 = arith.mulf %252, %260 : vector<2x32xf32>
    %269 = arith.addf %267, %268 : vector<2x32xf32>
    %270 = math.tanh %269 : vector<2x32xf32>
    %271 = arith.mulf %266, %270 : vector<2x32xf32>
    %c4 = arith.constant 4 : index
    %c0_67 = arith.constant 0 : index
    %c0_68 = arith.constant 0 : index
    %272 = vector.load %arg1[%c4, %c0_67, %c0_68] : memref<5x2x32xbf16, #tpu.memory_space<vmem>>, vector<1x2x32xbf16>
    %273 = vector.shape_cast %272 : vector<1x2x32xbf16> to vector<2x32xbf16>
    %cst_69 = arith.constant dense<0.000000e+00> : vector<2x128xf32>
    %274 = tpu.matmul %273, %0, %cst_69 {dimension_numbers = #tpu.dot_dimension_numbers<[1], [0], [0], [1], [0, 0, 1, 1], [], []>} : vector<2x32xbf16>, vector<32x128xbf16>, vector<2x128xf32> -> vector<2x128xf32>
    %275 = arith.truncf %239 : vector<2x32xf32> to vector<2x32xbf16>
    %cst_70 = arith.constant dense<0.000000e+00> : vector<2x128xf32>
    %276 = tpu.matmul %275, %1, %cst_70 {dimension_numbers = #tpu.dot_dimension_numbers<[1], [0], [0], [1], [0, 0, 1, 1], [], []>} : vector<2x32xbf16>, vector<32x128xbf16>, vector<2x128xf32> -> vector<2x128xf32>
    %277 = arith.addf %274, %276 : vector<2x128xf32>
    %278 = vector.broadcast %5 : vector<1x128xf32> to vector<2x128xf32>
    %279 = arith.addf %277, %278 : vector<2x128xf32>
    %280 = vector.extract_strided_slice %279 {offsets = [0, 0], sizes = [2, 32], strides = [1, 1]} : vector<2x128xf32> to vector<2x32xf32>
    %281 = arith.negf %280 : vector<2x32xf32>
    %282 = math.exp %281 : vector<2x32xf32>
    %cst_71 = arith.constant 1.000000e+00 : f32
    %283 = vector.broadcast %cst_71 : f32 to vector<2x32xf32>
    %284 = arith.addf %283, %282 : vector<2x32xf32>
    %285 = arith.divf %283, %284 : vector<2x32xf32>
    %286 = vector.extract_strided_slice %279 {offsets = [0, 32], sizes = [2, 32], strides = [1, 1]} : vector<2x128xf32> to vector<2x32xf32>
    %287 = arith.negf %286 : vector<2x32xf32>
    %288 = math.exp %287 : vector<2x32xf32>
    %cst_72 = arith.constant 1.000000e+00 : f32
    %289 = vector.broadcast %cst_72 : f32 to vector<2x32xf32>
    %290 = arith.addf %289, %288 : vector<2x32xf32>
    %291 = arith.divf %289, %290 : vector<2x32xf32>
    %292 = vector.extract_strided_slice %279 {offsets = [0, 64], sizes = [2, 32], strides = [1, 1]} : vector<2x128xf32> to vector<2x32xf32>
    %293 = math.tanh %292 : vector<2x32xf32>
    %294 = vector.extract_strided_slice %279 {offsets = [0, 96], sizes = [2, 32], strides = [1, 1]} : vector<2x128xf32> to vector<2x32xf32>
    %295 = arith.negf %294 : vector<2x32xf32>
    %296 = math.exp %295 : vector<2x32xf32>
    %cst_73 = arith.constant 1.000000e+00 : f32
    %297 = vector.broadcast %cst_73 : f32 to vector<2x32xf32>
    %298 = arith.addf %297, %296 : vector<2x32xf32>
    %299 = arith.divf %297, %298 : vector<2x32xf32>
    %300 = arith.mulf %291, %237 : vector<2x32xf32>
    %301 = arith.mulf %285, %293 : vector<2x32xf32>
    %302 = arith.addf %300, %301 : vector<2x32xf32>
    %303 = math.tanh %302 : vector<2x32xf32>
    %304 = arith.mulf %299, %303 : vector<2x32xf32>
    %305 = arith.truncf %304 : vector<2x32xf32> to vector<2x32xbf16>
    %cst_74 = arith.constant dense<0.000000e+00> : vector<2x128xf32>
    %306 = tpu.matmul %305, %2, %cst_74 {dimension_numbers = #tpu.dot_dimension_numbers<[1], [0], [0], [1], [0, 0, 1, 1], [], []>} : vector<2x32xbf16>, vector<32x128xbf16>, vector<2x128xf32> -> vector<2x128xf32>
    %307 = arith.truncf %271 : vector<2x32xf32> to vector<2x32xbf16>
    %cst_75 = arith.constant dense<0.000000e+00> : vector<2x128xf32>
    %308 = tpu.matmul %307, %3, %cst_75 {dimension_numbers = #tpu.dot_dimension_numbers<[1], [0], [0], [1], [0, 0, 1, 1], [], []>} : vector<2x32xbf16>, vector<32x128xbf16>, vector<2x128xf32> -> vector<2x128xf32>
    %309 = arith.addf %306, %308 : vector<2x128xf32>
    %310 = vector.broadcast %6 : vector<1x128xf32> to vector<2x128xf32>
    %311 = arith.addf %309, %310 : vector<2x128xf32>
    %312 = vector.extract_strided_slice %311 {offsets = [0, 0], sizes = [2, 32], strides = [1, 1]} : vector<2x128xf32> to vector<2x32xf32>
    %313 = arith.negf %312 : vector<2x32xf32>
    %314 = math.exp %313 : vector<2x32xf32>
    %cst_76 = arith.constant 1.000000e+00 : f32
    %315 = vector.broadcast %cst_76 : f32 to vector<2x32xf32>
    %316 = arith.addf %315, %314 : vector<2x32xf32>
    %317 = arith.divf %315, %316 : vector<2x32xf32>
    %318 = vector.extract_strided_slice %311 {offsets = [0, 32], sizes = [2, 32], strides = [1, 1]} : vector<2x128xf32> to vector<2x32xf32>
    %319 = arith.negf %318 : vector<2x32xf32>
    %320 = math.exp %319 : vector<2x32xf32>
    %cst_77 = arith.constant 1.000000e+00 : f32
    %321 = vector.broadcast %cst_77 : f32 to vector<2x32xf32>
    %322 = arith.addf %321, %320 : vector<2x32xf32>
    %323 = arith.divf %321, %322 : vector<2x32xf32>
    %324 = vector.extract_strided_slice %311 {offsets = [0, 64], sizes = [2, 32], strides = [1, 1]} : vector<2x128xf32> to vector<2x32xf32>
    %325 = math.tanh %324 : vector<2x32xf32>
    %326 = vector.extract_strided_slice %311 {offsets = [0, 96], sizes = [2, 32], strides = [1, 1]} : vector<2x128xf32> to vector<2x32xf32>
    %327 = arith.negf %326 : vector<2x32xf32>
    %328 = math.exp %327 : vector<2x32xf32>
    %cst_78 = arith.constant 1.000000e+00 : f32
    %329 = vector.broadcast %cst_78 : f32 to vector<2x32xf32>
    %330 = arith.addf %329, %328 : vector<2x32xf32>
    %331 = arith.divf %329, %330 : vector<2x32xf32>
    %332 = arith.mulf %323, %269 : vector<2x32xf32>
    %333 = arith.mulf %317, %325 : vector<2x32xf32>
    %334 = arith.addf %332, %333 : vector<2x32xf32>
    %335 = math.tanh %334 : vector<2x32xf32>
    %336 = arith.mulf %331, %335 : vector<2x32xf32>
    %337 = tpu.concatenate %76, %141, %206, %271, %336 in 0 : vector<2x32xf32>, vector<2x32xf32>, vector<2x32xf32>, vector<2x32xf32>, vector<2x32xf32> -> vector<10x32xf32>
    %338 = arith.truncf %337 : vector<10x32xf32> to vector<10x32xbf16>
    %cst_79 = arith.constant dense<0.000000e+00> : vector<10x128xf32>
    %339 = tpu.matmul %338, %4, %cst_79 {dimension_numbers = #tpu.dot_dimension_numbers<[1], [0], [0], [1], [0, 0, 1, 1], [], []>} : vector<10x32xbf16>, vector<32x128xbf16>, vector<10x128xf32> -> vector<10x128xf32>
    %340 = vector.broadcast %7 : vector<1x128xf32> to vector<10x128xf32>
    %341 = arith.addf %339, %340 : vector<10x128xf32>
    %342 = vector.shape_cast %341 : vector<10x128xf32> to vector<5x2x128xf32>
    %c0_80 = arith.constant 0 : index
    %c0_81 = arith.constant 0 : index
    %c0_82 = arith.constant 0 : index
    %343 = vector.load %arg10[%c0_80, %c0_81, %c0_82] : memref<5x2x128xf32, #tpu.memory_space<vmem>>, vector<5x2x128xf32>
    tpu.vector_store %arg10[%c0_80, %c0_81, %c0_82], %342 {strides = array<i32>} : memref<5x2x128xf32, #tpu.memory_space<vmem>>, vector<5x2x128xf32>,
    return
  }
  func.func @transform_0(%arg0: i32) -> (i32, i32, i32) {
    %c0_i32 = arith.constant 0 : i32
    %c0_i32_0 = arith.constant 0 : i32
    %c0_i32_1 = arith.constant 0 : i32
    return %c0_i32, %arg0, %c0_i32_0 : i32, i32, i32
  }
  func.func @transform_1(%arg0: i32) -> (i32, i32) {
    %c0_i32 = arith.constant 0 : i32
    %c0_i32_0 = arith.constant 0 : i32
    %c0_i32_1 = arith.constant 0 : i32
    return %c0_i32, %c0_i32_0 : i32, i32
  }
  func.func @transform_2(%arg0: i32) -> (i32, i32) {
    %c0_i32 = arith.constant 0 : i32
    %c0_i32_0 = arith.constant 0 : i32
    %c0_i32_1 = arith.constant 0 : i32
    return %c0_i32, %c0_i32_0 : i32, i32
  }
  func.func @transform_3(%arg0: i32) -> (i32, i32) {
    %c0_i32 = arith.constant 0 : i32
    %c0_i32_0 = arith.constant 0 : i32
    %c0_i32_1 = arith.constant 0 : i32
    return %c0_i32, %c0_i32_0 : i32, i32
  }
  func.func @transform_4(%arg0: i32) -> (i32, i32) {
    %c0_i32 = arith.constant 0 : i32
    %c0_i32_0 = arith.constant 0 : i32
    %c0_i32_1 = arith.constant 0 : i32
    return %c0_i32, %c0_i32_0 : i32, i32
  }
  func.func @transform_5(%arg0: i32) -> (i32, i32) {
    %c0_i32 = arith.constant 0 : i32
    %c0_i32_0 = arith.constant 0 : i32
    %c0_i32_1 = arith.constant 0 : i32
    return %c0_i32, %c0_i32_0 : i32, i32
  }
  func.func @transform_6(%arg0: i32) -> (i32, i32) {
    %c0_i32 = arith.constant 0 : i32
    %c0_i32_0 = arith.constant 0 : i32
    %c0_i32_1 = arith.constant 0 : i32
    return %c0_i32, %c0_i32_0 : i32, i32
  }
  func.func @transform_7(%arg0: i32) -> (i32, i32) {
    %c0_i32 = arith.constant 0 : i32
    %c0_i32_0 = arith.constant 0 : i32
    %c0_i32_1 = arith.constant 0 : i32
    return %c0_i32, %c0_i32_0 : i32, i32
  }
  func.func @transform_8(%arg0: i32) -> (i32, i32) {
    %c0_i32 = arith.constant 0 : i32
    %c0_i32_0 = arith.constant 0 : i32
    %c0_i32_1 = arith.constant 0 : i32
    return %c0_i32, %c0_i32_0 : i32, i32
  }
  func.func @transform_9(%arg0: i32) -> (i32, i32, i32) {
    %c0_i32 = arith.constant 0 : i32
    %c0_i32_0 = arith.constant 0 : i32
    %c0_i32_1 = arith.constant 0 : i32
    return %c0_i32, %arg0, %c0_i32_0 : i32, i32, i32
  }
}

module attributes {stable_mosaic.version = 11 : i64} {
  func.func @imitator_kernel(%arg0: i32, %arg1: memref<5x2x32xbf16, #tpu.memory_space<vmem>>, %arg2: memref<32x128xbf16, #tpu.memory_space<vmem>>, %arg3: memref<32x128xbf16, #tpu.memory_space<vmem>>, %arg4: memref<1x128xf32, #tpu.memory_space<vmem>>, %arg5: memref<32x128xbf16, #tpu.memory_space<vmem>>, %arg6: memref<32x128xbf16, #tpu.memory_space<vmem>>, %arg7: memref<1x128xf32, #tpu.memory_space<vmem>>, %arg8: memref<32x128xbf16, #tpu.memory_space<vmem>>, %arg9: memref<1x128xf32, #tpu.memory_space<vmem>>, %arg10: memref<5x2x128xf32, #tpu.memory_space<vmem>>) attributes {dimension_semantics = [#tpu.dimension_semantics<parallel>], iteration_bounds = array<i64: 1>, scalar_prefetch = 0 : i64, scratch_operands = 0 : i64, tpu.core_type = #tpu.core_type<tc>, window_params = [{transform_indices = @transform_0, window_bounds = array<i64: 5, 2, 32>}, {pipeline_mode = #tpu.pipeline_mode<synchronous>, transform_indices = @transform_1, window_bounds = array<i64: 32, 128>}, {pipeline_mode = #tpu.pipeline_mode<synchronous>, transform_indices = @transform_2, window_bounds = array<i64: 32, 128>}, {pipeline_mode = #tpu.pipeline_mode<synchronous>, transform_indices = @transform_3, window_bounds = array<i64: 1, 128>}, {pipeline_mode = #tpu.pipeline_mode<synchronous>, transform_indices = @transform_4, window_bounds = array<i64: 32, 128>}, {pipeline_mode = #tpu.pipeline_mode<synchronous>, transform_indices = @transform_5, window_bounds = array<i64: 32, 128>}, {pipeline_mode = #tpu.pipeline_mode<synchronous>, transform_indices = @transform_6, window_bounds = array<i64: 1, 128>}, {pipeline_mode = #tpu.pipeline_mode<synchronous>, transform_indices = @transform_7, window_bounds = array<i64: 32, 128>}, {pipeline_mode = #tpu.pipeline_mode<synchronous>, transform_indices = @transform_8, window_bounds = array<i64: 1, 128>}, {transform_indices = @transform_9, window_bounds = array<i64: 5, 2, 128>}]} {
    %c0 = arith.constant 0 : index
    %c0_0 = arith.constant 0 : index
    %0 = vector.load %arg2[%c0, %c0_0] : memref<32x128xbf16, #tpu.memory_space<vmem>>, vector<32x128xbf16>
    %c0_1 = arith.constant 0 : index
    %c0_2 = arith.constant 0 : index
    %1 = vector.load %arg3[%c0_1, %c0_2] : memref<32x128xbf16, #tpu.memory_space<vmem>>, vector<32x128xbf16>
    %c0_3 = arith.constant 0 : index
    %c0_4 = arith.constant 0 : index
    %2 = vector.load %arg5[%c0_3, %c0_4] : memref<32x128xbf16, #tpu.memory_space<vmem>>, vector<32x128xbf16>
    %c0_5 = arith.constant 0 : index
    %c0_6 = arith.constant 0 : index
    %3 = vector.load %arg6[%c0_5, %c0_6] : memref<32x128xbf16, #tpu.memory_space<vmem>>, vector<32x128xbf16>
    %c0_7 = arith.constant 0 : index
    %c0_8 = arith.constant 0 : index
    %4 = vector.load %arg8[%c0_7, %c0_8] : memref<32x128xbf16, #tpu.memory_space<vmem>>, vector<32x128xbf16>
    %c0_9 = arith.constant 0 : index
    %c0_10 = arith.constant 0 : index
    %5 = vector.load %arg4[%c0_9, %c0_10] : memref<1x128xf32, #tpu.memory_space<vmem>>, vector<1x128xf32>
    %c0_11 = arith.constant 0 : index
    %c0_12 = arith.constant 0 : index
    %6 = vector.load %arg7[%c0_11, %c0_12] : memref<1x128xf32, #tpu.memory_space<vmem>>, vector<1x128xf32>
    %c0_13 = arith.constant 0 : index
    %c0_14 = arith.constant 0 : index
    %7 = vector.load %arg9[%c0_13, %c0_14] : memref<1x128xf32, #tpu.memory_space<vmem>>, vector<1x128xf32>
    %cst = arith.constant 0.000000e+00 : f32
    %8 = vector.broadcast %cst : f32 to vector<2x32xf32>
    %cst_15 = arith.constant 0.000000e+00 : f32
    %9 = vector.broadcast %cst_15 : f32 to vector<2x32xf32>
    %cst_16 = arith.constant 0.000000e+00 : f32
    %10 = vector.broadcast %cst_16 : f32 to vector<2x32xf32>
    %cst_17 = arith.constant 0.000000e+00 : f32
    %11 = vector.broadcast %cst_17 : f32 to vector<2x32xf32>
    %c0_18 = arith.constant 0 : index
    %c0_19 = arith.constant 0 : index
    %c0_20 = arith.constant 0 : index
    %12 = vector.load %arg1[%c0_18, %c0_19, %c0_20] : memref<5x2x32xbf16, #tpu.memory_space<vmem>>, vector<1x2x32xbf16>
    %13 = vector.shape_cast %12 : vector<1x2x32xbf16> to vector<2x32xbf16>
    %cst_21 = arith.constant dense<0.000000e+00> : vector<2x128xf32>
    %14 = tpu.matmul %13, %0, %cst_21 {dimension_numbers = #tpu.dot_dimension_numbers<[1], [0], [0], [1], [0, 0, 1, 1], [], []>} : vector<2x32xbf16>, vector<32x128xbf16>, vector<2x128xf32> -> vector<2x128xf32>
    %15 = arith.truncf %8 : vector<2x32xf32> to vector<2x32xbf16>
    %cst_22 = arith.constant dense<0.000000e+00> : vector<2x128xf32>
    %16 = tpu.matmul %15, %1, %cst_22 {dimension_numbers = #tpu.dot_dimension_numbers<[1], [0], [0], [1], [0, 0, 1, 1], [], []>} : vector<2x32xbf16>, vector<32x128xbf16>, vector<2x128xf32> -> vector<2x128xf32>
    %17 = arith.addf %14, %16 : vector<2x128xf32>
    %18 = vector.broadcast %5 : vector<1x128xf32> to vector<2x128xf32>
    %19 = arith.addf %17, %18 : vector<2x128xf32>
    %20 = vector.extract_strided_slice %19 {offsets = [0, 0], sizes = [2, 32], strides = [1, 1]} : vector<2x128xf32> to vector<2x32xf32>
    %21 = arith.negf %20 : vector<2x32xf32>
    %22 = math.exp %21 : vector<2x32xf32>
    %cst_23 = arith.constant 1.000000e+00 : f32
    %23 = vector.broadcast %cst_23 : f32 to vector<2x32xf32>
    %24 = arith.addf %23, %22 : vector<2x32xf32>
    %25 = arith.divf %23, %24 : vector<2x32xf32>
    %26 = vector.extract_strided_slice %19 {offsets = [0, 32], sizes = [2, 32], strides = [1, 1]} : vector<2x128xf32> to vector<2x32xf32>
    %27 = arith.negf %26 : vector<2x32xf32>
    %28 = math.exp %27 : vector<2x32xf32>
    %cst_24 = arith.constant 1.000000e+00 : f32
    %29 = vector.broadcast %cst_24 : f32 to vector<2x32xf32>
    %30 = arith.addf %29, %28 : vector<2x32xf32>
    %31 = arith.divf %29, %30 : vector<2x32xf32>
    %32 = vector.extract_strided_slice %19 {offsets = [0, 64], sizes = [2, 32], strides = [1, 1]} : vector<2x128xf32> to vector<2x32xf32>
    %33 = math.tanh %32 : vector<2x32xf32>
    %34 = vector.extract_strided_slice %19 {offsets = [0, 96], sizes = [2, 32], strides = [1, 1]} : vector<2x128xf32> to vector<2x32xf32>
    %35 = arith.negf %34 : vector<2x32xf32>
    %36 = math.exp %35 : vector<2x32xf32>
    %cst_25 = arith.constant 1.000000e+00 : f32
    %37 = vector.broadcast %cst_25 : f32 to vector<2x32xf32>
    %38 = arith.addf %37, %36 : vector<2x32xf32>
    %39 = arith.divf %37, %38 : vector<2x32xf32>
    %40 = arith.mulf %31, %9 : vector<2x32xf32>
    %41 = arith.mulf %25, %33 : vector<2x32xf32>
    %42 = arith.addf %40, %41 : vector<2x32xf32>
    %43 = math.tanh %42 : vector<2x32xf32>
    %44 = arith.mulf %39, %43 : vector<2x32xf32>
    %45 = arith.truncf %44 : vector<2x32xf32> to vector<2x32xbf16>
    %cst_26 = arith.constant dense<0.000000e+00> : vector<2x128xf32>
    %46 = tpu.matmul %45, %2, %cst_26 {dimension_numbers = #tpu.dot_dimension_numbers<[1], [0], [0], [1], [0, 0, 1, 1], [], []>} : vector<2x32xbf16>, vector<32x128xbf16>, vector<2x128xf32> -> vector<2x128xf32>
    %47 = arith.truncf %10 : vector<2x32xf32> to vector<2x32xbf16>
    %cst_27 = arith.constant dense<0.000000e+00> : vector<2x128xf32>
    %48 = tpu.matmul %47, %3, %cst_27 {dimension_numbers = #tpu.dot_dimension_numbers<[1], [0], [0], [1], [0, 0, 1, 1], [], []>} : vector<2x32xbf16>, vector<32x128xbf16>, vector<2x128xf32> -> vector<2x128xf32>
    %49 = arith.addf %46, %48 : vector<2x128xf32>
    %50 = vector.broadcast %6 : vector<1x128xf32> to vector<2x128xf32>
    %51 = arith.addf %49, %50 : vector<2x128xf32>
    %52 = vector.extract_strided_slice %51 {offsets = [0, 0], sizes = [2, 32], strides = [1, 1]} : vector<2x128xf32> to vector<2x32xf32>
    %53 = arith.negf %52 : vector<2x32xf32>
    %54 = math.exp %53 : vector<2x32xf32>
    %cst_28 = arith.constant 1.000000e+00 : f32
    %55 = vector.broadcast %cst_28 : f32 to vector<2x32xf32>
    %56 = arith.addf %55, %54 : vector<2x32xf32>
    %57 = arith.divf %55, %56 : vector<2x32xf32>
    %58 = vector.extract_strided_slice %51 {offsets = [0, 32], sizes = [2, 32], strides = [1, 1]} : vector<2x128xf32> to vector<2x32xf32>
    %59 = arith.negf %58 : vector<2x32xf32>
    %60 = math.exp %59 : vector<2x32xf32>
    %cst_29 = arith.constant 1.000000e+00 : f32
    %61 = vector.broadcast %cst_29 : f32 to vector<2x32xf32>
    %62 = arith.addf %61, %60 : vector<2x32xf32>
    %63 = arith.divf %61, %62 : vector<2x32xf32>
    %64 = vector.extract_strided_slice %51 {offsets = [0, 64], sizes = [2, 32], strides = [1, 1]} : vector<2x128xf32> to vector<2x32xf32>
    %65 = math.tanh %64 : vector<2x32xf32>
    %66 = vector.extract_strided_slice %51 {offsets = [0, 96], sizes = [2, 32], strides = [1, 1]} : vector<2x128xf32> to vector<2x32xf32>
    %67 = arith.negf %66 : vector<2x32xf32>
    %68 = math.exp %67 : vector<2x32xf32>
    %cst_30 = arith.constant 1.000000e+00 : f32
    %69 = vector.broadcast %cst_30 : f32 to vector<2x32xf32>
    %70 = arith.addf %69, %68 : vector<2x32xf32>
    %71 = arith.divf %69, %70 : vector<2x32xf32>
    %72 = arith.mulf %63, %11 : vector<2x32xf32>
    %73 = arith.mulf %57, %65 : vector<2x32xf32>
    %74 = arith.addf %72, %73 : vector<2x32xf32>
    %75 = math.tanh %74 : vector<2x32xf32>
    %76 = arith.mulf %71, %75 : vector<2x32xf32>
    %c1 = arith.constant 1 : index
    %c0_31 = arith.constant 0 : index
    %c0_32 = arith.constant 0 : index
    %77 = vector.load %arg1[%c1, %c0_31, %c0_32] : memref<5x2x32xbf16, #tpu.memory_space<vmem>>, vector<1x2x32xbf16>
    %78 = vector.shape_cast %77 : vector<1x2x32xbf16> to vector<2x32xbf16>
    %cst_33 = arith.constant dense<0.000000e+00> : vector<2x128xf32>
    %79 = tpu.matmul %78, %0, %cst_33 {dimension_numbers = #tpu.dot_dimension_numbers<[1], [0], [0], [1], [0, 0, 1, 1], [], []>} : vector<2x32xbf16>, vector<32x128xbf16>, vector<2x128xf32> -> vector<2x128xf32>
    %80 = arith.truncf %44 : vector<2x32xf32> to vector<2x32xbf16>
    %cst_34 = arith.constant dense<0.000000e+00> : vector<2x128xf32>
    %81 = tpu.matmul %80, %1, %cst_34 {dimension_numbers = #tpu.dot_dimension_numbers<[1], [0], [0], [1], [0, 0, 1, 1], [], []>} : vector<2x32xbf16>, vector<32x128xbf16>, vector<2x128xf32> -> vector<2x128xf32>
    %82 = arith.addf %79, %81 : vector<2x128xf32>
    %83 = vector.broadcast %5 : vector<1x128xf32> to vector<2x128xf32>
    %84 = arith.addf %82, %83 : vector<2x128xf32>
    %85 = vector.extract_strided_slice %84 {offsets = [0, 0], sizes = [2, 32], strides = [1, 1]} : vector<2x128xf32> to vector<2x32xf32>
    %86 = arith.negf %85 : vector<2x32xf32>
    %87 = math.exp %86 : vector<2x32xf32>
    %cst_35 = arith.constant 1.000000e+00 : f32
    %88 = vector.broadcast %cst_35 : f32 to vector<2x32xf32>
    %89 = arith.addf %88, %87 : vector<2x32xf32>
    %90 = arith.divf %88, %89 : vector<2x32xf32>
    %91 = vector.extract_strided_slice %84 {offsets = [0, 32], sizes = [2, 32], strides = [1, 1]} : vector<2x128xf32> to vector<2x32xf32>
    %92 = arith.negf %91 : vector<2x32xf32>
    %93 = math.exp %92 : vector<2x32xf32>
    %cst_36 = arith.constant 1.000000e+00 : f32
    %94 = vector.broadcast %cst_36 : f32 to vector<2x32xf32>
    %95 = arith.addf %94, %93 : vector<2x32xf32>
    %96 = arith.divf %94, %95 : vector<2x32xf32>
    %97 = vector.extract_strided_slice %84 {offsets = [0, 64], sizes = [2, 32], strides = [1, 1]} : vector<2x128xf32> to vector<2x32xf32>
    %98 = math.tanh %97 : vector<2x32xf32>
    %99 = vector.extract_strided_slice %84 {offsets = [0, 96], sizes = [2, 32], strides = [1, 1]} : vector<2x128xf32> to vector<2x32xf32>
    %100 = arith.negf %99 : vector<2x32xf32>
    %101 = math.exp %100 : vector<2x32xf32>
    %cst_37 = arith.constant 1.000000e+00 : f32
    %102 = vector.broadcast %cst_37 : f32 to vector<2x32xf32>
    %103 = arith.addf %102, %101 : vector<2x32xf32>
    %104 = arith.divf %102, %103 : vector<2x32xf32>
    %105 = arith.mulf %96, %42 : vector<2x32xf32>
    %106 = arith.mulf %90, %98 : vector<2x32xf32>
    %107 = arith.addf %105, %106 : vector<2x32xf32>
    %108 = math.tanh %107 : vector<2x32xf32>
    %109 = arith.mulf %104, %108 : vector<2x32xf32>
    %110 = arith.truncf %109 : vector<2x32xf32> to vector<2x32xbf16>
    %cst_38 = arith.constant dense<0.000000e+00> : vector<2x128xf32>
    %111 = tpu.matmul %110, %2, %cst_38 {dimension_numbers = #tpu.dot_dimension_numbers<[1], [0], [0], [1], [0, 0, 1, 1], [], []>} : vector<2x32xbf16>, vector<32x128xbf16>, vector<2x128xf32> -> vector<2x128xf32>
    %112 = arith.truncf %76 : vector<2x32xf32> to vector<2x32xbf16>
    %cst_39 = arith.constant dense<0.000000e+00> : vector<2x128xf32>
    %113 = tpu.matmul %112, %3, %cst_39 {dimension_numbers = #tpu.dot_dimension_numbers<[1], [0], [0], [1], [0, 0, 1, 1], [], []>} : vector<2x32xbf16>, vector<32x128xbf16>, vector<2x128xf32> -> vector<2x128xf32>
    %114 = arith.addf %111, %113 : vector<2x128xf32>
    %115 = vector.broadcast %6 : vector<1x128xf32> to vector<2x128xf32>
    %116 = arith.addf %114, %115 : vector<2x128xf32>
    %117 = vector.extract_strided_slice %116 {offsets = [0, 0], sizes = [2, 32], strides = [1, 1]} : vector<2x128xf32> to vector<2x32xf32>
    %118 = arith.negf %117 : vector<2x32xf32>
    %119 = math.exp %118 : vector<2x32xf32>
    %cst_40 = arith.constant 1.000000e+00 : f32
    %120 = vector.broadcast %cst_40 : f32 to vector<2x32xf32>
    %121 = arith.addf %120, %119 : vector<2x32xf32>
    %122 = arith.divf %120, %121 : vector<2x32xf32>
    %123 = vector.extract_strided_slice %116 {offsets = [0, 32], sizes = [2, 32], strides = [1, 1]} : vector<2x128xf32> to vector<2x32xf32>
    %124 = arith.negf %123 : vector<2x32xf32>
    %125 = math.exp %124 : vector<2x32xf32>
    %cst_41 = arith.constant 1.000000e+00 : f32
    %126 = vector.broadcast %cst_41 : f32 to vector<2x32xf32>
    %127 = arith.addf %126, %125 : vector<2x32xf32>
    %128 = arith.divf %126, %127 : vector<2x32xf32>
    %129 = vector.extract_strided_slice %116 {offsets = [0, 64], sizes = [2, 32], strides = [1, 1]} : vector<2x128xf32> to vector<2x32xf32>
    %130 = math.tanh %129 : vector<2x32xf32>
    %131 = vector.extract_strided_slice %116 {offsets = [0, 96], sizes = [2, 32], strides = [1, 1]} : vector<2x128xf32> to vector<2x32xf32>
    %132 = arith.negf %131 : vector<2x32xf32>
    %133 = math.exp %132 : vector<2x32xf32>
    %cst_42 = arith.constant 1.000000e+00 : f32
    %134 = vector.broadcast %cst_42 : f32 to vector<2x32xf32>
    %135 = arith.addf %134, %133 : vector<2x32xf32>
    %136 = arith.divf %134, %135 : vector<2x32xf32>
    %137 = arith.mulf %128, %74 : vector<2x32xf32>
    %138 = arith.mulf %122, %130 : vector<2x32xf32>
    %139 = arith.addf %137, %138 : vector<2x32xf32>
    %140 = math.tanh %139 : vector<2x32xf32>
    %141 = arith.mulf %136, %140 : vector<2x32xf32>
    %c2 = arith.constant 2 : index
    %c0_43 = arith.constant 0 : index
    %c0_44 = arith.constant 0 : index
    %142 = vector.load %arg1[%c2, %c0_43, %c0_44] : memref<5x2x32xbf16, #tpu.memory_space<vmem>>, vector<1x2x32xbf16>
    %143 = vector.shape_cast %142 : vector<1x2x32xbf16> to vector<2x32xbf16>
    %cst_45 = arith.constant dense<0.000000e+00> : vector<2x128xf32>
    %144 = tpu.matmul %143, %0, %cst_45 {dimension_numbers = #tpu.dot_dimension_numbers<[1], [0], [0], [1], [0, 0, 1, 1], [], []>} : vector<2x32xbf16>, vector<32x128xbf16>, vector<2x128xf32> -> vector<2x128xf32>
    %145 = arith.truncf %109 : vector<2x32xf32> to vector<2x32xbf16>
    %cst_46 = arith.constant dense<0.000000e+00> : vector<2x128xf32>
    %146 = tpu.matmul %145, %1, %cst_46 {dimension_numbers = #tpu.dot_dimension_numbers<[1], [0], [0], [1], [0, 0, 1, 1], [], []>} : vector<2x32xbf16>, vector<32x128xbf16>, vector<2x128xf32> -> vector<2x128xf32>
    %147 = arith.addf %144, %146 : vector<2x128xf32>
    %148 = vector.broadcast %5 : vector<1x128xf32> to vector<2x128xf32>
    %149 = arith.addf %147, %148 : vector<2x128xf32>
    %150 = vector.extract_strided_slice %149 {offsets = [0, 0], sizes = [2, 32], strides = [1, 1]} : vector<2x128xf32> to vector<2x32xf32>
    %151 = arith.negf %150 : vector<2x32xf32>
    %152 = math.exp %151 : vector<2x32xf32>
    %cst_47 = arith.constant 1.000000e+00 : f32
    %153 = vector.broadcast %cst_47 : f32 to vector<2x32xf32>
    %154 = arith.addf %153, %152 : vector<2x32xf32>
    %155 = arith.divf %153, %154 : vector<2x32xf32>
    %156 = vector.extract_strided_slice %149 {offsets = [0, 32], sizes = [2, 32], strides = [1, 1]} : vector<2x128xf32> to vector<2x32xf32>
    %157 = arith.negf %156 : vector<2x32xf32>
    %158 = math.exp %157 : vector<2x32xf32>
    %cst_48 = arith.constant 1.000000e+00 : f32
    %159 = vector.broadcast %cst_48 : f32 to vector<2x32xf32>
    %160 = arith.addf %159, %158 : vector<2x32xf32>
    %161 = arith.divf %159, %160 : vector<2x32xf32>
    %162 = vector.extract_strided_slice %149 {offsets = [0, 64], sizes = [2, 32], strides = [1, 1]} : vector<2x128xf32> to vector<2x32xf32>
    %163 = math.tanh %162 : vector<2x32xf32>
    %164 = vector.extract_strided_slice %149 {offsets = [0, 96], sizes = [2, 32], strides = [1, 1]} : vector<2x128xf32> to vector<2x32xf32>
    %165 = arith.negf %164 : vector<2x32xf32>
    %166 = math.exp %165 : vector<2x32xf32>
    %cst_49 = arith.constant 1.000000e+00 : f32
    %167 = vector.broadcast %cst_49 : f32 to vector<2x32xf32>
    %168 = arith.addf %167, %166 : vector<2x32xf32>
    %169 = arith.divf %167, %168 : vector<2x32xf32>
    %170 = arith.mulf %161, %107 : vector<2x32xf32>
    %171 = arith.mulf %155, %163 : vector<2x32xf32>
    %172 = arith.addf %170, %171 : vector<2x32xf32>
    %173 = math.tanh %172 : vector<2x32xf32>
    %174 = arith.mulf %169, %173 : vector<2x32xf32>
    %175 = arith.truncf %174 : vector<2x32xf32> to vector<2x32xbf16>
    %cst_50 = arith.constant dense<0.000000e+00> : vector<2x128xf32>
    %176 = tpu.matmul %175, %2, %cst_50 {dimension_numbers = #tpu.dot_dimension_numbers<[1], [0], [0], [1], [0, 0, 1, 1], [], []>} : vector<2x32xbf16>, vector<32x128xbf16>, vector<2x128xf32> -> vector<2x128xf32>
    %177 = arith.truncf %141 : vector<2x32xf32> to vector<2x32xbf16>
    %cst_51 = arith.constant dense<0.000000e+00> : vector<2x128xf32>
    %178 = tpu.matmul %177, %3, %cst_51 {dimension_numbers = #tpu.dot_dimension_numbers<[1], [0], [0], [1], [0, 0, 1, 1], [], []>} : vector<2x32xbf16>, vector<32x128xbf16>, vector<2x128xf32> -> vector<2x128xf32>
    %179 = arith.addf %176, %178 : vector<2x128xf32>
    %180 = vector.broadcast %6 : vector<1x128xf32> to vector<2x128xf32>
    %181 = arith.addf %179, %180 : vector<2x128xf32>
    %182 = vector.extract_strided_slice %181 {offsets = [0, 0], sizes = [2, 32], strides = [1, 1]} : vector<2x128xf32> to vector<2x32xf32>
    %183 = arith.negf %182 : vector<2x32xf32>
    %184 = math.exp %183 : vector<2x32xf32>
    %cst_52 = arith.constant 1.000000e+00 : f32
    %185 = vector.broadcast %cst_52 : f32 to vector<2x32xf32>
    %186 = arith.addf %185, %184 : vector<2x32xf32>
    %187 = arith.divf %185, %186 : vector<2x32xf32>
    %188 = vector.extract_strided_slice %181 {offsets = [0, 32], sizes = [2, 32], strides = [1, 1]} : vector<2x128xf32> to vector<2x32xf32>
    %189 = arith.negf %188 : vector<2x32xf32>
    %190 = math.exp %189 : vector<2x32xf32>
    %cst_53 = arith.constant 1.000000e+00 : f32
    %191 = vector.broadcast %cst_53 : f32 to vector<2x32xf32>
    %192 = arith.addf %191, %190 : vector<2x32xf32>
    %193 = arith.divf %191, %192 : vector<2x32xf32>
    %194 = vector.extract_strided_slice %181 {offsets = [0, 64], sizes = [2, 32], strides = [1, 1]} : vector<2x128xf32> to vector<2x32xf32>
    %195 = math.tanh %194 : vector<2x32xf32>
    %196 = vector.extract_strided_slice %181 {offsets = [0, 96], sizes = [2, 32], strides = [1, 1]} : vector<2x128xf32> to vector<2x32xf32>
    %197 = arith.negf %196 : vector<2x32xf32>
    %198 = math.exp %197 : vector<2x32xf32>
    %cst_54 = arith.constant 1.000000e+00 : f32
    %199 = vector.broadcast %cst_54 : f32 to vector<2x32xf32>
    %200 = arith.addf %199, %198 : vector<2x32xf32>
    %201 = arith.divf %199, %200 : vector<2x32xf32>
    %202 = arith.mulf %193, %139 : vector<2x32xf32>
    %203 = arith.mulf %187, %195 : vector<2x32xf32>
    %204 = arith.addf %202, %203 : vector<2x32xf32>
    %205 = math.tanh %204 : vector<2x32xf32>
    %206 = arith.mulf %201, %205 : vector<2x32xf32>
    %c3 = arith.constant 3 : index
    %c0_55 = arith.constant 0 : index
    %c0_56 = arith.constant 0 : index
    %207 = vector.load %arg1[%c3, %c0_55, %c0_56] : memref<5x2x32xbf16, #tpu.memory_space<vmem>>, vector<1x2x32xbf16>
    %208 = vector.shape_cast %207 : vector<1x2x32xbf16> to vector<2x32xbf16>
    %cst_57 = arith.constant dense<0.000000e+00> : vector<2x128xf32>
    %209 = tpu.matmul %208, %0, %cst_57 {dimension_numbers = #tpu.dot_dimension_numbers<[1], [0], [0], [1], [0, 0, 1, 1], [], []>} : vector<2x32xbf16>, vector<32x128xbf16>, vector<2x128xf32> -> vector<2x128xf32>
    %210 = arith.truncf %174 : vector<2x32xf32> to vector<2x32xbf16>
    %cst_58 = arith.constant dense<0.000000e+00> : vector<2x128xf32>
    %211 = tpu.matmul %210, %1, %cst_58 {dimension_numbers = #tpu.dot_dimension_numbers<[1], [0], [0], [1], [0, 0, 1, 1], [], []>} : vector<2x32xbf16>, vector<32x128xbf16>, vector<2x128xf32> -> vector<2x128xf32>
    %212 = arith.addf %209, %211 : vector<2x128xf32>
    %213 = vector.broadcast %5 : vector<1x128xf32> to vector<2x128xf32>
    %214 = arith.addf %212, %213 : vector<2x128xf32>
    %215 = vector.extract_strided_slice %214 {offsets = [0, 0], sizes = [2, 32], strides = [1, 1]} : vector<2x128xf32> to vector<2x32xf32>
    %216 = arith.negf %215 : vector<2x32xf32>
    %217 = math.exp %216 : vector<2x32xf32>
    %cst_59 = arith.constant 1.000000e+00 : f32
    %218 = vector.broadcast %cst_59 : f32 to vector<2x32xf32>
    %219 = arith.addf %218, %217 : vector<2x32xf32>
    %220 = arith.divf %218, %219 : vector<2x32xf32>
    %221 = vector.extract_strided_slice %214 {offsets = [0, 32], sizes = [2, 32], strides = [1, 1]} : vector<2x128xf32> to vector<2x32xf32>
    %222 = arith.negf %221 : vector<2x32xf32>
    %223 = math.exp %222 : vector<2x32xf32>
    %cst_60 = arith.constant 1.000000e+00 : f32
    %224 = vector.broadcast %cst_60 : f32 to vector<2x32xf32>
    %225 = arith.addf %224, %223 : vector<2x32xf32>
    %226 = arith.divf %224, %225 : vector<2x32xf32>
    %227 = vector.extract_strided_slice %214 {offsets = [0, 64], sizes = [2, 32], strides = [1, 1]} : vector<2x128xf32> to vector<2x32xf32>
    %228 = math.tanh %227 : vector<2x32xf32>
    %229 = vector.extract_strided_slice %214 {offsets = [0, 96], sizes = [2, 32], strides = [1, 1]} : vector<2x128xf32> to vector<2x32xf32>
    %230 = arith.negf %229 : vector<2x32xf32>
    %231 = math.exp %230 : vector<2x32xf32>
    %cst_61 = arith.constant 1.000000e+00 : f32
    %232 = vector.broadcast %cst_61 : f32 to vector<2x32xf32>
    %233 = arith.addf %232, %231 : vector<2x32xf32>
    %234 = arith.divf %232, %233 : vector<2x32xf32>
    %235 = arith.mulf %226, %172 : vector<2x32xf32>
    %236 = arith.mulf %220, %228 : vector<2x32xf32>
    %237 = arith.addf %235, %236 : vector<2x32xf32>
    %238 = math.tanh %237 : vector<2x32xf32>
    %239 = arith.mulf %234, %238 : vector<2x32xf32>
    %240 = arith.truncf %239 : vector<2x32xf32> to vector<2x32xbf16>
    %cst_62 = arith.constant dense<0.000000e+00> : vector<2x128xf32>
    %241 = tpu.matmul %240, %2, %cst_62 {dimension_numbers = #tpu.dot_dimension_numbers<[1], [0], [0], [1], [0, 0, 1, 1], [], []>} : vector<2x32xbf16>, vector<32x128xbf16>, vector<2x128xf32> -> vector<2x128xf32>
    %242 = arith.truncf %206 : vector<2x32xf32> to vector<2x32xbf16>
    %cst_63 = arith.constant dense<0.000000e+00> : vector<2x128xf32>
    %243 = tpu.matmul %242, %3, %cst_63 {dimension_numbers = #tpu.dot_dimension_numbers<[1], [0], [0], [1], [0, 0, 1, 1], [], []>} : vector<2x32xbf16>, vector<32x128xbf16>, vector<2x128xf32> -> vector<2x128xf32>
    %244 = arith.addf %241, %243 : vector<2x128xf32>
    %245 = vector.broadcast %6 : vector<1x128xf32> to vector<2x128xf32>
    %246 = arith.addf %244, %245 : vector<2x128xf32>
    %247 = vector.extract_strided_slice %246 {offsets = [0, 0], sizes = [2, 32], strides = [1, 1]} : vector<2x128xf32> to vector<2x32xf32>
    %248 = arith.negf %247 : vector<2x32xf32>
    %249 = math.exp %248 : vector<2x32xf32>
    %cst_64 = arith.constant 1.000000e+00 : f32
    %250 = vector.broadcast %cst_64 : f32 to vector<2x32xf32>
    %251 = arith.addf %250, %249 : vector<2x32xf32>
    %252 = arith.divf %250, %251 : vector<2x32xf32>
    %253 = vector.extract_strided_slice %246 {offsets = [0, 32], sizes = [2, 32], strides = [1, 1]} : vector<2x128xf32> to vector<2x32xf32>
    %254 = arith.negf %253 : vector<2x32xf32>
    %255 = math.exp %254 : vector<2x32xf32>
    %cst_65 = arith.constant 1.000000e+00 : f32
    %256 = vector.broadcast %cst_65 : f32 to vector<2x32xf32>
    %257 = arith.addf %256, %255 : vector<2x32xf32>
    %258 = arith.divf %256, %257 : vector<2x32xf32>
    %259 = vector.extract_strided_slice %246 {offsets = [0, 64], sizes = [2, 32], strides = [1, 1]} : vector<2x128xf32> to vector<2x32xf32>
    %260 = math.tanh %259 : vector<2x32xf32>
    %261 = vector.extract_strided_slice %246 {offsets = [0, 96], sizes = [2, 32], strides = [1, 1]} : vector<2x128xf32> to vector<2x32xf32>
    %262 = arith.negf %261 : vector<2x32xf32>
    %263 = math.exp %262 : vector<2x32xf32>
    %cst_66 = arith.constant 1.000000e+00 : f32
    %264 = vector.broadcast %cst_66 : f32 to vector<2x32xf32>
    %265 = arith.addf %264, %263 : vector<2x32xf32>
    %266 = arith.divf %264, %265 : vector<2x32xf32>
    %267 = arith.mulf %258, %204 : vector<2x32xf32>
    %268 = arith.mulf %252, %260 : vector<2x32xf32>
    %269 = arith.addf %267, %268 : vector<2x32xf32>
    %270 = math.tanh %269 : vector<2x32xf32>
    %271 = arith.mulf %266, %270 : vector<2x32xf32>
    %c4 = arith.constant 4 : index
    %c0_67 = arith.constant 0 : index
    %c0_68 = arith.constant 0 : index
    %272 = vector.load %arg1[%c4, %c0_67, %c0_68] : memref<5x2x32xbf16, #tpu.memory_space<vmem>>, vector<1x2x32xbf16>
    %273 = vector.shape_cast %272 : vector<1x2x32xbf16> to vector<2x32xbf16>
    %cst_69 = arith.constant dense<0.000000e+00> : vector<2x128xf32>
    %274 = tpu.matmul %273, %0, %cst_69 {dimension_numbers = #tpu.dot_dimension_numbers<[1], [0], [0], [1], [0, 0, 1, 1], [], []>} : vector<2x32xbf16>, vector<32x128xbf16>, vector<2x128xf32> -> vector<2x128xf32>
    %275 = arith.truncf %239 : vector<2x32xf32> to vector<2x32xbf16>
    %cst_70 = arith.constant dense<0.000000e+00> : vector<2x128xf32>
    %276 = tpu.matmul %275, %1, %cst_70 {dimension_numbers = #tpu.dot_dimension_numbers<[1], [0], [0], [1], [0, 0, 1, 1], [], []>} : vector<2x32xbf16>, vector<32x128xbf16>, vector<2x128xf32> -> vector<2x128xf32>
    %277 = arith.addf %274, %276 : vector<2x128xf32>
    %278 = vector.broadcast %5 : vector<1x128xf32> to vector<2x128xf32>
    %279 = arith.addf %277, %278 : vector<2x128xf32>
    %280 = vector.extract_strided_slice %279 {offsets = [0, 0], sizes = [2, 32], strides = [1, 1]} : vector<2x128xf32> to vector<2x32xf32>
    %281 = arith.negf %280 : vector<2x32xf32>
    %282 = math.exp %281 : vector<2x32xf32>
    %cst_71 = arith.constant 1.000000e+00 : f32
    %283 = vector.broadcast %cst_71 : f32 to vector<2x32xf32>
    %284 = arith.addf %283, %282 : vector<2x32xf32>
    %285 = arith.divf %283, %284 : vector<2x32xf32>
    %286 = vector.extract_strided_slice %279 {offsets = [0, 32], sizes = [2, 32], strides = [1, 1]} : vector<2x128xf32> to vector<2x32xf32>
    %287 = arith.negf %286 : vector<2x32xf32>
    %288 = math.exp %287 : vector<2x32xf32>
    %cst_72 = arith.constant 1.000000e+00 : f32
    %289 = vector.broadcast %cst_72 : f32 to vector<2x32xf32>
    %290 = arith.addf %289, %288 : vector<2x32xf32>
    %291 = arith.divf %289, %290 : vector<2x32xf32>
    %292 = vector.extract_strided_slice %279 {offsets = [0, 64], sizes = [2, 32], strides = [1, 1]} : vector<2x128xf32> to vector<2x32xf32>
    %293 = math.tanh %292 : vector<2x32xf32>
    %294 = vector.extract_strided_slice %279 {offsets = [0, 96], sizes = [2, 32], strides = [1, 1]} : vector<2x128xf32> to vector<2x32xf32>
    %295 = arith.negf %294 : vector<2x32xf32>
    %296 = math.exp %295 : vector<2x32xf32>
    %cst_73 = arith.constant 1.000000e+00 : f32
    %297 = vector.broadcast %cst_73 : f32 to vector<2x32xf32>
    %298 = arith.addf %297, %296 : vector<2x32xf32>
    %299 = arith.divf %297, %298 : vector<2x32xf32>
    %300 = arith.mulf %291, %237 : vector<2x32xf32>
    %301 = arith.mulf %285, %293 : vector<2x32xf32>
    %302 = arith.addf %300, %301 : vector<2x32xf32>
    %303 = math.tanh %302 : vector<2x32xf32>
    %304 = arith.mulf %299, %303 : vector<2x32xf32>
    %305 = arith.truncf %304 : vector<2x32xf32> to vector<2x32xbf16>
    %cst_74 = arith.constant dense<0.000000e+00> : vector<2x128xf32>
    %306 = tpu.matmul %305, %2, %cst_74 {dimension_numbers = #tpu.dot_dimension_numbers<[1], [0], [0], [1], [0, 0, 1, 1], [], []>} : vector<2x32xbf16>, vector<32x128xbf16>, vector<2x128xf32> -> vector<2x128xf32>
    %307 = arith.truncf %271 : vector<2x32xf32> to vector<2x32xbf16>
    %cst_75 = arith.constant dense<0.000000e+00> : vector<2x128xf32>
    %308 = tpu.matmul %307, %3, %cst_75 {dimension_numbers = #tpu.dot_dimension_numbers<[1], [0], [0], [1], [0, 0, 1, 1], [], []>} : vector<2x32xbf16>, vector<32x128xbf16>, vector<2x128xf32> -> vector<2x128xf32>
    %309 = arith.addf %306, %308 : vector<2x128xf32>
    %310 = vector.broadcast %6 : vector<1x128xf32> to vector<2x128xf32>
    %311 = arith.addf %309, %310 : vector<2x128xf32>
    %312 = vector.extract_strided_slice %311 {offsets = [0, 0], sizes = [2, 32], strides = [1, 1]} : vector<2x128xf32> to vector<2x32xf32>
    %313 = arith.negf %312 : vector<2x32xf32>
    %314 = math.exp %313 : vector<2x32xf32>
    %cst_76 = arith.constant 1.000000e+00 : f32
    %315 = vector.broadcast %cst_76 : f32 to vector<2x32xf32>
    %316 = arith.addf %315, %314 : vector<2x32xf32>
    %317 = arith.divf %315, %316 : vector<2x32xf32>
    %318 = vector.extract_strided_slice %311 {offsets = [0, 32], sizes = [2, 32], strides = [1, 1]} : vector<2x128xf32> to vector<2x32xf32>
    %319 = arith.negf %318 : vector<2x32xf32>
    %320 = math.exp %319 : vector<2x32xf32>
    %cst_77 = arith.constant 1.000000e+00 : f32
    %321 = vector.broadcast %cst_77 : f32 to vector<2x32xf32>
    %322 = arith.addf %321, %320 : vector<2x32xf32>
    %323 = arith.divf %321, %322 : vector<2x32xf32>
    %324 = vector.extract_strided_slice %311 {offsets = [0, 64], sizes = [2, 32], strides = [1, 1]} : vector<2x128xf32> to vector<2x32xf32>
    %325 = math.tanh %324 : vector<2x32xf32>
    %326 = vector.extract_strided_slice %311 {offsets = [0, 96], sizes = [2, 32], strides = [1, 1]} : vector<2x128xf32> to vector<2x32xf32>
    %327 = arith.negf %326 : vector<2x32xf32>
    %328 = math.exp %327 : vector<2x32xf32>
    %cst_78 = arith.constant 1.000000e+00 : f32
    %329 = vector.broadcast %cst_78 : f32 to vector<2x32xf32>
    %330 = arith.addf %329, %328 : vector<2x32xf32>
    %331 = arith.divf %329, %330 : vector<2x32xf32>
    %332 = arith.mulf %323, %269 : vector<2x32xf32>
    %333 = arith.mulf %317, %325 : vector<2x32xf32>
    %334 = arith.addf %332, %333 : vector<2x32xf32>
    %335 = math.tanh %334 : vector<2x32xf32>
    %336 = arith.mulf %331, %335 : vector<2x32xf32>
    %337 = tpu.concatenate %76, %141, %206, %271, %336 in 0 : vector<2x32xf32>, vector<2x32xf32>, vector<2x32xf32>, vector<2x32xf32>, vector<2x32xf32> -> vector<10x32xf32>
    %338 = arith.truncf %337 : vector<10x32xf32> to vector<10x32xbf16>
    %cst_79 = arith.constant dense<0.000000e+00> : vector<10x128xf32>
    %339 = tpu.matmul %338, %4, %cst_79 {dimension_numbers = #tpu.dot_dimension_numbers<[1], [0], [0], [1], [0, 0, 1, 1], [], []>} : vector<10x32xbf16>, vector<32x128xbf16>, vector<10x128xf32> -> vector<10x128xf32>
    %340 = vector.broadcast %7 : vector<1x128xf32> to vector<10x128xf32>
    %341 = arith.addf %339, %340 : vector<10x128xf32>
    %342 = vector.shape_cast %341 : vector<10x128xf32> to vector<5x2x128xf32>
    %c0_80 = arith.constant 0 : index
    %c0_81 = arith.constant 0 : index
    %c0_82 = arith.constant 0 : index
    %343 = vector.load %arg10[%c0_80, %c0_81, %c0_82] : memref<5x2x128xf32, #tpu.memory_space<vmem>>, vector<5x2x128xf32>
    tpu.vector_store %arg10[%c0_80, %c0_81, %c0_82], %342 {strides = array<i32>} : memref<5x2x128xf32, #tpu.memory_space<vmem>>, vector<5x2x128xf32>,
    return
  }
  func.func @transform_0(%arg0: i32) -> (i32, i32, i32) {
    %c0_i32 = arith.constant 0 : i32
    %c0_i32_0 = arith.constant 0 : i32
    %c0_i32_1 = arith.constant 0 : i32
    return %c0_i32, %arg0, %c0_i32_0 : i32, i32, i32
  }
  func.func @transform_1(%arg0: i32) -> (i32, i32) {
    %c0_i32 = arith.constant 0 : i32
    %c0_i32_0 = arith.constant 0 : i32
    %c0_i32_1 = arith.constant 0 : i32
    return %c0_i32, %c0_i32_0 : i32, i32
  }
  func.func @transform_2(%arg0: i32) -> (i32, i32) {
    %c0_i32 = arith.constant 0 : i32
    %c0_i32_0 = arith.constant 0 : i32
    %c0_i32_1 = arith.constant 0 : i32
    return %c0_i32, %c0_i32_0 : i32, i32
  }
  func.func @transform_3(%arg0: i32) -> (i32, i32) {
    %c0_i32 = arith.constant 0 : i32
    %c0_i32_0 = arith.constant 0 : i32
    %c0_i32_1 = arith.constant 0 : i32
    return %c0_i32, %c0_i32_0 : i32, i32
  }
  func.func @transform_4(%arg0: i32) -> (i32, i32) {
    %c0_i32 = arith.constant 0 : i32
    %c0_i32_0 = arith.constant 0 : i32
    %c0_i32_1 = arith.constant 0 : i32
    return %c0_i32, %c0_i32_0 : i32, i32
  }
  func.func @transform_5(%arg0: i32) -> (i32, i32) {
    %c0_i32 = arith.constant 0 : i32
    %c0_i32_0 = arith.constant 0 : i32
    %c0_i32_1 = arith.constant 0 : i32
    return %c0_i32, %c0_i32_0 : i32, i32
  }
  func.func @transform_6(%arg0: i32) -> (i32, i32) {
    %c0_i32 = arith.constant 0 : i32
    %c0_i32_0 = arith.constant 0 : i32
    %c0_i32_1 = arith.constant 0 : i32
    return %c0_i32, %c0_i32_0 : i32, i32
  }
  func.func @transform_7(%arg0: i32) -> (i32, i32) {
    %c0_i32 = arith.constant 0 : i32
    %c0_i32_0 = arith.constant 0 : i32
    %c0_i32_1 = arith.constant 0 : i32
    return %c0_i32, %c0_i32_0 : i32, i32
  }
  func.func @transform_8(%arg0: i32) -> (i32, i32) {
    %c0_i32 = arith.constant 0 : i32
    %c0_i32_0 = arith.constant 0 : i32
    %c0_i32_1 = arith.constant 0 : i32
    return %c0_i32, %c0_i32_0 : i32, i32
  }
  func.func @transform_9(%arg0: i32) -> (i32, i32, i32) {
    %c0_i32 = arith.constant 0 : i32
    %c0_i32_0 = arith.constant 0 : i32
    %c0_i32_1 = arith.constant 0 : i32
    return %c0_i32, %arg0, %c0_i32_0 : i32, i32, i32
  }
}

</mosaic_0001>

<bundles_post_ra>
// kernel: tpu_custom_call.1
= control target key start
LH: loop header
LB: loop body
LE: loop exit
PB: predicated region body
PF: predicated region fallthrough
CT: control target
= control target key end

     0   :  { %14 = vsyncpa [#allocation3], 0  ;;  %s2405_s0 = inlined_call_operand.hbm [shape: bf16[5,2,32], index: 0, kind: input, shape index: {}]   ;;  %s2406_s1 = inlined_call_operand.hbm [shape: bf16[32,128], index: 1, kind: input, shape index: {}]   ;;  %s2407_s2 = inlined_call_operand.hbm [shape: bf16[32,128], index: 2, kind: input, shape index: {}]   ;;  %s2408_s3 = inlined_call_operand.vmem [shape: f32[1,128], index: 3, kind: input, shape index: {}]   ;;  %s2409_s4 = inlined_call_operand.hbm [shape: bf16[32,128], index: 4, kind: input, shape index: {}]   ;;  %s2410_s5 = inlined_call_operand.vmem [shape: bf16[32,128], index: 5, kind: input, shape index: {}]   ;;  %s2411_s6 = inlined_call_operand.vmem [shape: f32[1,128], index: 6, kind: input, shape index: {}]   ;;  %s2412_s7 = inlined_call_operand.hbm [shape: bf16[32,128], index: 7, kind: input, shape index: {}]   ;;  %s2413_s8 = inlined_call_operand.vmem [shape: f32[1,128], index: 8, kind: input, shape index: {}]   ;;  %s2414_s9 = inlined_call_operand.hbm [shape: f32[5,2,128], index: 9, kind: output, shape index: {}]  }
   0x1   :  { %15 = vsyncpa [#allocation6], 0 }
   0x2   :  { %16 = vsyncpa [#allocation9], 0 }
   0x3   :  { %17 = vsyncpa [#allocation4], 0  ;;  %s1984_s30 = smov [#allocation5]   ;;  %s1844_s13 = scalar_lea.hbm %s2406_s1, 256 }
   0x4   :  { %s35_s10 = sshll.u32 %s1984_s30, 4  ;;  %p1845_p0 = scmp.ne.s32.totalorder %s2406_s1, %s1844_s13  ;;  %s36_s10 = int_to_ptr.vmem [resolvable:$true] %s35_s10 }
   0x5   :  { %p1848_p1 = scmp.lt.u32.totalorder %s1844_s13, %s2406_s1 }
   0x7   :  { %p1850_p2 = pnand %p1848_p1, %p1845_p0 }
   0x9   :  { %1853 = shalt.err (!%p1850_p2)
}
   0xa   :  { %s1854_s18 = scalar_lea.vmem %s36_s10, 256  ;;  %p1859_p4 = scmp.lt.s32.totalorder %s36_s10, %s36_s10 }
   0xb   :  { %p1855_p3 = scmp.ne.s32.totalorder %s36_s10, %s1854_s18  ;;  %p1860_p5 = scmp.lt.s32.totalorder %s1854_s18, %s1854_s18 }
   0xd   :  { %p1861_p6 = por %p1860_p5, %p1859_p4 }
   0xf   :  { %p1862_p7 = pnand %p1861_p6, %p1855_p3 }
  0x11   :  { %1865 = shalt.err (!%p1862_p7)
}
  0x12   :  { %s1985_s19 = smov 64   ;;  %s1986_s20 = smov 4  }
  0x13   :  { %41 = dma.hbm_to_vmem [thread:$0]  %s2406_s1, 256, %s36_s10, [#allocation6], %s1985_s19, %s1985_s19, %s1986_s20  }
  0x14   :  { %s1987_s23 = smov [#allocation8]   ;;  %s1988_s25 = smov [#allocation2]  }
  0x15   :  { %s61_s24 = sshll.u32 %s1987_s23, 4  ;;  %s23_s26 = sshll.u32 %s1988_s25, 4  ;;  %s62_s24 = int_to_ptr.vmem [resolvable:$true] %s61_s24  ;;  %s24_s26 = int_to_ptr.vmem [resolvable:$true] %s23_s26 }
  0x16   :  { %s1866_s29 = scalar_lea.hbm %s2409_s4, 256 }
  0x17   :  { %p1867_p8 = scmp.ne.s32.totalorder %s2409_s4, %s1866_s29  ;;  %p1870_p9 = scmp.lt.u32.totalorder %s1866_s29, %s2409_s4 }
  0x19   :  { %p1872_p10 = pnand %p1870_p9, %p1867_p8 }
  0x1b   :  { %1875 = shalt.err (!%p1872_p10)
}
  0x1c   :  { %s1876_s1 = scalar_lea.vmem %s62_s24, 256  ;;  %p1881_p12 = scmp.lt.s32.totalorder %s62_s24, %s62_s24 }
  0x1d   :  { %p1877_p11 = scmp.ne.s32.totalorder %s62_s24, %s1876_s1  ;;  %p1882_p13 = scmp.lt.s32.totalorder %s1876_s1, %s1876_s1 }
  0x1f   :  { %p1883_p0 = por %p1882_p13, %p1881_p12 }
  0x21   :  { %p1884_p1 = pnand %p1883_p0, %p1877_p11 }
  0x23   :  { %1887 = shalt.err (!%p1884_p1)
}
  0x24   :  { %67 = dma.hbm_to_vmem [thread:$0]  %s2409_s4, 256, %s62_s24, [#allocation9], %s1985_s19, %s1985_s19, %s1986_s20  }
  0x25   :  { %s1888_s17 = scalar_lea.hbm %s2405_s0, 80 }
  0x26   :  { %p1889_p2 = scmp.ne.s32.totalorder %s2405_s0, %s1888_s17  ;;  %p1892_p3 = scmp.lt.u32.totalorder %s1888_s17, %s2405_s0 }
  0x28   :  { %p1894_p4 = pnand %p1892_p3, %p1889_p2 }
  0x2a   :  { %1897 = shalt.err (!%p1894_p4)
}
  0x2b   :  { %s1898_s25 = scalar_lea.vmem %s24_s26, 80  ;;  %s1902_s27 = scalar_lea.vmem %s24_s26, 96 }
  0x2c   :  { %p1899_p5 = scmp.ne.s32.totalorder %s24_s26, %s1898_s25  ;;  %p1903_p6 = scmp.lt.s32.totalorder %s24_s26, %s24_s26 }
  0x2d   :  { %p1904_p7 = scmp.lt.s32.totalorder %s1902_s27, %s1898_s25 }
  0x2f   :  { %p1905_p8 = por %p1904_p7, %p1903_p6 }
  0x31   :  { %p1906_p9 = pnand %p1905_p8, %p1899_p5 }
  0x33   :  { %1909 = shalt.err (!%p1906_p9)
}
  0x34   :  { %s1989_s4 = smov 16   ;;  %s1990_s24 = smov 1  }
  0x35   :  { %29 = dma.hbm_to_vmem [thread:$0]  %s2405_s0, 80, %s24_s26, [#allocation3], %s1989_s4, %s1989_s4, %s1990_s24  }
  0x36   :  { %s1991_s30 = smov [#allocation7]   ;;  %s1992_s12 = smov [#allocation10]  }
  0x37   :  { %s47_s11 = sshll.u32 %s1991_s30, 4  ;;  %s77_s13 = sshll.u32 %s1992_s12, 4  ;;  %s48_s11 = int_to_ptr.vmem [resolvable:$true] %s47_s11  ;;  %s78_s13 = int_to_ptr.vmem [resolvable:$true] %s77_s13 }
  0x38   :  { %s1910_s14 = scalar_lea.hbm %s2407_s2, 256 }
  0x39   :  { %p1911_p10 = scmp.ne.s32.totalorder %s2407_s2, %s1910_s14  ;;  %p1914_p11 = scmp.lt.u32.totalorder %s1910_s14, %s2407_s2 }
  0x3b   :  { %p1916_p12 = pnand %p1914_p11, %p1911_p10 }
  0x3d   :  { %1919 = shalt.err (!%p1916_p12)
}
  0x3e   :  { %s1920_s0 = scalar_lea.vmem %s48_s11, 256  ;;  %p1925_p0 = scmp.lt.s32.totalorder %s48_s11, %s48_s11 }
  0x3f   :  { %p1921_p13 = scmp.ne.s32.totalorder %s48_s11, %s1920_s0  ;;  %p1926_p1 = scmp.lt.s32.totalorder %s1920_s0, %s1920_s0 }
  0x41   :  { %p1927_p2 = por %p1926_p1, %p1925_p0 }
  0x43   :  { %p1928_p3 = pnand %p1927_p2, %p1921_p13 }
  0x45   :  { %1931 = shalt.err (!%p1928_p3)
}
  0x46   :  { %53 = dma.hbm_to_vmem [thread:$0]  %s2407_s2, 256, %s48_s11, [#allocation6], %s1985_s19, %s1985_s19, %s1986_s20  }
  0x47   :  { %s1932_s25 = scalar_lea.hbm %s2412_s7, 256 }
  0x48   :  { %p1933_p4 = scmp.ne.s32.totalorder %s2412_s7, %s1932_s25  ;;  %p1936_p5 = scmp.lt.u32.totalorder %s1932_s25, %s2412_s7 }
  0x4a   :  { %p1938_p6 = pnand %p1936_p5, %p1933_p4 }
  0x4c   :  { %1941 = shalt.err (!%p1938_p6)
}
  0x4d   :  { %s1942_s29 = scalar_lea.vmem %s78_s13, 256  ;;  %p1947_p8 = scmp.lt.s32.totalorder %s78_s13, %s78_s13 }
  0x4e   :  { %p1943_p7 = scmp.ne.s32.totalorder %s78_s13, %s1942_s29  ;;  %p1948_p9 = scmp.lt.s32.totalorder %s1942_s29, %s1942_s29 }
  0x50   :  { %p1949_p10 = por %p1948_p9, %p1947_p8 }
  0x52   :  { %p1950_p11 = pnand %p1949_p10, %p1943_p7 }
  0x54   :  { %1953 = shalt.err (!%p1950_p11)
}
  0x55   :  { %83 = dma.hbm_to_vmem [thread:$0]  %s2412_s7, 256, %s78_s13, [#allocation9], %s1985_s19, %s1985_s19, %s1986_s20  }
  0x56   :  { %1976 = dma.done.wait [#allocation3], 80  }
  0x57   :  { %1977 = vsyncadd [#allocation3], 4294967216 }
  0x58   :  { %1978 = dma.done.wait [#allocation6], 512  }
  0x59   :  { %1979 = vsyncadd [#allocation6], 4294966784 }
  0x5a   :  { %1980 = dma.done.wait [#allocation9], 512  }
  0x5b   :  { %1981 = vsyncadd [#allocation9], 4294966784  ;;  %v1993_v0 = vmov 0.0   ;;  %vm1994_vm0 = vmmov 0   ;;  %v2128_v1 = vld [vmem:[#allocation7] sm:$0xff]   ;;  %v2130_v2 = vld [vmem:[#allocation5] sm:$0xff]  }
  0x5c   :  { %1570 = vmatprep.subr.bf16.mxu0 %v1993_v0  ;;  %1578 = vmatprep.subr.bf16.mxu1 %v1993_v0  ;;  %v2133_v3 = vld [vmem:[#allocation7 + $0x8] sm:$0xff]   ;;  %v2137_v4 = vld [vmem:[#allocation5 + $0x8] sm:$0xff]   ;;  %vm138_vm1 = vcmask 261120   ;;  %v1995_v6 = vmov 0   ;;  %v2165_v29 = vld [vmem:[#allocation8] sm:$0xff]   ;;  %vm1335_vm2 = vcmask 1041408  }
  0x5d   :  { %1574 = vmatprep.mubr.msk.bf16.mxu0 %vm1994_vm0, %v1993_v0  ;;  %1582 = vmatprep.mubr.msk.bf16.mxu1 %vm1994_vm0, %v1993_v0  ;;  %v125_v5 = vld [vmem:[#allocation2] sm:$0x1]  ;;  %v2152_v8 = vld [vmem:[%s2408_s3] ss:$0 sm:$0xff]  ;;  %s1996_s3 = smov 32   ;;  %v2171_v30 = vld [vmem:[%s2410_s5 + $0x8] sm:$0xff]  }
  0x5e   :  { %1571 = vmatpush3.bf16.msra.mxu0 %v2128_v1  ;;  %1579 = vmatpush3.bf16.msra.mxu1 %v2130_v2  ;;  %v2163_v28 = vld [vmem:[%s2410_s5] sm:$0xff]   ;;  %v411_v41 = vld [vmem:[#allocation2 + $0x1] sm:$0x1]  ;;  %vm1337_vm3 = vcmask 1043456   ;;  %vm1339_vm4 = vcmask 1045504  }
  0x5f   :  { %1572 = vmatprep.subr.bf16.mxu0 %v1993_v0  ;;  %1580 = vmatprep.subr.bf16.mxu1 %v1993_v0  ;;  %v2174_v31 = vld [vmem:[#allocation8 + $0x8] sm:$0xff]  }
  0x60   :  { %v2214_v42 = vld [vmem:[%s2411_s6] ss:$0 sm:$0xff] }
  0x62   :  { %1573 = vmatpush3.bf16.msra.mxu0 %v2133_v3  ;;  %1581 = vmatpush3.bf16.msra.mxu1 %v2137_v4 }
  0x63   :  { %1586 = vmatprep.subr.bf16.mxu0 %v1993_v0  ;;  %1594 = vmatprep.subr.bf16.mxu1 %v1993_v0 }
  0x65   :  { %1575 = vmatmul.mubr.bf16.vlgmr.msra.gmra.mrb[0].mxu0 %v1995_v6  ;;  %1583 = vmatmul.mubr.msk.bf16.vlgmr.msra.gmra.mrb[0].mxu1 %vm138_vm1, %v125_v5 }
  0x66   :  { %1590 = vmatprep.mubr.msk.bf16.mxu0 %vm1994_vm0, %v1993_v0  ;;  %1598 = vmatprep.mubr.msk.bf16.mxu1 %vm1994_vm0, %v1993_v0 }
  0x67   :  { %1587 = vmatpush3.bf16.msra.mxu0 %v2163_v28  ;;  %1595 = vmatpush3.bf16.msra.mxu1 %v2165_v29 }
  0x68   :  { %1588 = vmatprep.subr.bf16.mxu0 %v1993_v0  ;;  %1596 = vmatprep.subr.bf16.mxu1 %v1993_v0 }
  0x6b   :  { %1589 = vmatpush3.bf16.msra.mxu0 %v2171_v30  ;;  %1597 = vmatpush3.bf16.msra.mxu1 %v2174_v31 }
  0x6c   :  { %1602 = vmatprep.subr.bf16.mxu0 %v1993_v0  ;;  %1610 = vmatprep.subr.bf16.mxu1 %v1993_v0 }
  0x6e   :  { %1591 = vmatmul.mubr.bf16.vlgmr.msra.gmra.mrb[4].mxu0 %v1995_v6 }
  0x6f   :  { %1603 = vmatpush3.bf16.msra.mxu0 %v2128_v1  ;;  %1606 = vmatprep.mubr.msk.bf16.mxu0 %vm1994_vm0, %v1993_v0 }
  0x70   :  { %1604 = vmatprep.subr.bf16.mxu0 %v1993_v0 }
  0x73   :  { %1605 = vmatpush3.bf16.msra.mxu0 %v2133_v3 }
  0x74   :  { %1618 = vmatprep.subr.bf16.mxu0 %v1993_v0 }
 0x138   :  { %v176_v7 = vpop.f32.mrb[0].mxu0  ;;  %v231_v9 = vpop.f32.mrb[0].mxu1 }
 0x139   :  { %v1576_v10 = vpop.f32.mrb[1].mxu0  ;;  %v232_v11 = vadd.f32 %v231_v9, %v176_v7  ;;  %v1584_v12 = vpop.f32.mrb[1].mxu1 }
 0x13a   :  { %v179_v13 = vpop.f32.mrb[2].mxu0  ;;  %v234_v14 = vpop.f32.mrb[2].mxu1 }
 0x13b   :  { %v1577_v15 = vpop.f32.mrb[3].mxu0  ;;  %v243_v16 = vadd.f32 %v2152_v8, %v232_v11  ;;  %v1585_v17 = vpop.f32.mrb[3].mxu1 }
 0x13d   :  { %1764 = vtanh.f32 %v243_v16  ;;  %v1468_v19 = vmul.f32 -1.442695, %v243_v16 }
 0x13f   :  { %1766 = vpow2.f32 %v1468_v19 }
 0x141   :  { %v315_v36 = vpop.f32.mrb[4].mxu0 }
 0x142   :  { %v1592_v37 = vpop.f32.mrb[5].mxu0 }
 0x143   :  { %v318_v38 = vpop.f32.mrb[6].mxu0 }
 0x144   :  { %v1593_v39 = vpop.f32.mrb[7].mxu0 }
 0x147   :  { %v1765_v18 = vpop.eup %1764 }
 0x148   :  { %253 = vrot.lane.b32.xlu0 %v1765_v18, %s1985_s19 }
 0x149   :  { %v1767_v20 = vpop.eup %1766 }
 0x14a   :  { %v247_v21 = vadd.f32 1.0, %v1767_v20 }
 0x14c   :  { %1768 = vrcp.f32 %v247_v21 }
 0x156   :  { %v1769_v22 = vpop.eup %1768 }
 0x157   :  { %v251_v25 = vmul.f32 0.0, %v1769_v22 }
 0x1ba   :  { %v254_v23 = vpop.permute.xlu0 %253 }
 0x1bb   :  { %v256_v24 = vmul.f32 %v1769_v22, %v254_v23 }
 0x1bd   :  { %258 = vrot.lane.b32.xlu0 %v256_v24, %s1996_s3 }
 0x22f   :  { %v259_v26 = vpop.permute.xlu0 %258 }
 0x230   :  { %v2157_v27 = vadd.f32 %v259_v26, %v251_v25 }
 0x232   :  { %1770 = vtanh.f32 %v2157_v27 }
 0x23c   :  { %v1771_v32 = vpop.eup %1770 }
 0x23d   :  { %264 = vrot.lane.b32.xlu1 %v1771_v32, %s1985_s19 }
 0x2af   :  { %v265_v33 = vpop.permute.xlu1 %264 }
 0x2b0   :  { %v267_v34 = vmul.f32 %v1769_v22, %v265_v33 }
 0x2b2   :  { %v268_v35 = vpack.c.bf16 %v267_v34, %v267_v34 }
 0x2b4   :  { %322 = vrot.lane.b32.xlu1 %v268_v35, %s1996_s3  ;;  %v640_v35 = vld [vmem:[#allocation2 + $0x2] sm:$0x1] }
 0x326   :  { %v323_v40 = vpop.permute.xlu1 %322 }
 0x327   :  { %1599 = vmatmul.mubr.msk.bf16.vlgmr.msra.gmra.mrb[4].mxu1 %vm138_vm1, %v323_v40  ;;  %1607 = vmatmul.mubr.msk.bf16.vlgmr.msra.gmra.mrb[8].mxu0 %vm138_vm1, %v323_v40 }
 0x328   :  { %1611 = vmatpush3.bf16.msra.mxu1 %v2130_v2  ;;  %1614 = vmatprep.mubr.msk.bf16.mxu1 %vm1994_vm0, %v1993_v0 }
 0x329   :  { %1612 = vmatprep.subr.bf16.mxu1 %v1993_v0  ;;  %1619 = vmatpush3.bf16.msra.mxu0 %v2163_v28 }
 0x32a   :  { %1620 = vmatprep.subr.bf16.mxu0 %v1993_v0  ;;  %1622 = vmatprep.mubr.msk.bf16.mxu0 %vm1994_vm0, %v1993_v0 }
 0x32c   :  { %1613 = vmatpush3.bf16.msra.mxu1 %v2137_v4 }
 0x32d   :  { %1621 = vmatpush3.bf16.msra.mxu0 %v2171_v30  ;;  %1626 = vmatprep.subr.bf16.mxu1 %v1993_v0 }
 0x32e   :  { %1634 = vmatprep.subr.bf16.mxu0 %v1993_v0 }
 0x32f   :  { %1615 = vmatmul.mubr.msk.bf16.vlgmr.msra.gmra.mrb[8].mxu1 %vm138_vm1, %v411_v41 }
 0x330   :  { %1627 = vmatpush3.bf16.msra.mxu1 %v2165_v29  ;;  %1630 = vmatprep.mubr.msk.bf16.mxu1 %vm1994_vm0, %v1993_v0 }
 0x331   :  { %1628 = vmatprep.subr.bf16.mxu1 %v1993_v0 }
 0x334   :  { %1629 = vmatpush3.bf16.msra.mxu1 %v2174_v31 }
 0x335   :  { %1642 = vmatprep.subr.bf16.mxu1 %v1993_v0 }
 0x3fa   :  { %v373_v43 = vpop.f32.mrb[4].mxu1  ;;  %v446_v44 = vpop.f32.mrb[8].mxu0 }
 0x3fb   :  { %v374_v45 = vadd.f32 %v373_v43, %v315_v36  ;;  %v1600_v46 = vpop.f32.mrb[5].mxu1  ;;  %v1608_v47 = vpop.f32.mrb[9].mxu0 }
 0x3fc   :  { %v376_v48 = vpop.f32.mrb[6].mxu1  ;;  %v449_v49 = vpop.f32.mrb[10].mxu0 }
 0x3fd   :  { %v385_v50 = vadd.f32 %v2214_v42, %v374_v45  ;;  %v1601_v51 = vpop.f32.mrb[7].mxu1  ;;  %v1609_v52 = vpop.f32.mrb[11].mxu0 }
 0x3ff   :  { %1772 = vtanh.f32 %v385_v50  ;;  %v1475_v61 = vmul.f32 -1.442695, %v385_v50 }
 0x402   :  { %v489_v53 = vpop.f32.mrb[8].mxu1 }
 0x403   :  { %v490_v54 = vadd.f32 %v489_v53, %v446_v44  ;;  %v1616_v55 = vpop.f32.mrb[9].mxu1 }
 0x404   :  { %v492_v56 = vpop.f32.mrb[10].mxu1 }
 0x405   :  { %v495_v57 = vadd.f32 %v2152_v8, %v490_v54  ;;  %v1617_v58 = vpop.f32.mrb[11].mxu1 }
 0x407   :  { %1774 = vtanh.f32 %v495_v57  ;;  %v1478_v62 = vmul.f32 -1.442695, %v495_v57 }
 0x408   :  { %1776 = vpow2.f32 %v1475_v61 }
 0x409   :  { %v1773_v59 = vpop.eup %1772  ;;  %1778 = vpow2.f32 %v1478_v62 }
 0x40a   :  { %395 = vrot.lane.b32.xlu0 %v1773_v59, %s1985_s19 }
 0x411   :  { %v1775_v60 = vpop.eup %1774 }
 0x412   :  { %505 = vrot.lane.b32.xlu1 %v1775_v60, %s1985_s19  ;;  %v1777_v63 = vpop.eup %1776 }
 0x413   :  { %v389_v5 = vadd.f32 1.0, %v1777_v63  ;;  %v1779_v6 = vpop.eup %1778 }
 0x414   :  { %v499_v7 = vadd.f32 1.0, %v1779_v6 }
 0x415   :  { %1780 = vrcp.f32 %v389_v5 }
 0x416   :  { %1782 = vrcp.f32 %v499_v7 }
 0x41f   :  { %v1781_v9 = vpop.eup %1780 }
 0x420   :  { %v1783_v12 = vpop.eup %1782  ;;  %v393_v15 = vmul.f32 0.0, %v1781_v9 }
 0x421   :  { %v503_v18 = vmul.f32 %v1783_v12, %v2157_v27 }
 0x47c   :  { %v396_v10 = vpop.permute.xlu0 %395 }
 0x47d   :  { %v398_v11 = vmul.f32 %v1781_v9, %v396_v10 }
 0x47f   :  { %400 = vrot.lane.b32.xlu0 %v398_v11, %s1996_s3 }
 0x484   :  { %v506_v13 = vpop.permute.xlu1 %505 }
 0x485   :  { %v508_v14 = vmul.f32 %v1783_v12, %v506_v13 }
 0x487   :  { %510 = vrot.lane.b32.xlu1 %v508_v14, %s1996_s3 }
 0x4f1   :  { %v401_v16 = vpop.permute.xlu0 %400 }
 0x4f2   :  { %v2222_v17 = vadd.f32 %v401_v16, %v393_v15 }
 0x4f4   :  { %1784 = vtanh.f32 %v2222_v17 }
 0x4f9   :  { %v511_v19 = vpop.permute.xlu1 %510 }
 0x4fa   :  { %v2226_v20 = vadd.f32 %v511_v19, %v503_v18 }
 0x4fc   :  { %1786 = vtanh.f32 %v2226_v20 }
 0x4fe   :  { %v1785_v21 = vpop.eup %1784 }
 0x4ff   :  { %406 = vrot.lane.b32.xlu0 %v1785_v21, %s1985_s19 }
 0x506   :  { %v1787_v22 = vpop.eup %1786 }
 0x507   :  { %516 = vrot.lane.b32.xlu1 %v1787_v22, %s1985_s19 }
 0x571   :  { %v407_v23 = vpop.permute.xlu0 %406 }
 0x572   :  { %v2231_v24 = vmul.f32 %v1781_v9, %v407_v23 }
 0x574   :  { %v521_v25 = vpack.c.bf16 %v2231_v24, %v2231_v24 }
 0x576   :  { %523 = vrot.lane.b32.xlu0 %v521_v25, %s1996_s3 }
 0x579   :  { %v517_v26 = vpop.permute.xlu1 %516 }
 0x57a   :  { %v519_v27 = vmul.f32 %v1783_v12, %v517_v26 }
 0x57c   :  { %v520_v32 = vpack.c.bf16 %v519_v27, %v519_v27 }
 0x57e   :  { %569 = vrot.lane.b32.xlu1 %v520_v32, %s1996_s3 }
 0x5e8   :  { %v524_v33 = vpop.permute.xlu0 %523 }
 0x5e9   :  { %1623 = vmatmul.mubr.msk.bf16.vlgmr.msra.gmra.mrb[12].mxu0 %vm138_vm1, %v524_v33 }
 0x5ea   :  { %1635 = vmatpush3.bf16.msra.mxu0 %v2128_v1  ;;  %1638 = vmatprep.mubr.msk.bf16.mxu0 %vm1994_vm0, %v1993_v0 }
 0x5eb   :  { %1636 = vmatprep.subr.bf16.mxu0 %v1993_v0 }
 0x5ee   :  { %1637 = vmatpush3.bf16.msra.mxu0 %v2133_v3 }
 0x5ef   :  { %1650 = vmatprep.subr.bf16.mxu0 %v1993_v0 }
 0x5f0   :  { %v570_v34 = vpop.permute.xlu1 %569 }
 0x5f1   :  { %1631 = vmatmul.mubr.msk.bf16.vlgmr.msra.gmra.mrb[12].mxu1 %vm138_vm1, %v570_v34  ;;  %1639 = vmatmul.mubr.msk.bf16.vlgmr.msra.gmra.mrb[16].mxu0 %vm138_vm1, %v570_v34  ;;  %v869_v34 = vld [vmem:[#allocation2 + $0x3] sm:$0x1] }
 0x5f2   :  { %1643 = vmatpush3.bf16.msra.mxu1 %v2130_v2  ;;  %1646 = vmatprep.mubr.msk.bf16.mxu1 %vm1994_vm0, %v1993_v0 }
 0x5f3   :  { %1644 = vmatprep.subr.bf16.mxu1 %v1993_v0  ;;  %1651 = vmatpush3.bf16.msra.mxu0 %v2163_v28 }
 0x5f4   :  { %1652 = vmatprep.subr.bf16.mxu0 %v1993_v0  ;;  %1654 = vmatprep.mubr.msk.bf16.mxu0 %vm1994_vm0, %v1993_v0 }
 0x5f6   :  { %1645 = vmatpush3.bf16.msra.mxu1 %v2137_v4 }
 0x5f7   :  { %1653 = vmatpush3.bf16.msra.mxu0 %v2171_v30  ;;  %1658 = vmatprep.subr.bf16.mxu1 %v1993_v0 }
 0x5f8   :  { %1666 = vmatprep.subr.bf16.mxu0 %v1993_v0 }
 0x5f9   :  { %1647 = vmatmul.mubr.msk.bf16.vlgmr.msra.gmra.mrb[16].mxu1 %vm138_vm1, %v640_v35 }
 0x5fa   :  { %1659 = vmatpush3.bf16.msra.mxu1 %v2165_v29  ;;  %1662 = vmatprep.mubr.msk.bf16.mxu1 %vm1994_vm0, %v1993_v0 }
 0x5fb   :  { %1660 = vmatprep.subr.bf16.mxu1 %v1993_v0 }
 0x5fe   :  { %1661 = vmatpush3.bf16.msra.mxu1 %v2174_v31 }
 0x5ff   :  { %1674 = vmatprep.subr.bf16.mxu1 %v1993_v0 }
 0x6bc   :  { %v562_v36 = vpop.f32.mrb[12].mxu0 }
 0x6bd   :  { %v1624_v37 = vpop.f32.mrb[13].mxu0 }
 0x6be   :  { %v565_v38 = vpop.f32.mrb[14].mxu0 }
 0x6bf   :  { %v1625_v39 = vpop.f32.mrb[15].mxu0 }
 0x6c4   :  { %v608_v40 = vpop.f32.mrb[12].mxu1  ;;  %v675_v41 = vpop.f32.mrb[16].mxu0 }
 0x6c5   :  { %v609_v43 = vadd.f32 %v608_v40, %v562_v36  ;;  %v1632_v44 = vpop.f32.mrb[13].mxu1  ;;  %v1640_v45 = vpop.f32.mrb[17].mxu0 }
 0x6c6   :  { %v611_v46 = vpop.f32.mrb[14].mxu1  ;;  %v678_v47 = vpop.f32.mrb[18].mxu0 }
 0x6c7   :  { %v614_v48 = vadd.f32 %v2214_v42, %v609_v43  ;;  %v1633_v49 = vpop.f32.mrb[15].mxu1  ;;  %v1641_v50 = vpop.f32.mrb[19].mxu0 }
 0x6c9   :  { %1788 = vtanh.f32 %v614_v48  ;;  %v1481_v59 = vmul.f32 -1.442695, %v614_v48 }
 0x6cc   :  { %v718_v51 = vpop.f32.mrb[16].mxu1 }
 0x6cd   :  { %v719_v52 = vadd.f32 %v718_v51, %v675_v41  ;;  %v1648_v53 = vpop.f32.mrb[17].mxu1 }
 0x6ce   :  { %v721_v54 = vpop.f32.mrb[18].mxu1 }
 0x6cf   :  { %v724_v55 = vadd.f32 %v2152_v8, %v719_v52  ;;  %v1649_v56 = vpop.f32.mrb[19].mxu1 }
 0x6d1   :  { %1790 = vtanh.f32 %v724_v55  ;;  %v1484_v60 = vmul.f32 -1.442695, %v724_v55 }
 0x6d2   :  { %1792 = vpow2.f32 %v1481_v59 }
 0x6d3   :  { %v1789_v57 = vpop.eup %1788  ;;  %1794 = vpow2.f32 %v1484_v60 }
 0x6d4   :  { %624 = vrot.lane.b32.xlu0 %v1789_v57, %s1985_s19 }
 0x6db   :  { %v1791_v58 = vpop.eup %1790 }
 0x6dc   :  { %734 = vrot.lane.b32.xlu1 %v1791_v58, %s1985_s19  ;;  %v1793_v61 = vpop.eup %1792 }
 0x6dd   :  { %v618_v62 = vadd.f32 1.0, %v1793_v61  ;;  %v1795_v63 = vpop.eup %1794 }
 0x6de   :  { %v728_v5 = vadd.f32 1.0, %v1795_v63 }
 0x6df   :  { %1796 = vrcp.f32 %v618_v62 }
 0x6e0   :  { %1798 = vrcp.f32 %v728_v5 }
 0x6e9   :  { %v1797_v6 = vpop.eup %1796 }
 0x6ea   :  { %v1799_v10 = vpop.eup %1798  ;;  %v622_v13 = vmul.f32 %v1797_v6, %v2222_v17 }
 0x6eb   :  { %v732_v16 = vmul.f32 %v1799_v10, %v2226_v20 }
 0x746   :  { %v625_v7 = vpop.permute.xlu0 %624 }
 0x747   :  { %v627_v9 = vmul.f32 %v1797_v6, %v625_v7 }
 0x749   :  { %629 = vrot.lane.b32.xlu0 %v627_v9, %s1996_s3 }
 0x74e   :  { %v735_v11 = vpop.permute.xlu1 %734 }
 0x74f   :  { %v737_v12 = vmul.f32 %v1799_v10, %v735_v11 }
 0x751   :  { %739 = vrot.lane.b32.xlu1 %v737_v12, %s1996_s3 }
 0x7bb   :  { %v630_v14 = vpop.permute.xlu0 %629 }
 0x7bc   :  { %v2272_v15 = vadd.f32 %v630_v14, %v622_v13 }
 0x7be   :  { %1800 = vtanh.f32 %v2272_v15 }
 0x7c3   :  { %v740_v18 = vpop.permute.xlu1 %739 }
 0x7c4   :  { %v2276_v19 = vadd.f32 %v740_v18, %v732_v16 }
 0x7c6   :  { %1802 = vtanh.f32 %v2276_v19 }
 0x7c8   :  { %v1801_v21 = vpop.eup %1800 }
 0x7c9   :  { %635 = vrot.lane.b32.xlu0 %v1801_v21, %s1985_s19 }
 0x7d0   :  { %v1803_v22 = vpop.eup %1802 }
 0x7d1   :  { %745 = vrot.lane.b32.xlu1 %v1803_v22, %s1985_s19 }
 0x83b   :  { %v636_v23 = vpop.permute.xlu0 %635 }
 0x83c   :  { %v2281_v17 = vmul.f32 %v1797_v6, %v636_v23 }
 0x83e   :  { %v750_v25 = vpack.c.bf16 %v2281_v17, %v2281_v17 }
 0x840   :  { %752 = vrot.lane.b32.xlu0 %v750_v25, %s1996_s3 }
 0x843   :  { %v746_v20 = vpop.permute.xlu1 %745 }
 0x844   :  { %v748_v26 = vmul.f32 %v1799_v10, %v746_v20 }
 0x846   :  { %v749_v27 = vpack.c.bf16 %v748_v26, %v748_v26 }
 0x848   :  { %798 = vrot.lane.b32.xlu1 %v749_v27, %s1996_s3 }
 0x8b2   :  { %v753_v32 = vpop.permute.xlu0 %752 }
 0x8b3   :  { %1655 = vmatmul.mubr.msk.bf16.vlgmr.msra.gmra.mrb[20].mxu0 %vm138_vm1, %v753_v32 }
 0x8b4   :  { %1667 = vmatpush3.bf16.msra.mxu0 %v2128_v1  ;;  %1670 = vmatprep.mubr.msk.bf16.mxu0 %vm1994_vm0, %v1993_v0 }
 0x8b5   :  { %1668 = vmatprep.subr.bf16.mxu0 %v1993_v0 }
 0x8b8   :  { %1669 = vmatpush3.bf16.msra.mxu0 %v2133_v3 }
 0x8b9   :  { %1682 = vmatprep.subr.bf16.mxu0 %v1993_v0 }
 0x8ba   :  { %v799_v33 = vpop.permute.xlu1 %798 }
 0x8bb   :  { %1663 = vmatmul.mubr.msk.bf16.vlgmr.msra.gmra.mrb[20].mxu1 %vm138_vm1, %v799_v33  ;;  %1671 = vmatmul.mubr.msk.bf16.vlgmr.msra.gmra.mrb[24].mxu0 %vm138_vm1, %v799_v33 }
 0x8bc   :  { %1675 = vmatpush3.bf16.msra.mxu1 %v2130_v2  ;;  %1678 = vmatprep.mubr.msk.bf16.mxu1 %vm1994_vm0, %v1993_v0 }
 0x8bd   :  { %1676 = vmatprep.subr.bf16.mxu1 %v1993_v0  ;;  %1683 = vmatpush3.bf16.msra.mxu0 %v2163_v28 }
 0x8be   :  { %1684 = vmatprep.subr.bf16.mxu0 %v1993_v0  ;;  %1686 = vmatprep.mubr.msk.bf16.mxu0 %vm1994_vm0, %v1993_v0 }
 0x8c0   :  { %1677 = vmatpush3.bf16.msra.mxu1 %v2137_v4 }
 0x8c1   :  { %1685 = vmatpush3.bf16.msra.mxu0 %v2171_v30  ;;  %1690 = vmatprep.subr.bf16.mxu1 %v1993_v0 }
 0x8c2   :  { %1698 = vmatprep.subr.bf16.mxu0 %v1993_v0 }
 0x8c3   :  { %1679 = vmatmul.mubr.msk.bf16.vlgmr.msra.gmra.mrb[24].mxu1 %vm138_vm1, %v869_v34 }
 0x8c4   :  { %1691 = vmatpush3.bf16.msra.mxu1 %v2165_v29  ;;  %1694 = vmatprep.mubr.msk.bf16.mxu1 %vm1994_vm0, %v1993_v0 }
 0x8c5   :  { %1692 = vmatprep.subr.bf16.mxu1 %v1993_v0 }
 0x8c8   :  { %1693 = vmatpush3.bf16.msra.mxu1 %v2174_v31 }
 0x8c9   :  { %1706 = vmatprep.subr.bf16.mxu1 %v1993_v0 }
 0x986   :  { %v791_v35 = vpop.f32.mrb[20].mxu0 }
 0x987   :  { %v1656_v36 = vpop.f32.mrb[21].mxu0 }
 0x988   :  { %v794_v37 = vpop.f32.mrb[22].mxu0 }
 0x989   :  { %v1657_v38 = vpop.f32.mrb[23].mxu0 }
 0x98e   :  { %v837_v39 = vpop.f32.mrb[20].mxu1  ;;  %v904_v40 = vpop.f32.mrb[24].mxu0 }
 0x98f   :  { %v838_v41 = vadd.f32 %v837_v39, %v791_v35  ;;  %v1664_v43 = vpop.f32.mrb[21].mxu1  ;;  %v1672_v44 = vpop.f32.mrb[25].mxu0 }
 0x990   :  { %v840_v45 = vpop.f32.mrb[22].mxu1  ;;  %v907_v46 = vpop.f32.mrb[26].mxu0 }
 0x991   :  { %v843_v47 = vadd.f32 %v2214_v42, %v838_v41  ;;  %v1665_v48 = vpop.f32.mrb[23].mxu1  ;;  %v1673_v49 = vpop.f32.mrb[27].mxu0 }
 0x993   :  { %1804 = vtanh.f32 %v843_v47  ;;  %v1487_v58 = vmul.f32 -1.442695, %v843_v47 }
 0x996   :  { %v947_v50 = vpop.f32.mrb[24].mxu1 }
 0x997   :  { %v948_v51 = vadd.f32 %v947_v50, %v904_v40  ;;  %v1680_v52 = vpop.f32.mrb[25].mxu1 }
 0x998   :  { %v950_v53 = vpop.f32.mrb[26].mxu1 }
 0x999   :  { %v953_v54 = vadd.f32 %v2152_v8, %v948_v51  ;;  %v1681_v55 = vpop.f32.mrb[27].mxu1 }
 0x99b   :  { %1806 = vtanh.f32 %v953_v54  ;;  %v1490_v59 = vmul.f32 -1.442695, %v953_v54 }
 0x99c   :  { %1808 = vpow2.f32 %v1487_v58 }
 0x99d   :  { %v1805_v56 = vpop.eup %1804  ;;  %1810 = vpow2.f32 %v1490_v59 }
 0x99e   :  { %853 = vrot.lane.b32.xlu0 %v1805_v56, %s1985_s19 }
 0x9a5   :  { %v1807_v57 = vpop.eup %1806 }
 0x9a6   :  { %963 = vrot.lane.b32.xlu1 %v1807_v57, %s1985_s19  ;;  %v1809_v60 = vpop.eup %1808 }
 0x9a7   :  { %v847_v61 = vadd.f32 1.0, %v1809_v60  ;;  %v1811_v62 = vpop.eup %1810 }
 0x9a8   :  { %v957_v63 = vadd.f32 1.0, %v1811_v62 }
 0x9a9   :  { %1812 = vrcp.f32 %v847_v61 }
 0x9aa   :  { %1814 = vrcp.f32 %v957_v63 }
 0x9b3   :  { %v1813_v5 = vpop.eup %1812 }
 0x9b4   :  { %v1815_v9 = vpop.eup %1814  ;;  %v851_v12 = vmul.f32 %v1813_v5, %v2272_v15  ;;  %v1327_v15 = vrot.slane %v2281_v17, 6 }
 0x9b5   :  { %v961_v16 = vmul.f32 %v1815_v9, %v2276_v19 }
 0x9b6   :  { %v1336_v19 = vsel %vm1335_vm2, %v2231_v24, %v1327_v15 }
 0xa10   :  { %v854_v6 = vpop.permute.xlu0 %853 }
 0xa11   :  { %v856_v7 = vmul.f32 %v1813_v5, %v854_v6 }
 0xa13   :  { %858 = vrot.lane.b32.xlu0 %v856_v7, %s1996_s3 }
 0xa18   :  { %v964_v10 = vpop.permute.xlu1 %963 }
 0xa19   :  { %v966_v11 = vmul.f32 %v1815_v9, %v964_v10 }
 0xa1b   :  { %968 = vrot.lane.b32.xlu1 %v966_v11, %s1996_s3 }
 0xa85   :  { %v859_v13 = vpop.permute.xlu0 %858 }
 0xa86   :  { %v2322_v14 = vadd.f32 %v859_v13, %v851_v12 }
 0xa88   :  { %1816 = vtanh.f32 %v2322_v14 }
 0xa8d   :  { %v969_v18 = vpop.permute.xlu1 %968 }
 0xa8e   :  { %v2326_v21 = vadd.f32 %v969_v18, %v961_v16 }
 0xa90   :  { %1818 = vtanh.f32 %v2326_v21 }
 0xa92   :  { %v1817_v22 = vpop.eup %1816 }
 0xa93   :  { %864 = vrot.lane.b32.xlu0 %v1817_v22, %s1985_s19 }
 0xa9a   :  { %v1819_v23 = vpop.eup %1818 }
 0xa9b   :  { %974 = vrot.lane.b32.xlu1 %v1819_v23, %s1985_s19 }
 0xb05   :  { %v865_v25 = vpop.permute.xlu0 %864 }
 0xb06   :  { %v867_v20 = vmul.f32 %v1813_v5, %v865_v25 }
 0xb08   :  { %v979_v26 = vpack.c.bf16 %v867_v20, %v867_v20  ;;  %v1330_v27 = vrot.slane %v867_v20, 4 }
 0xb0a   :  { %981 = vrot.lane.b32.xlu0 %v979_v26, %s1996_s3  ;;  %v2334_v32 = vsel %vm1337_vm3, %v1336_v19, %v1330_v27 }
 0xb0d   :  { %v975_v33 = vpop.permute.xlu1 %974 }
 0xb0e   :  { %v977_v34 = vmul.f32 %v1815_v9, %v975_v33 }
 0xb10   :  { %v978_v35 = vpack.c.bf16 %v977_v34, %v977_v34 }
 0xb12   :  { %1027 = vrot.lane.b32.xlu1 %v978_v35, %s1996_s3 }
 0xb7c   :  { %v982_v36 = vpop.permute.xlu0 %981 }
 0xb7d   :  { %1687 = vmatmul.mubr.msk.bf16.vlgmr.msra.gmra.mrb[28].mxu0 %vm138_vm1, %v982_v36 }
 0xb7e   :  { %1699 = vmatpush3.bf16.msra.mxu0 %v2128_v1  ;;  %1702 = vmatprep.mubr.msk.bf16.mxu0 %vm1994_vm0, %v1993_v0  ;;  %v1098_v1 = vld [vmem:[#allocation2 + $0x4] sm:$0x1] }
 0xb7f   :  { %1700 = vmatprep.subr.bf16.mxu0 %v1993_v0 }
 0xb82   :  { %1701 = vmatpush3.bf16.msra.mxu0 %v2133_v3 }
 0xb83   :  { %1714 = vmatprep.subr.bf16.mxu0 %v1993_v0 }
 0xb84   :  { %v1028_v24 = vpop.permute.xlu1 %1027 }
 0xb85   :  { %1695 = vmatmul.mubr.msk.bf16.vlgmr.msra.gmra.mrb[28].mxu1 %vm138_vm1, %v1028_v24  ;;  %1703 = vmatmul.mubr.msk.bf16.vlgmr.msra.gmra.mrb[32].mxu0 %vm138_vm1, %v1028_v24 }
 0xb86   :  { %1707 = vmatpush3.bf16.msra.mxu1 %v2130_v2  ;;  %1710 = vmatprep.mubr.msk.bf16.mxu1 %vm1994_vm0, %v1993_v0 }
 0xb87   :  { %1708 = vmatprep.subr.bf16.mxu1 %v1993_v0  ;;  %1715 = vmatpush3.bf16.msra.mxu0 %v2163_v28 }
 0xb88   :  { %1716 = vmatprep.subr.bf16.mxu0 %v1993_v0  ;;  %1718 = vmatprep.mubr.msk.bf16.mxu0 %vm1994_vm0, %v1993_v0 }
 0xb8a   :  { %1709 = vmatpush3.bf16.msra.mxu1 %v2137_v4 }
 0xb8b   :  { %1717 = vmatpush3.bf16.msra.mxu0 %v2171_v30  ;;  %1722 = vmatprep.subr.bf16.mxu1 %v1993_v0 }
 0xb8c   :  { %1730 = vmatprep.subr.bf16.mxu0 %v1993_v0 }
 0xb8d   :  { %1711 = vmatmul.mubr.msk.bf16.vlgmr.msra.gmra.mrb[32].mxu1 %vm138_vm1, %v1098_v1 }
 0xb8e   :  { %1723 = vmatpush3.bf16.msra.mxu1 %v2165_v29  ;;  %1726 = vmatprep.mubr.msk.bf16.mxu1 %vm1994_vm0, %v1993_v0 }
 0xb8f   :  { %1724 = vmatprep.subr.bf16.mxu1 %v1993_v0 }
 0xb92   :  { %1725 = vmatpush3.bf16.msra.mxu1 %v2174_v31 }
 0xc50   :  { %v1020_v2 = vpop.f32.mrb[28].mxu0 }
 0xc51   :  { %v1688_v3 = vpop.f32.mrb[29].mxu0 }
 0xc52   :  { %v1023_v4 = vpop.f32.mrb[30].mxu0 }
 0xc53   :  { %v1689_v28 = vpop.f32.mrb[31].mxu0 }
 0xc58   :  { %v1066_v30 = vpop.f32.mrb[28].mxu1  ;;  %v1133_v17 = vpop.f32.mrb[32].mxu0 }
 0xc59   :  { %v1067_v37 = vadd.f32 %v1066_v30, %v1020_v2  ;;  %v1696_v38 = vpop.f32.mrb[29].mxu1  ;;  %v1704_v39 = vpop.f32.mrb[33].mxu0 }
 0xc5a   :  { %v1069_v40 = vpop.f32.mrb[30].mxu1  ;;  %v1136_v41 = vpop.f32.mrb[34].mxu0 }
 0xc5b   :  { %v1072_v29 = vadd.f32 %v2214_v42, %v1067_v37  ;;  %v1697_v43 = vpop.f32.mrb[31].mxu1  ;;  %v1705_v44 = vpop.f32.mrb[35].mxu0  ;;  %v1763_v41 = vld [vmem:[#allocation10 + $0x8] sm:$0xff]  }
 0xc5d   :  { %1820 = vtanh.f32 %v1072_v29  ;;  %v1493_v52 = vmul.f32 -1.442695, %v1072_v29 }
 0xc60   :  { %v1176_v45 = vpop.f32.mrb[32].mxu1 }
 0xc61   :  { %v1177_v46 = vadd.f32 %v1176_v45, %v1133_v17  ;;  %v1712_v47 = vpop.f32.mrb[33].mxu1 }
 0xc62   :  { %v1179_v31 = vpop.f32.mrb[34].mxu1  ;;  %v1997_v47 = vmov 1983009808  }
 0xc63   :  { %v1182_v48 = vadd.f32 %v2152_v8, %v1177_v46  ;;  %v1713_v49 = vpop.f32.mrb[35].mxu1  ;;  %v1411_v31 = vunpack.c.l.s4 %v1997_v47 }
 0xc65   :  { %1822 = vtanh.f32 %v1182_v48  ;;  %v1496_v53 = vmul.f32 -1.442695, %v1182_v48  ;;  %v1413_v48 = vlaneseq  ;;  %v1412_v49 = vunpack.c.0.s8 %v1411_v31 }
 0xc66   :  { %1824 = vpow2.f32 %v1493_v52 }
 0xc67   :  { %v1821_v50 = vpop.eup %1820  ;;  %1826 = vpow2.f32 %v1496_v53 }
 0xc68   :  { %1082 = vrot.lane.b32.xlu0 %v1821_v50, %s1985_s19  ;;  %v1414_v50 = vshrl.u32 %v1413_v48, 7 }
 0xc6f   :  { %v1823_v51 = vpop.eup %1822 }
 0xc70   :  { %1192 = vrot.lane.b32.xlu1 %v1823_v51, %s1985_s19  ;;  %v1825_v54 = vpop.eup %1824  ;;  %v1415_v51 = vsub.s32 %v1412_v49, %v1414_v50 }
 0xc71   :  { %v1076_v55 = vadd.f32 1.0, %v1825_v54  ;;  %v1827_v56 = vpop.eup %1826 }
 0xc72   :  { %v1186_v57 = vadd.f32 1.0, %v1827_v56 }
 0xc73   :  { %1828 = vrcp.f32 %v1076_v55 }
 0xc74   :  { %1830 = vrcp.f32 %v1186_v57 }
 0xc7d   :  { %v1829_v58 = vpop.eup %1828 }
 0xc7e   :  { %v1831_v60 = vpop.eup %1830  ;;  %v1080_v63 = vmul.f32 %v1829_v58, %v2322_v14 }
 0xc7f   :  { %v1190_v7 = vmul.f32 %v1831_v60, %v2326_v21 }
 0xcda   :  { %v1083_v8 = vpop.permute.xlu0 %1082 }
 0xcdb   :  { %v1085_v59 = vmul.f32 %v1829_v58, %v1083_v8 }
 0xcdd   :  { %1087 = vrot.lane.b32.xlu0 %v1085_v59, %s1996_s3 }
 0xce2   :  { %v1193_v61 = vpop.permute.xlu1 %1192 }
 0xce3   :  { %v1195_v62 = vmul.f32 %v1831_v60, %v1193_v61 }
 0xce5   :  { %1197 = vrot.lane.b32.xlu1 %v1195_v62, %s1996_s3 }
 0xd4f   :  { %v1088_v5 = vpop.permute.xlu0 %1087 }
 0xd50   :  { %v1090_v6 = vadd.f32 %v1088_v5, %v1080_v63 }
 0xd52   :  { %1832 = vtanh.f32 %v1090_v6 }
 0xd57   :  { %v1198_v9 = vpop.permute.xlu1 %1197 }
 0xd58   :  { %v1200_v10 = vadd.f32 %v1198_v9, %v1190_v7 }
 0xd5a   :  { %1834 = vtanh.f32 %v1200_v10 }
 0xd5c   :  { %v1833_v11 = vpop.eup %1832 }
 0xd5d   :  { %1093 = vrot.lane.b32.xlu0 %v1833_v11, %s1985_s19 }
 0xd64   :  { %v1835_v12 = vpop.eup %1834 }
 0xd65   :  { %1203 = vrot.lane.b32.xlu1 %v1835_v12, %s1985_s19 }
 0xdcf   :  { %v1094_v13 = vpop.permute.xlu0 %1093 }
 0xdd0   :  { %v1096_v16 = vmul.f32 %v1829_v58, %v1094_v13 }
 0xdd2   :  { %v1208_v18 = vpack.c.bf16 %v1096_v16, %v1096_v16  ;;  %v1333_v22 = vrot.slane %v1096_v16, 2 }
 0xdd4   :  { %1210 = vrot.lane.b32.xlu0 %v1208_v18, %s1996_s3  ;;  %v1340_v14 = vsel %vm1339_vm4, %v2334_v32, %v1333_v22 }
 0xdd7   :  { %v1204_v23 = vpop.permute.xlu1 %1203 }
 0xdd8   :  { %v1206_v21 = vmul.f32 %v1831_v60, %v1204_v23 }
 0xdda   :  { %v1207_v15 = vpack.c.bf16 %v1206_v21, %v1206_v21 }
 0xddc   :  { %1256 = vrot.lane.b32.xlu1 %v1207_v15, %s1996_s3 }
 0xe46   :  { %v1211_v25 = vpop.permute.xlu0 %1210 }
 0xe47   :  { %1719 = vmatmul.mubr.msk.bf16.vlgmr.msra.gmra.mrb[36].mxu0 %vm138_vm1, %v1211_v25 }
 0xe48   :  { %1734 = vmatprep.mubr.msk.bf16.mxu0 %vm1994_vm0, %v1993_v0 }
 0xe4e   :  { %v1257_v20 = vpop.permute.xlu1 %1256 }
 0xe4f   :  { %1727 = vmatmul.mubr.msk.bf16.vlgmr.msra.gmra.mrb[36].mxu1 %vm138_vm1, %v1257_v20 }
 0xf1a   :  { %v1249_v26 = vpop.f32.mrb[36].mxu0 }
 0xf1b   :  { %v1720_v27 = vpop.f32.mrb[37].mxu0 }
 0xf1c   :  { %v1252_v19 = vpop.f32.mrb[38].mxu0 }
 0xf1d   :  { %v1721_v33 = vpop.f32.mrb[39].mxu0 }
 0xf22   :  { %v1295_v34 = vpop.f32.mrb[36].mxu1 }
 0xf23   :  { %v1296_v32 = vadd.f32 %v1295_v34, %v1249_v26  ;;  %v1728_v35 = vpop.f32.mrb[37].mxu1 }
 0xf24   :  { %v1298_v36 = vpop.f32.mrb[38].mxu1 }
 0xf25   :  { %v1301_v24 = vadd.f32 %v2214_v42, %v1296_v32  ;;  %v1729_v1 = vpop.f32.mrb[39].mxu1  ;;  %v1762_v42 = vld [vmem:[#allocation10] sm:$0xff]  }
 0xf26   :  { %1731 = vmatpush3.bf16.msra.mxu0 %v1762_v42 }
 0xf27   :  { %1836 = vtanh.f32 %v1301_v24  ;;  %v1499_v3 = vmul.f32 -1.442695, %v1301_v24  ;;  %1732 = vmatprep.subr.bf16.mxu0 %v1993_v0  ;;  %v1500_v0 = vld [vmem:[%s2413_s8] ss:$0 sm:$0xff] }
 0xf29   :  { %1838 = vpow2.f32 %v1499_v3 }
 0xf2a   :  { %1733 = vmatpush3.bf16.msra.mxu0 %v1763_v41 }
 0xf31   :  { %v1837_v2 = vpop.eup %1836 }
 0xf32   :  { %1311 = vrot.lane.b32.xlu0 %v1837_v2, %s1985_s19 }
 0xf33   :  { %v1839_v4 = vpop.eup %1838 }
 0xf34   :  { %v1305_v28 = vadd.f32 1.0, %v1839_v4 }
 0xf36   :  { %1840 = vrcp.f32 %v1305_v28 }
 0xf40   :  { %v1841_v30 = vpop.eup %1840 }
 0xf41   :  { %v1309_v38 = vmul.f32 %v1841_v30, %v1090_v6 }
 0xfa4   :  { %v1312_v17 = vpop.permute.xlu0 %1311 }
 0xfa5   :  { %v1314_v37 = vmul.f32 %v1841_v30, %v1312_v17 }
 0xfa7   :  { %1316 = vrot.lane.b32.xlu1 %v1314_v37, %s1996_s3 }
0x1019   :  { %v1317_v39 = vpop.permute.xlu1 %1316 }
0x101a   :  { %v1319_v40 = vadd.f32 %v1317_v39, %v1309_v38 }
0x101c   :  { %1842 = vtanh.f32 %v1319_v40 }
0x1026   :  { %v1843_v29 = vpop.eup %1842 }
0x1027   :  { %1322 = vrot.lane.b32.xlu0 %v1843_v29, %s1985_s19  ;;  %s1998_s19 = smov [#allocation11]  }
0x1028   :  { %s1448_s15 = sshll.u32 %s1998_s19, 4  ;;  %s1449_s15 = int_to_ptr.vmem [resolvable:$true] %s1448_s15 }
0x1029   :  { %s1954_s8 = scalar_lea.vmem %s1449_s15, 160  ;;  %p1959_p13 = scmp.lt.s32.totalorder %s1449_s15, %s1449_s15 }
0x102a   :  { %p1955_p12 = scmp.ne.s32.totalorder %s1449_s15, %s1954_s8  ;;  %p1960_p0 = scmp.lt.s32.totalorder %s1954_s8, %s1954_s8 }
0x102c   :  { %p1961_p1 = por %p1960_p0, %p1959_p13 }
0x102e   :  { %p1962_p2 = pnand %p1961_p1, %p1955_p12 }
0x1099   :  { %v1323_v43 = vpop.permute.xlu0 %1322 }
0x109a   :  { %v1325_v44 = vmul.f32 %v1841_v30, %v1323_v43 }
0x109c   :  { %v1341_v45 = vpack.c.bf16 %v1325_v44, %v1340_v14 }
0x109e   :  { %1349 = vrot.lane.b32.xlu1 %v1341_v45, %s1996_s3 }
0x1110   :  { %v1350_v46 = vpop.permute.xlu1 %1349 }
0x1111   :  { %1735 = vmatmul.mubr.msk.bf16.vlgmr.msra.gmra.mrb[40].mxu0 %vm138_vm1, %v1350_v46 }
0x11e4   :  { %v1400_v52 = vpop.f32.mrb[40].mxu0 }
0x11e5   :  { %v1401_v53 = vadd.f32 %v1500_v0, %v1400_v52  ;;  %v1736_v54 = vpop.f32.mrb[41].mxu0 }
0x11e6   :  { %v1403_v55 = vpop.f32.mrb[42].mxu0 }
0x11e7   :  { %v1409_v56 = vcombine.high %v1401_v53, %v1401_v53  ;;  %v1416_v57 = vrot.slane %v1401_v53, %v1415_v51  ;;  %1504 = vst.sshfl [vmem:[#allocation11] sm:$0x3 pattern:$0x76325410] %v1401_v53  ;;  %v1404_v58 = vadd.f32 %v1500_v0, %v1403_v55  ;;  %v1737_v8 = vpop.f32.mrb[43].mxu0 }
0x11e9   :  { %v1423_v59 = vrot.slane %v1409_v56, %v1415_v51  ;;  %v1424_v60 = vcombine.high %v1416_v57, %v1416_v57  ;;  %1505 = vst.sshfl [vmem:[#allocation11 + $0x4] sm:$0x3 pattern:$0x76325410] %v1409_v56 }
0x11ea   :  { %1506 = vst.sshfl [vmem:[#allocation11 + $0x8] sm:$0x3 pattern:$0x76325410] %v1404_v58 }
0x11eb   :  { %v1425_v61 = vcombine.high %v1423_v59, %v1423_v59  ;;  %1439 = vst [vmem:[#allocation11 + $0x2] sm:$0x3] %v1424_v60 }
0x11ed   :  { %1441 = vst [vmem:[#allocation11 + $0x6] sm:$0x3] %v1425_v61 }
0x11ee   :  { %1965 = shalt.err (!%p1962_p2)
}
0x11ef   :  { %s1966_s18 = scalar_lea.hbm %s2414_s9, 160 }
0x11f0   :  { %p1967_p3 = scmp.ne.s32.totalorder %s2414_s9, %s1966_s18  ;;  %p1970_p4 = scmp.lt.u32.totalorder %s1966_s18, %s2414_s9 }
0x11f2   :  { %p1972_p5 = pnand %p1970_p4, %p1967_p3 }
0x11f4   :  { %1975 = shalt.err (!%p1972_p5)
}
0x11f5   :  { %s1999_s23 = smov 2  }
0x11f6   :  { %1454 = dma.vmem_to_hbm [thread:$0]  %s1449_s15, 160, %s2414_s9, [#allocation4], %s1996_s3, %s1996_s3, %s1999_s23  }
0x11f7   :  { %1982 = dma.done.wait [#allocation4], 160  }
0x11f8   :  { %1983 = vsyncadd [#allocation4], 4294967136 }
0x11f9   :  { %1458 = vsyncpa [#allocation3], 1 }
0x11fa   :  { %1459 = vsyncpa [#allocation6], 1 }
0x11fb   :  { %1460 = vsyncpa [#allocation9], 1 }
0x11fc   :  { %1461 = vsyncpa [#allocation4], 1 }

// kernel: tpu_custom_call.1
= control target key start
LH: loop header
LB: loop body
LE: loop exit
PB: predicated region body
PF: predicated region fallthrough
CT: control target
= control target key end

     0   :  { %14 = vsyncpa [#allocation3], 0  ;;  %s2405_s0 = inlined_call_operand.hbm [shape: bf16[5,2,32], index: 0, kind: input, shape index: {}]   ;;  %s2406_s1 = inlined_call_operand.hbm [shape: bf16[32,128], index: 1, kind: input, shape index: {}]   ;;  %s2407_s2 = inlined_call_operand.hbm [shape: bf16[32,128], index: 2, kind: input, shape index: {}]   ;;  %s2408_s3 = inlined_call_operand.vmem [shape: f32[1,128], index: 3, kind: input, shape index: {}]   ;;  %s2409_s4 = inlined_call_operand.hbm [shape: bf16[32,128], index: 4, kind: input, shape index: {}]   ;;  %s2410_s5 = inlined_call_operand.vmem [shape: bf16[32,128], index: 5, kind: input, shape index: {}]   ;;  %s2411_s6 = inlined_call_operand.vmem [shape: f32[1,128], index: 6, kind: input, shape index: {}]   ;;  %s2412_s7 = inlined_call_operand.hbm [shape: bf16[32,128], index: 7, kind: input, shape index: {}]   ;;  %s2413_s8 = inlined_call_operand.vmem [shape: f32[1,128], index: 8, kind: input, shape index: {}]   ;;  %s2414_s9 = inlined_call_operand.hbm [shape: f32[5,2,128], index: 9, kind: output, shape index: {}]  }
   0x1   :  { %15 = vsyncpa [#allocation6], 0 }
   0x2   :  { %16 = vsyncpa [#allocation9], 0 }
   0x3   :  { %17 = vsyncpa [#allocation4], 0  ;;  %s1984_s30 = smov [#allocation5]   ;;  %s1844_s13 = scalar_lea.hbm %s2406_s1, 256 }
   0x4   :  { %s35_s10 = sshll.u32 %s1984_s30, 4  ;;  %p1845_p0 = scmp.ne.s32.totalorder %s2406_s1, %s1844_s13  ;;  %s36_s10 = int_to_ptr.vmem [resolvable:$true] %s35_s10 }
   0x5   :  { %p1848_p1 = scmp.lt.u32.totalorder %s1844_s13, %s2406_s1 }
   0x7   :  { %p1850_p2 = pnand %p1848_p1, %p1845_p0 }
   0x9   :  { %1853 = shalt.err (!%p1850_p2)
}
   0xa   :  { %s1854_s18 = scalar_lea.vmem %s36_s10, 256  ;;  %p1859_p4 = scmp.lt.s32.totalorder %s36_s10, %s36_s10 }
   0xb   :  { %p1855_p3 = scmp.ne.s32.totalorder %s36_s10, %s1854_s18  ;;  %p1860_p5 = scmp.lt.s32.totalorder %s1854_s18, %s1854_s18 }
   0xd   :  { %p1861_p6 = por %p1860_p5, %p1859_p4 }
   0xf   :  { %p1862_p7 = pnand %p1861_p6, %p1855_p3 }
  0x11   :  { %1865 = shalt.err (!%p1862_p7)
}
  0x12   :  { %s1985_s19 = smov 64   ;;  %s1986_s20 = smov 4  }
  0x13   :  { %41 = dma.hbm_to_vmem [thread:$0]  %s2406_s1, 256, %s36_s10, [#allocation6], %s1985_s19, %s1985_s19, %s1986_s20  }
  0x14   :  { %s1987_s23 = smov [#allocation8]   ;;  %s1988_s25 = smov [#allocation2]  }
  0x15   :  { %s61_s24 = sshll.u32 %s1987_s23, 4  ;;  %s23_s26 = sshll.u32 %s1988_s25, 4  ;;  %s62_s24 = int_to_ptr.vmem [resolvable:$true] %s61_s24  ;;  %s24_s26 = int_to_ptr.vmem [resolvable:$true] %s23_s26 }
  0x16   :  { %s1866_s29 = scalar_lea.hbm %s2409_s4, 256 }
  0x17   :  { %p1867_p8 = scmp.ne.s32.totalorder %s2409_s4, %s1866_s29  ;;  %p1870_p9 = scmp.lt.u32.totalorder %s1866_s29, %s2409_s4 }
  0x19   :  { %p1872_p10 = pnand %p1870_p9, %p1867_p8 }
  0x1b   :  { %1875 = shalt.err (!%p1872_p10)
}
  0x1c   :  { %s1876_s1 = scalar_lea.vmem %s62_s24, 256  ;;  %p1881_p12 = scmp.lt.s32.totalorder %s62_s24, %s62_s24 }
  0x1d   :  { %p1877_p11 = scmp.ne.s32.totalorder %s62_s24, %s1876_s1  ;;  %p1882_p13 = scmp.lt.s32.totalorder %s1876_s1, %s1876_s1 }
  0x1f   :  { %p1883_p0 = por %p1882_p13, %p1881_p12 }
  0x21   :  { %p1884_p1 = pnand %p1883_p0, %p1877_p11 }
  0x23   :  { %1887 = shalt.err (!%p1884_p1)
}
  0x24   :  { %67 = dma.hbm_to_vmem [thread:$0]  %s2409_s4, 256, %s62_s24, [#allocation9], %s1985_s19, %s1985_s19, %s1986_s20  }
  0x25   :  { %s1888_s17 = scalar_lea.hbm %s2405_s0, 80 }
  0x26   :  { %p1889_p2 = scmp.ne.s32.totalorder %s2405_s0, %s1888_s17  ;;  %p1892_p3 = scmp.lt.u32.totalorder %s1888_s17, %s2405_s0 }
  0x28   :  { %p1894_p4 = pnand %p1892_p3, %p1889_p2 }
  0x2a   :  { %1897 = shalt.err (!%p1894_p4)
}
  0x2b   :  { %s1898_s25 = scalar_lea.vmem %s24_s26, 80  ;;  %s1902_s27 = scalar_lea.vmem %s24_s26, 96 }
  0x2c   :  { %p1899_p5 = scmp.ne.s32.totalorder %s24_s26, %s1898_s25  ;;  %p1903_p6 = scmp.lt.s32.totalorder %s24_s26, %s24_s26 }
  0x2d   :  { %p1904_p7 = scmp.lt.s32.totalorder %s1902_s27, %s1898_s25 }
  0x2f   :  { %p1905_p8 = por %p1904_p7, %p1903_p6 }
  0x31   :  { %p1906_p9 = pnand %p1905_p8, %p1899_p5 }
  0x33   :  { %1909 = shalt.err (!%p1906_p9)
}
  0x34   :  { %s1989_s4 = smov 16   ;;  %s1990_s24 = smov 1  }
  0x35   :  { %29 = dma.hbm_to_vmem [thread:$0]  %s2405_s0, 80, %s24_s26, [#allocation3], %s1989_s4, %s1989_s4, %s1990_s24  }
  0x36   :  { %s1991_s30 = smov [#allocation7]   ;;  %s1992_s12 = smov [#allocation10]  }
  0x37   :  { %s47_s11 = sshll.u32 %s1991_s30, 4  ;;  %s77_s13 = sshll.u32 %s1992_s12, 4  ;;  %s48_s11 = int_to_ptr.vmem [resolvable:$true] %s47_s11  ;;  %s78_s13 = int_to_ptr.vmem [resolvable:$true] %s77_s13 }
  0x38   :  { %s1910_s14 = scalar_lea.hbm %s2407_s2, 256 }
  0x39   :  { %p1911_p10 = scmp.ne.s32.totalorder %s2407_s2, %s1910_s14  ;;  %p1914_p11 = scmp.lt.u32.totalorder %s1910_s14, %s2407_s2 }
  0x3b   :  { %p1916_p12 = pnand %p1914_p11, %p1911_p10 }
  0x3d   :  { %1919 = shalt.err (!%p1916_p12)
}
  0x3e   :  { %s1920_s0 = scalar_lea.vmem %s48_s11, 256  ;;  %p1925_p0 = scmp.lt.s32.totalorder %s48_s11, %s48_s11 }
  0x3f   :  { %p1921_p13 = scmp.ne.s32.totalorder %s48_s11, %s1920_s0  ;;  %p1926_p1 = scmp.lt.s32.totalorder %s1920_s0, %s1920_s0 }
  0x41   :  { %p1927_p2 = por %p1926_p1, %p1925_p0 }
  0x43   :  { %p1928_p3 = pnand %p1927_p2, %p1921_p13 }
  0x45   :  { %1931 = shalt.err (!%p1928_p3)
}
  0x46   :  { %53 = dma.hbm_to_vmem [thread:$0]  %s2407_s2, 256, %s48_s11, [#allocation6], %s1985_s19, %s1985_s19, %s1986_s20  }
  0x47   :  { %s1932_s25 = scalar_lea.hbm %s2412_s7, 256 }
  0x48   :  { %p1933_p4 = scmp.ne.s32.totalorder %s2412_s7, %s1932_s25  ;;  %p1936_p5 = scmp.lt.u32.totalorder %s1932_s25, %s2412_s7 }
  0x4a   :  { %p1938_p6 = pnand %p1936_p5, %p1933_p4 }
  0x4c   :  { %1941 = shalt.err (!%p1938_p6)
}
  0x4d   :  { %s1942_s29 = scalar_lea.vmem %s78_s13, 256  ;;  %p1947_p8 = scmp.lt.s32.totalorder %s78_s13, %s78_s13 }
  0x4e   :  { %p1943_p7 = scmp.ne.s32.totalorder %s78_s13, %s1942_s29  ;;  %p1948_p9 = scmp.lt.s32.totalorder %s1942_s29, %s1942_s29 }
  0x50   :  { %p1949_p10 = por %p1948_p9, %p1947_p8 }
  0x52   :  { %p1950_p11 = pnand %p1949_p10, %p1943_p7 }
  0x54   :  { %1953 = shalt.err (!%p1950_p11)
}
  0x55   :  { %83 = dma.hbm_to_vmem [thread:$0]  %s2412_s7, 256, %s78_s13, [#allocation9], %s1985_s19, %s1985_s19, %s1986_s20  }
  0x56   :  { %1976 = dma.done.wait [#allocation3], 80  }
  0x57   :  { %1977 = vsyncadd [#allocation3], 4294967216 }
  0x58   :  { %1978 = dma.done.wait [#allocation6], 512  }
  0x59   :  { %1979 = vsyncadd [#allocation6], 4294966784 }
  0x5a   :  { %1980 = dma.done.wait [#allocation9], 512  }
  0x5b   :  { %1981 = vsyncadd [#allocation9], 4294966784  ;;  %v1993_v0 = vmov 0.0   ;;  %vm1994_vm0 = vmmov 0   ;;  %v2128_v1 = vld [vmem:[#allocation7] sm:$0xff]   ;;  %v2130_v2 = vld [vmem:[#allocation5] sm:$0xff]  }
  0x5c   :  { %1570 = vmatprep.subr.bf16.mxu0 %v1993_v0  ;;  %1578 = vmatprep.subr.bf16.mxu1 %v1993_v0  ;;  %v2133_v3 = vld [vmem:[#allocation7 + $0x8] sm:$0xff]   ;;  %v2137_v4 = vld [vmem:[#allocation5 + $0x8] sm:$0xff]   ;;  %vm138_vm1 = vcmask 261120   ;;  %v1995_v6 = vmov 0   ;;  %v2165_v29 = vld [vmem:[#allocation8] sm:$0xff]   ;;  %vm1335_vm2 = vcmask 1041408  }
  0x5d   :  { %1574 = vmatprep.mubr.msk.bf16.mxu0 %vm1994_vm0, %v1993_v0  ;;  %1582 = vmatprep.mubr.msk.bf16.mxu1 %vm1994_vm0, %v1993_v0  ;;  %v125_v5 = vld [vmem:[#allocation2] sm:$0x1]  ;;  %v2152_v8 = vld [vmem:[%s2408_s3] ss:$0 sm:$0xff]  ;;  %s1996_s3 = smov 32   ;;  %v2171_v30 = vld [vmem:[%s2410_s5 + $0x8] sm:$0xff]  }
  0x5e   :  { %1571 = vmatpush3.bf16.msra.mxu0 %v2128_v1  ;;  %1579 = vmatpush3.bf16.msra.mxu1 %v2130_v2  ;;  %v2163_v28 = vld [vmem:[%s2410_s5] sm:$0xff]   ;;  %v411_v41 = vld [vmem:[#allocation2 + $0x1] sm:$0x1]  ;;  %vm1337_vm3 = vcmask 1043456   ;;  %vm1339_vm4 = vcmask 1045504  }
  0x5f   :  { %1572 = vmatprep.subr.bf16.mxu0 %v1993_v0  ;;  %1580 = vmatprep.subr.bf16.mxu1 %v1993_v0  ;;  %v2174_v31 = vld [vmem:[#allocation8 + $0x8] sm:$0xff]  }
  0x60   :  { %v2214_v42 = vld [vmem:[%s2411_s6] ss:$0 sm:$0xff] }
  0x62   :  { %1573 = vmatpush3.bf16.msra.mxu0 %v2133_v3  ;;  %1581 = vmatpush3.bf16.msra.mxu1 %v2137_v4 }
  0x63   :  { %1586 = vmatprep.subr.bf16.mxu0 %v1993_v0  ;;  %1594 = vmatprep.subr.bf16.mxu1 %v1993_v0 }
  0x65   :  { %1575 = vmatmul.mubr.bf16.vlgmr.msra.gmra.mrb[0].mxu0 %v1995_v6  ;;  %1583 = vmatmul.mubr.msk.bf16.vlgmr.msra.gmra.mrb[0].mxu1 %vm138_vm1, %v125_v5 }
  0x66   :  { %1590 = vmatprep.mubr.msk.bf16.mxu0 %vm1994_vm0, %v1993_v0  ;;  %1598 = vmatprep.mubr.msk.bf16.mxu1 %vm1994_vm0, %v1993_v0 }
  0x67   :  { %1587 = vmatpush3.bf16.msra.mxu0 %v2163_v28  ;;  %1595 = vmatpush3.bf16.msra.mxu1 %v2165_v29 }
  0x68   :  { %1588 = vmatprep.subr.bf16.mxu0 %v1993_v0  ;;  %1596 = vmatprep.subr.bf16.mxu1 %v1993_v0 }
  0x6b   :  { %1589 = vmatpush3.bf16.msra.mxu0 %v2171_v30  ;;  %1597 = vmatpush3.bf16.msra.mxu1 %v2174_v31 }
  0x6c   :  { %1602 = vmatprep.subr.bf16.mxu0 %v1993_v0  ;;  %1610 = vmatprep.subr.bf16.mxu1 %v1993_v0 }
  0x6e   :  { %1591 = vmatmul.mubr.bf16.vlgmr.msra.gmra.mrb[4].mxu0 %v1995_v6 }
  0x6f   :  { %1603 = vmatpush3.bf16.msra.mxu0 %v2128_v1  ;;  %1606 = vmatprep.mubr.msk.bf16.mxu0 %vm1994_vm0, %v1993_v0 }
  0x70   :  { %1604 = vmatprep.subr.bf16.mxu0 %v1993_v0 }
  0x73   :  { %1605 = vmatpush3.bf16.msra.mxu0 %v2133_v3 }
  0x74   :  { %1618 = vmatprep.subr.bf16.mxu0 %v1993_v0 }
 0x138   :  { %v176_v7 = vpop.f32.mrb[0].mxu0  ;;  %v231_v9 = vpop.f32.mrb[0].mxu1 }
 0x139   :  { %v1576_v10 = vpop.f32.mrb[1].mxu0  ;;  %v232_v11 = vadd.f32 %v231_v9, %v176_v7  ;;  %v1584_v12 = vpop.f32.mrb[1].mxu1 }
 0x13a   :  { %v179_v13 = vpop.f32.mrb[2].mxu0  ;;  %v234_v14 = vpop.f32.mrb[2].mxu1 }
 0x13b   :  { %v1577_v15 = vpop.f32.mrb[3].mxu0  ;;  %v243_v16 = vadd.f32 %v2152_v8, %v232_v11  ;;  %v1585_v17 = vpop.f32.mrb[3].mxu1 }
 0x13d   :  { %1764 = vtanh.f32 %v243_v16  ;;  %v1468_v19 = vmul.f32 -1.442695, %v243_v16 }
 0x13f   :  { %1766 = vpow2.f32 %v1468_v19 }
 0x141   :  { %v315_v36 = vpop.f32.mrb[4].mxu0 }
 0x142   :  { %v1592_v37 = vpop.f32.mrb[5].mxu0 }
 0x143   :  { %v318_v38 = vpop.f32.mrb[6].mxu0 }
 0x144   :  { %v1593_v39 = vpop.f32.mrb[7].mxu0 }
 0x147   :  { %v1765_v18 = vpop.eup %1764 }
 0x148   :  { %253 = vrot.lane.b32.xlu0 %v1765_v18, %s1985_s19 }
 0x149   :  { %v1767_v20 = vpop.eup %1766 }
 0x14a   :  { %v247_v21 = vadd.f32 1.0, %v1767_v20 }
 0x14c   :  { %1768 = vrcp.f32 %v247_v21 }
 0x156   :  { %v1769_v22 = vpop.eup %1768 }
 0x157   :  { %v251_v25 = vmul.f32 0.0, %v1769_v22 }
 0x1ba   :  { %v254_v23 = vpop.permute.xlu0 %253 }
 0x1bb   :  { %v256_v24 = vmul.f32 %v1769_v22, %v254_v23 }
 0x1bd   :  { %258 = vrot.lane.b32.xlu0 %v256_v24, %s1996_s3 }
 0x22f   :  { %v259_v26 = vpop.permute.xlu0 %258 }
 0x230   :  { %v2157_v27 = vadd.f32 %v259_v26, %v251_v25 }
 0x232   :  { %1770 = vtanh.f32 %v2157_v27 }
 0x23c   :  { %v1771_v32 = vpop.eup %1770 }
 0x23d   :  { %264 = vrot.lane.b32.xlu1 %v1771_v32, %s1985_s19 }
 0x2af   :  { %v265_v33 = vpop.permute.xlu1 %264 }
 0x2b0   :  { %v267_v34 = vmul.f32 %v1769_v22, %v265_v33 }
 0x2b2   :  { %v268_v35 = vpack.c.bf16 %v267_v34, %v267_v34 }
 0x2b4   :  { %322 = vrot.lane.b32.xlu1 %v268_v35, %s1996_s3  ;;  %v640_v35 = vld [vmem:[#allocation2 + $0x2] sm:$0x1] }
 0x326   :  { %v323_v40 = vpop.permute.xlu1 %322 }
 0x327   :  { %1599 = vmatmul.mubr.msk.bf16.vlgmr.msra.gmra.mrb[4].mxu1 %vm138_vm1, %v323_v40  ;;  %1607 = vmatmul.mubr.msk.bf16.vlgmr.msra.gmra.mrb[8].mxu0 %vm138_vm1, %v323_v40 }
 0x328   :  { %1611 = vmatpush3.bf16.msra.mxu1 %v2130_v2  ;;  %1614 = vmatprep.mubr.msk.bf16.mxu1 %vm1994_vm0, %v1993_v0 }
 0x329   :  { %1612 = vmatprep.subr.bf16.mxu1 %v1993_v0  ;;  %1619 = vmatpush3.bf16.msra.mxu0 %v2163_v28 }
 0x32a   :  { %1620 = vmatprep.subr.bf16.mxu0 %v1993_v0  ;;  %1622 = vmatprep.mubr.msk.bf16.mxu0 %vm1994_vm0, %v1993_v0 }
 0x32c   :  { %1613 = vmatpush3.bf16.msra.mxu1 %v2137_v4 }
 0x32d   :  { %1621 = vmatpush3.bf16.msra.mxu0 %v2171_v30  ;;  %1626 = vmatprep.subr.bf16.mxu1 %v1993_v0 }
 0x32e   :  { %1634 = vmatprep.subr.bf16.mxu0 %v1993_v0 }
 0x32f   :  { %1615 = vmatmul.mubr.msk.bf16.vlgmr.msra.gmra.mrb[8].mxu1 %vm138_vm1, %v411_v41 }
 0x330   :  { %1627 = vmatpush3.bf16.msra.mxu1 %v2165_v29  ;;  %1630 = vmatprep.mubr.msk.bf16.mxu1 %vm1994_vm0, %v1993_v0 }
 0x331   :  { %1628 = vmatprep.subr.bf16.mxu1 %v1993_v0 }
 0x334   :  { %1629 = vmatpush3.bf16.msra.mxu1 %v2174_v31 }
 0x335   :  { %1642 = vmatprep.subr.bf16.mxu1 %v1993_v0 }
 0x3fa   :  { %v373_v43 = vpop.f32.mrb[4].mxu1  ;;  %v446_v44 = vpop.f32.mrb[8].mxu0 }
 0x3fb   :  { %v374_v45 = vadd.f32 %v373_v43, %v315_v36  ;;  %v1600_v46 = vpop.f32.mrb[5].mxu1  ;;  %v1608_v47 = vpop.f32.mrb[9].mxu0 }
 0x3fc   :  { %v376_v48 = vpop.f32.mrb[6].mxu1  ;;  %v449_v49 = vpop.f32.mrb[10].mxu0 }
 0x3fd   :  { %v385_v50 = vadd.f32 %v2214_v42, %v374_v45  ;;  %v1601_v51 = vpop.f32.mrb[7].mxu1  ;;  %v1609_v52 = vpop.f32.mrb[11].mxu0 }
 0x3ff   :  { %1772 = vtanh.f32 %v385_v50  ;;  %v1475_v61 = vmul.f32 -1.442695, %v385_v50 }
 0x402   :  { %v489_v53 = vpop.f32.mrb[8].mxu1 }
 0x403   :  { %v490_v54 = vadd.f32 %v489_v53, %v446_v44  ;;  %v1616_v55 = vpop.f32.mrb[9].mxu1 }
 0x404   :  { %v492_v56 = vpop.f32.mrb[10].mxu1 }
 0x405   :  { %v495_v57 = vadd.f32 %v2152_v8, %v490_v54  ;;  %v1617_v58 = vpop.f32.mrb[11].mxu1 }
 0x407   :  { %1774 = vtanh.f32 %v495_v57  ;;  %v1478_v62 = vmul.f32 -1.442695, %v495_v57 }
 0x408   :  { %1776 = vpow2.f32 %v1475_v61 }
 0x409   :  { %v1773_v59 = vpop.eup %1772  ;;  %1778 = vpow2.f32 %v1478_v62 }
 0x40a   :  { %395 = vrot.lane.b32.xlu0 %v1773_v59, %s1985_s19 }
 0x411   :  { %v1775_v60 = vpop.eup %1774 }
 0x412   :  { %505 = vrot.lane.b32.xlu1 %v1775_v60, %s1985_s19  ;;  %v1777_v63 = vpop.eup %1776 }
 0x413   :  { %v389_v5 = vadd.f32 1.0, %v1777_v63  ;;  %v1779_v6 = vpop.eup %1778 }
 0x414   :  { %v499_v7 = vadd.f32 1.0, %v1779_v6 }
 0x415   :  { %1780 = vrcp.f32 %v389_v5 }
 0x416   :  { %1782 = vrcp.f32 %v499_v7 }
 0x41f   :  { %v1781_v9 = vpop.eup %1780 }
 0x420   :  { %v1783_v12 = vpop.eup %1782  ;;  %v393_v15 = vmul.f32 0.0, %v1781_v9 }
 0x421   :  { %v503_v18 = vmul.f32 %v1783_v12, %v2157_v27 }
 0x47c   :  { %v396_v10 = vpop.permute.xlu0 %395 }
 0x47d   :  { %v398_v11 = vmul.f32 %v1781_v9, %v396_v10 }
 0x47f   :  { %400 = vrot.lane.b32.xlu0 %v398_v11, %s1996_s3 }
 0x484   :  { %v506_v13 = vpop.permute.xlu1 %505 }
 0x485   :  { %v508_v14 = vmul.f32 %v1783_v12, %v506_v13 }
 0x487   :  { %510 = vrot.lane.b32.xlu1 %v508_v14, %s1996_s3 }
 0x4f1   :  { %v401_v16 = vpop.permute.xlu0 %400 }
 0x4f2   :  { %v2222_v17 = vadd.f32 %v401_v16, %v393_v15 }
 0x4f4   :  { %1784 = vtanh.f32 %v2222_v17 }
 0x4f9   :  { %v511_v19 = vpop.permute.xlu1 %510 }
 0x4fa   :  { %v2226_v20 = vadd.f32 %v511_v19, %v503_v18 }
 0x4fc   :  { %1786 = vtanh.f32 %v2226_v20 }
 0x4fe   :  { %v1785_v21 = vpop.eup %1784 }
 0x4ff   :  { %406 = vrot.lane.b32.xlu0 %v1785_v21, %s1985_s19 }
 0x506   :  { %v1787_v22 = vpop.eup %1786 }
 0x507   :  { %516 = vrot.lane.b32.xlu1 %v1787_v22, %s1985_s19 }
 0x571   :  { %v407_v23 = vpop.permute.xlu0 %406 }
 0x572   :  { %v2231_v24 = vmul.f32 %v1781_v9, %v407_v23 }
 0x574   :  { %v521_v25 = vpack.c.bf16 %v2231_v24, %v2231_v24 }
 0x576   :  { %523 = vrot.lane.b32.xlu0 %v521_v25, %s1996_s3 }
 0x579   :  { %v517_v26 = vpop.permute.xlu1 %516 }
 0x57a   :  { %v519_v27 = vmul.f32 %v1783_v12, %v517_v26 }
 0x57c   :  { %v520_v32 = vpack.c.bf16 %v519_v27, %v519_v27 }
 0x57e   :  { %569 = vrot.lane.b32.xlu1 %v520_v32, %s1996_s3 }
 0x5e8   :  { %v524_v33 = vpop.permute.xlu0 %523 }
 0x5e9   :  { %1623 = vmatmul.mubr.msk.bf16.vlgmr.msra.gmra.mrb[12].mxu0 %vm138_vm1, %v524_v33 }
 0x5ea   :  { %1635 = vmatpush3.bf16.msra.mxu0 %v2128_v1  ;;  %1638 = vmatprep.mubr.msk.bf16.mxu0 %vm1994_vm0, %v1993_v0 }
 0x5eb   :  { %1636 = vmatprep.subr.bf16.mxu0 %v1993_v0 }
 0x5ee   :  { %1637 = vmatpush3.bf16.msra.mxu0 %v2133_v3 }
 0x5ef   :  { %1650 = vmatprep.subr.bf16.mxu0 %v1993_v0 }
 0x5f0   :  { %v570_v34 = vpop.permute.xlu1 %569 }
 0x5f1   :  { %1631 = vmatmul.mubr.msk.bf16.vlgmr.msra.gmra.mrb[12].mxu1 %vm138_vm1, %v570_v34  ;;  %1639 = vmatmul.mubr.msk.bf16.vlgmr.msra.gmra.mrb[16].mxu0 %vm138_vm1, %v570_v34  ;;  %v869_v34 = vld [vmem:[#allocation2 + $0x3] sm:$0x1] }
 0x5f2   :  { %1643 = vmatpush3.bf16.msra.mxu1 %v2130_v2  ;;  %1646 = vmatprep.mubr.msk.bf16.mxu1 %vm1994_vm0, %v1993_v0 }
 0x5f3   :  { %1644 = vmatprep.subr.bf16.mxu1 %v1993_v0  ;;  %1651 = vmatpush3.bf16.msra.mxu0 %v2163_v28 }
 0x5f4   :  { %1652 = vmatprep.subr.bf16.mxu0 %v1993_v0  ;;  %1654 = vmatprep.mubr.msk.bf16.mxu0 %vm1994_vm0, %v1993_v0 }
 0x5f6   :  { %1645 = vmatpush3.bf16.msra.mxu1 %v2137_v4 }
 0x5f7   :  { %1653 = vmatpush3.bf16.msra.mxu0 %v2171_v30  ;;  %1658 = vmatprep.subr.bf16.mxu1 %v1993_v0 }
 0x5f8   :  { %1666 = vmatprep.subr.bf16.mxu0 %v1993_v0 }
 0x5f9   :  { %1647 = vmatmul.mubr.msk.bf16.vlgmr.msra.gmra.mrb[16].mxu1 %vm138_vm1, %v640_v35 }
 0x5fa   :  { %1659 = vmatpush3.bf16.msra.mxu1 %v2165_v29  ;;  %1662 = vmatprep.mubr.msk.bf16.mxu1 %vm1994_vm0, %v1993_v0 }
 0x5fb   :  { %1660 = vmatprep.subr.bf16.mxu1 %v1993_v0 }
 0x5fe   :  { %1661 = vmatpush3.bf16.msra.mxu1 %v2174_v31 }
 0x5ff   :  { %1674 = vmatprep.subr.bf16.mxu1 %v1993_v0 }
 0x6bc   :  { %v562_v36 = vpop.f32.mrb[12].mxu0 }
 0x6bd   :  { %v1624_v37 = vpop.f32.mrb[13].mxu0 }
 0x6be   :  { %v565_v38 = vpop.f32.mrb[14].mxu0 }
 0x6bf   :  { %v1625_v39 = vpop.f32.mrb[15].mxu0 }
 0x6c4   :  { %v608_v40 = vpop.f32.mrb[12].mxu1  ;;  %v675_v41 = vpop.f32.mrb[16].mxu0 }
 0x6c5   :  { %v609_v43 = vadd.f32 %v608_v40, %v562_v36  ;;  %v1632_v44 = vpop.f32.mrb[13].mxu1  ;;  %v1640_v45 = vpop.f32.mrb[17].mxu0 }
 0x6c6   :  { %v611_v46 = vpop.f32.mrb[14].mxu1  ;;  %v678_v47 = vpop.f32.mrb[18].mxu0 }
 0x6c7   :  { %v614_v48 = vadd.f32 %v2214_v42, %v609_v43  ;;  %v1633_v49 = vpop.f32.mrb[15].mxu1  ;;  %v1641_v50 = vpop.f32.mrb[19].mxu0 }
 0x6c9   :  { %1788 = vtanh.f32 %v614_v48  ;;  %v1481_v59 = vmul.f32 -1.442695, %v614_v48 }
 0x6cc   :  { %v718_v51 = vpop.f32.mrb[16].mxu1 }
 0x6cd   :  { %v719_v52 = vadd.f32 %v718_v51, %v675_v41  ;;  %v1648_v53 = vpop.f32.mrb[17].mxu1 }
 0x6ce   :  { %v721_v54 = vpop.f32.mrb[18].mxu1 }
 0x6cf   :  { %v724_v55 = vadd.f32 %v2152_v8, %v719_v52  ;;  %v1649_v56 = vpop.f32.mrb[19].mxu1 }
 0x6d1   :  { %1790 = vtanh.f32 %v724_v55  ;;  %v1484_v60 = vmul.f32 -1.442695, %v724_v55 }
 0x6d2   :  { %1792 = vpow2.f32 %v1481_v59 }
 0x6d3   :  { %v1789_v57 = vpop.eup %1788  ;;  %1794 = vpow2.f32 %v1484_v60 }
 0x6d4   :  { %624 = vrot.lane.b32.xlu0 %v1789_v57, %s1985_s19 }
 0x6db   :  { %v1791_v58 = vpop.eup %1790 }
 0x6dc   :  { %734 = vrot.lane.b32.xlu1 %v1791_v58, %s1985_s19  ;;  %v1793_v61 = vpop.eup %1792 }
 0x6dd   :  { %v618_v62 = vadd.f32 1.0, %v1793_v61  ;;  %v1795_v63 = vpop.eup %1794 }
 0x6de   :  { %v728_v5 = vadd.f32 1.0, %v1795_v63 }
 0x6df   :  { %1796 = vrcp.f32 %v618_v62 }
 0x6e0   :  { %1798 = vrcp.f32 %v728_v5 }
 0x6e9   :  { %v1797_v6 = vpop.eup %1796 }
 0x6ea   :  { %v1799_v10 = vpop.eup %1798  ;;  %v622_v13 = vmul.f32 %v1797_v6, %v2222_v17 }
 0x6eb   :  { %v732_v16 = vmul.f32 %v1799_v10, %v2226_v20 }
 0x746   :  { %v625_v7 = vpop.permute.xlu0 %624 }
 0x747   :  { %v627_v9 = vmul.f32 %v1797_v6, %v625_v7 }
 0x749   :  { %629 = vrot.lane.b32.xlu0 %v627_v9, %s1996_s3 }
 0x74e   :  { %v735_v11 = vpop.permute.xlu1 %734 }
 0x74f   :  { %v737_v12 = vmul.f32 %v1799_v10, %v735_v11 }
 0x751   :  { %739 = vrot.lane.b32.xlu1 %v737_v12, %s1996_s3 }
 0x7bb   :  { %v630_v14 = vpop.permute.xlu0 %629 }
 0x7bc   :  { %v2272_v15 = vadd.f32 %v630_v14, %v622_v13 }
 0x7be   :  { %1800 = vtanh.f32 %v2272_v15 }
 0x7c3   :  { %v740_v18 = vpop.permute.xlu1 %739 }
 0x7c4   :  { %v2276_v19 = vadd.f32 %v740_v18, %v732_v16 }
 0x7c6   :  { %1802 = vtanh.f32 %v2276_v19 }
 0x7c8   :  { %v1801_v21 = vpop.eup %1800 }
 0x7c9   :  { %635 = vrot.lane.b32.xlu0 %v1801_v21, %s1985_s19 }
 0x7d0   :  { %v1803_v22 = vpop.eup %1802 }
 0x7d1   :  { %745 = vrot.lane.b32.xlu1 %v1803_v22, %s1985_s19 }
 0x83b   :  { %v636_v23 = vpop.permute.xlu0 %635 }
 0x83c   :  { %v2281_v17 = vmul.f32 %v1797_v6, %v636_v23 }
 0x83e   :  { %v750_v25 = vpack.c.bf16 %v2281_v17, %v2281_v17 }
 0x840   :  { %752 = vrot.lane.b32.xlu0 %v750_v25, %s1996_s3 }
 0x843   :  { %v746_v20 = vpop.permute.xlu1 %745 }
 0x844   :  { %v748_v26 = vmul.f32 %v1799_v10, %v746_v20 }
 0x846   :  { %v749_v27 = vpack.c.bf16 %v748_v26, %v748_v26 }
 0x848   :  { %798 = vrot.lane.b32.xlu1 %v749_v27, %s1996_s3 }
 0x8b2   :  { %v753_v32 = vpop.permute.xlu0 %752 }
 0x8b3   :  { %1655 = vmatmul.mubr.msk.bf16.vlgmr.msra.gmra.mrb[20].mxu0 %vm138_vm1, %v753_v32 }
 0x8b4   :  { %1667 = vmatpush3.bf16.msra.mxu0 %v2128_v1  ;;  %1670 = vmatprep.mubr.msk.bf16.mxu0 %vm1994_vm0, %v1993_v0 }
 0x8b5   :  { %1668 = vmatprep.subr.bf16.mxu0 %v1993_v0 }
 0x8b8   :  { %1669 = vmatpush3.bf16.msra.mxu0 %v2133_v3 }
 0x8b9   :  { %1682 = vmatprep.subr.bf16.mxu0 %v1993_v0 }
 0x8ba   :  { %v799_v33 = vpop.permute.xlu1 %798 }
 0x8bb   :  { %1663 = vmatmul.mubr.msk.bf16.vlgmr.msra.gmra.mrb[20].mxu1 %vm138_vm1, %v799_v33  ;;  %1671 = vmatmul.mubr.msk.bf16.vlgmr.msra.gmra.mrb[24].mxu0 %vm138_vm1, %v799_v33 }
 0x8bc   :  { %1675 = vmatpush3.bf16.msra.mxu1 %v2130_v2  ;;  %1678 = vmatprep.mubr.msk.bf16.mxu1 %vm1994_vm0, %v1993_v0 }
 0x8bd   :  { %1676 = vmatprep.subr.bf16.mxu1 %v1993_v0  ;;  %1683 = vmatpush3.bf16.msra.mxu0 %v2163_v28 }
 0x8be   :  { %1684 = vmatprep.subr.bf16.mxu0 %v1993_v0  ;;  %1686 = vmatprep.mubr.msk.bf16.mxu0 %vm1994_vm0, %v1993_v0 }
 0x8c0   :  { %1677 = vmatpush3.bf16.msra.mxu1 %v2137_v4 }
 0x8c1   :  { %1685 = vmatpush3.bf16.msra.mxu0 %v2171_v30  ;;  %1690 = vmatprep.subr.bf16.mxu1 %v1993_v0 }
 0x8c2   :  { %1698 = vmatprep.subr.bf16.mxu0 %v1993_v0 }
 0x8c3   :  { %1679 = vmatmul.mubr.msk.bf16.vlgmr.msra.gmra.mrb[24].mxu1 %vm138_vm1, %v869_v34 }
 0x8c4   :  { %1691 = vmatpush3.bf16.msra.mxu1 %v2165_v29  ;;  %1694 = vmatprep.mubr.msk.bf16.mxu1 %vm1994_vm0, %v1993_v0 }
 0x8c5   :  { %1692 = vmatprep.subr.bf16.mxu1 %v1993_v0 }
 0x8c8   :  { %1693 = vmatpush3.bf16.msra.mxu1 %v2174_v31 }
 0x8c9   :  { %1706 = vmatprep.subr.bf16.mxu1 %v1993_v0 }
 0x986   :  { %v791_v35 = vpop.f32.mrb[20].mxu0 }
 0x987   :  { %v1656_v36 = vpop.f32.mrb[21].mxu0 }
 0x988   :  { %v794_v37 = vpop.f32.mrb[22].mxu0 }
 0x989   :  { %v1657_v38 = vpop.f32.mrb[23].mxu0 }
 0x98e   :  { %v837_v39 = vpop.f32.mrb[20].mxu1  ;;  %v904_v40 = vpop.f32.mrb[24].mxu0 }
 0x98f   :  { %v838_v41 = vadd.f32 %v837_v39, %v791_v35  ;;  %v1664_v43 = vpop.f32.mrb[21].mxu1  ;;  %v1672_v44 = vpop.f32.mrb[25].mxu0 }
 0x990   :  { %v840_v45 = vpop.f32.mrb[22].mxu1  ;;  %v907_v46 = vpop.f32.mrb[26].mxu0 }
 0x991   :  { %v843_v47 = vadd.f32 %v2214_v42, %v838_v41  ;;  %v1665_v48 = vpop.f32.mrb[23].mxu1  ;;  %v1673_v49 = vpop.f32.mrb[27].mxu0 }
 0x993   :  { %1804 = vtanh.f32 %v843_v47  ;;  %v1487_v58 = vmul.f32 -1.442695, %v843_v47 }
 0x996   :  { %v947_v50 = vpop.f32.mrb[24].mxu1 }
 0x997   :  { %v948_v51 = vadd.f32 %v947_v50, %v904_v40  ;;  %v1680_v52 = vpop.f32.mrb[25].mxu1 }
 0x998   :  { %v950_v53 = vpop.f32.mrb[26].mxu1 }
 0x999   :  { %v953_v54 = vadd.f32 %v2152_v8, %v948_v51  ;;  %v1681_v55 = vpop.f32.mrb[27].mxu1 }
 0x99b   :  { %1806 = vtanh.f32 %v953_v54  ;;  %v1490_v59 = vmul.f32 -1.442695, %v953_v54 }
 0x99c   :  { %1808 = vpow2.f32 %v1487_v58 }
 0x99d   :  { %v1805_v56 = vpop.eup %1804  ;;  %1810 = vpow2.f32 %v1490_v59 }
 0x99e   :  { %853 = vrot.lane.b32.xlu0 %v1805_v56, %s1985_s19 }
 0x9a5   :  { %v1807_v57 = vpop.eup %1806 }
 0x9a6   :  { %963 = vrot.lane.b32.xlu1 %v1807_v57, %s1985_s19  ;;  %v1809_v60 = vpop.eup %1808 }
 0x9a7   :  { %v847_v61 = vadd.f32 1.0, %v1809_v60  ;;  %v1811_v62 = vpop.eup %1810 }
 0x9a8   :  { %v957_v63 = vadd.f32 1.0, %v1811_v62 }
 0x9a9   :  { %1812 = vrcp.f32 %v847_v61 }
 0x9aa   :  { %1814 = vrcp.f32 %v957_v63 }
 0x9b3   :  { %v1813_v5 = vpop.eup %1812 }
 0x9b4   :  { %v1815_v9 = vpop.eup %1814  ;;  %v851_v12 = vmul.f32 %v1813_v5, %v2272_v15  ;;  %v1327_v15 = vrot.slane %v2281_v17, 6 }
 0x9b5   :  { %v961_v16 = vmul.f32 %v1815_v9, %v2276_v19 }
 0x9b6   :  { %v1336_v19 = vsel %vm1335_vm2, %v2231_v24, %v1327_v15 }
 0xa10   :  { %v854_v6 = vpop.permute.xlu0 %853 }
 0xa11   :  { %v856_v7 = vmul.f32 %v1813_v5, %v854_v6 }
 0xa13   :  { %858 = vrot.lane.b32.xlu0 %v856_v7, %s1996_s3 }
 0xa18   :  { %v964_v10 = vpop.permute.xlu1 %963 }
 0xa19   :  { %v966_v11 = vmul.f32 %v1815_v9, %v964_v10 }
 0xa1b   :  { %968 = vrot.lane.b32.xlu1 %v966_v11, %s1996_s3 }
 0xa85   :  { %v859_v13 = vpop.permute.xlu0 %858 }
 0xa86   :  { %v2322_v14 = vadd.f32 %v859_v13, %v851_v12 }
 0xa88   :  { %1816 = vtanh.f32 %v2322_v14 }
 0xa8d   :  { %v969_v18 = vpop.permute.xlu1 %968 }
 0xa8e   :  { %v2326_v21 = vadd.f32 %v969_v18, %v961_v16 }
 0xa90   :  { %1818 = vtanh.f32 %v2326_v21 }
 0xa92   :  { %v1817_v22 = vpop.eup %1816 }
 0xa93   :  { %864 = vrot.lane.b32.xlu0 %v1817_v22, %s1985_s19 }
 0xa9a   :  { %v1819_v23 = vpop.eup %1818 }
 0xa9b   :  { %974 = vrot.lane.b32.xlu1 %v1819_v23, %s1985_s19 }
 0xb05   :  { %v865_v25 = vpop.permute.xlu0 %864 }
 0xb06   :  { %v867_v20 = vmul.f32 %v1813_v5, %v865_v25 }
 0xb08   :  { %v979_v26 = vpack.c.bf16 %v867_v20, %v867_v20  ;;  %v1330_v27 = vrot.slane %v867_v20, 4 }
 0xb0a   :  { %981 = vrot.lane.b32.xlu0 %v979_v26, %s1996_s3  ;;  %v2334_v32 = vsel %vm1337_vm3, %v1336_v19, %v1330_v27 }
 0xb0d   :  { %v975_v33 = vpop.permute.xlu1 %974 }
 0xb0e   :  { %v977_v34 = vmul.f32 %v1815_v9, %v975_v33 }
 0xb10   :  { %v978_v35 = vpack.c.bf16 %v977_v34, %v977_v34 }
 0xb12   :  { %1027 = vrot.lane.b32.xlu1 %v978_v35, %s1996_s3 }
 0xb7c   :  { %v982_v36 = vpop.permute.xlu0 %981 }
 0xb7d   :  { %1687 = vmatmul.mubr.msk.bf16.vlgmr.msra.gmra.mrb[28].mxu0 %vm138_vm1, %v982_v36 }
 0xb7e   :  { %1699 = vmatpush3.bf16.msra.mxu0 %v2128_v1  ;;  %1702 = vmatprep.mubr.msk.bf16.mxu0 %vm1994_vm0, %v1993_v0  ;;  %v1098_v1 = vld [vmem:[#allocation2 + $0x4] sm:$0x1] }
 0xb7f   :  { %1700 = vmatprep.subr.bf16.mxu0 %v1993_v0 }
 0xb82   :  { %1701 = vmatpush3.bf16.msra.mxu0 %v2133_v3 }
 0xb83   :  { %1714 = vmatprep.subr.bf16.mxu0 %v1993_v0 }
 0xb84   :  { %v1028_v24 = vpop.permute.xlu1 %1027 }
 0xb85   :  { %1695 = vmatmul.mubr.msk.bf16.vlgmr.msra.gmra.mrb[28].mxu1 %vm138_vm1, %v1028_v24  ;;  %1703 = vmatmul.mubr.msk.bf16.vlgmr.msra.gmra.mrb[32].mxu0 %vm138_vm1, %v1028_v24 }
 0xb86   :  { %1707 = vmatpush3.bf16.msra.mxu1 %v2130_v2  ;;  %1710 = vmatprep.mubr.msk.bf16.mxu1 %vm1994_vm0, %v1993_v0 }
 0xb87   :  { %1708 = vmatprep.subr.bf16.mxu1 %v1993_v0  ;;  %1715 = vmatpush3.bf16.msra.mxu0 %v2163_v28 }
 0xb88   :  { %1716 = vmatprep.subr.bf16.mxu0 %v1993_v0  ;;  %1718 = vmatprep.mubr.msk.bf16.mxu0 %vm1994_vm0, %v1993_v0 }
 0xb8a   :  { %1709 = vmatpush3.bf16.msra.mxu1 %v2137_v4 }
 0xb8b   :  { %1717 = vmatpush3.bf16.msra.mxu0 %v2171_v30  ;;  %1722 = vmatprep.subr.bf16.mxu1 %v1993_v0 }
 0xb8c   :  { %1730 = vmatprep.subr.bf16.mxu0 %v1993_v0 }
 0xb8d   :  { %1711 = vmatmul.mubr.msk.bf16.vlgmr.msra.gmra.mrb[32].mxu1 %vm138_vm1, %v1098_v1 }
 0xb8e   :  { %1723 = vmatpush3.bf16.msra.mxu1 %v2165_v29  ;;  %1726 = vmatprep.mubr.msk.bf16.mxu1 %vm1994_vm0, %v1993_v0 }
 0xb8f   :  { %1724 = vmatprep.subr.bf16.mxu1 %v1993_v0 }
 0xb92   :  { %1725 = vmatpush3.bf16.msra.mxu1 %v2174_v31 }
 0xc50   :  { %v1020_v2 = vpop.f32.mrb[28].mxu0 }
 0xc51   :  { %v1688_v3 = vpop.f32.mrb[29].mxu0 }
 0xc52   :  { %v1023_v4 = vpop.f32.mrb[30].mxu0 }
 0xc53   :  { %v1689_v28 = vpop.f32.mrb[31].mxu0 }
 0xc58   :  { %v1066_v30 = vpop.f32.mrb[28].mxu1  ;;  %v1133_v17 = vpop.f32.mrb[32].mxu0 }
 0xc59   :  { %v1067_v37 = vadd.f32 %v1066_v30, %v1020_v2  ;;  %v1696_v38 = vpop.f32.mrb[29].mxu1  ;;  %v1704_v39 = vpop.f32.mrb[33].mxu0 }
 0xc5a   :  { %v1069_v40 = vpop.f32.mrb[30].mxu1  ;;  %v1136_v41 = vpop.f32.mrb[34].mxu0 }
 0xc5b   :  { %v1072_v29 = vadd.f32 %v2214_v42, %v1067_v37  ;;  %v1697_v43 = vpop.f32.mrb[31].mxu1  ;;  %v1705_v44 = vpop.f32.mrb[35].mxu0  ;;  %v1763_v41 = vld [vmem:[#allocation10 + $0x8] sm:$0xff]  }
 0xc5d   :  { %1820 = vtanh.f32 %v1072_v29  ;;  %v1493_v52 = vmul.f32 -1.442695, %v1072_v29 }
 0xc60   :  { %v1176_v45 = vpop.f32.mrb[32].mxu1 }
 0xc61   :  { %v1177_v46 = vadd.f32 %v1176_v45, %v1133_v17  ;;  %v1712_v47 = vpop.f32.mrb[33].mxu1 }
 0xc62   :  { %v1179_v31 = vpop.f32.mrb[34].mxu1  ;;  %v1997_v47 = vmov 1983009808  }
 0xc63   :  { %v1182_v48 = vadd.f32 %v2152_v8, %v1177_v46  ;;  %v1713_v49 = vpop.f32.mrb[35].mxu1  ;;  %v1411_v31 = vunpack.c.l.s4 %v1997_v47 }
 0xc65   :  { %1822 = vtanh.f32 %v1182_v48  ;;  %v1496_v53 = vmul.f32 -1.442695, %v1182_v48  ;;  %v1413_v48 = vlaneseq  ;;  %v1412_v49 = vunpack.c.0.s8 %v1411_v31 }
 0xc66   :  { %1824 = vpow2.f32 %v1493_v52 }
 0xc67   :  { %v1821_v50 = vpop.eup %1820  ;;  %1826 = vpow2.f32 %v1496_v53 }
 0xc68   :  { %1082 = vrot.lane.b32.xlu0 %v1821_v50, %s1985_s19  ;;  %v1414_v50 = vshrl.u32 %v1413_v48, 7 }
 0xc6f   :  { %v1823_v51 = vpop.eup %1822 }
 0xc70   :  { %1192 = vrot.lane.b32.xlu1 %v1823_v51, %s1985_s19  ;;  %v1825_v54 = vpop.eup %1824  ;;  %v1415_v51 = vsub.s32 %v1412_v49, %v1414_v50 }
 0xc71   :  { %v1076_v55 = vadd.f32 1.0, %v1825_v54  ;;  %v1827_v56 = vpop.eup %1826 }
 0xc72   :  { %v1186_v57 = vadd.f32 1.0, %v1827_v56 }
 0xc73   :  { %1828 = vrcp.f32 %v1076_v55 }
 0xc74   :  { %1830 = vrcp.f32 %v1186_v57 }
 0xc7d   :  { %v1829_v58 = vpop.eup %1828 }
 0xc7e   :  { %v1831_v60 = vpop.eup %1830  ;;  %v1080_v63 = vmul.f32 %v1829_v58, %v2322_v14 }
 0xc7f   :  { %v1190_v7 = vmul.f32 %v1831_v60, %v2326_v21 }
 0xcda   :  { %v1083_v8 = vpop.permute.xlu0 %1082 }
 0xcdb   :  { %v1085_v59 = vmul.f32 %v1829_v58, %v1083_v8 }
 0xcdd   :  { %1087 = vrot.lane.b32.xlu0 %v1085_v59, %s1996_s3 }
 0xce2   :  { %v1193_v61 = vpop.permute.xlu1 %1192 }
 0xce3   :  { %v1195_v62 = vmul.f32 %v1831_v60, %v1193_v61 }
 0xce5   :  { %1197 = vrot.lane.b32.xlu1 %v1195_v62, %s1996_s3 }
 0xd4f   :  { %v1088_v5 = vpop.permute.xlu0 %1087 }
 0xd50   :  { %v1090_v6 = vadd.f32 %v1088_v5, %v1080_v63 }
 0xd52   :  { %1832 = vtanh.f32 %v1090_v6 }
 0xd57   :  { %v1198_v9 = vpop.permute.xlu1 %1197 }
 0xd58   :  { %v1200_v10 = vadd.f32 %v1198_v9, %v1190_v7 }
 0xd5a   :  { %1834 = vtanh.f32 %v1200_v10 }
 0xd5c   :  { %v1833_v11 = vpop.eup %1832 }
 0xd5d   :  { %1093 = vrot.lane.b32.xlu0 %v1833_v11, %s1985_s19 }
 0xd64   :  { %v1835_v12 = vpop.eup %1834 }
 0xd65   :  { %1203 = vrot.lane.b32.xlu1 %v1835_v12, %s1985_s19 }
 0xdcf   :  { %v1094_v13 = vpop.permute.xlu0 %1093 }
 0xdd0   :  { %v1096_v16 = vmul.f32 %v1829_v58, %v1094_v13 }
 0xdd2   :  { %v1208_v18 = vpack.c.bf16 %v1096_v16, %v1096_v16  ;;  %v1333_v22 = vrot.slane %v1096_v16, 2 }
 0xdd4   :  { %1210 = vrot.lane.b32.xlu0 %v1208_v18, %s1996_s3  ;;  %v1340_v14 = vsel %vm1339_vm4, %v2334_v32, %v1333_v22 }
 0xdd7   :  { %v1204_v23 = vpop.permute.xlu1 %1203 }
 0xdd8   :  { %v1206_v21 = vmul.f32 %v1831_v60, %v1204_v23 }
 0xdda   :  { %v1207_v15 = vpack.c.bf16 %v1206_v21, %v1206_v21 }
 0xddc   :  { %1256 = vrot.lane.b32.xlu1 %v1207_v15, %s1996_s3 }
 0xe46   :  { %v1211_v25 = vpop.permute.xlu0 %1210 }
 0xe47   :  { %1719 = vmatmul.mubr.msk.bf16.vlgmr.msra.gmra.mrb[36].mxu0 %vm138_vm1, %v1211_v25 }
 0xe48   :  { %1734 = vmatprep.mubr.msk.bf16.mxu0 %vm1994_vm0, %v1993_v0 }
 0xe4e   :  { %v1257_v20 = vpop.permute.xlu1 %1256 }
 0xe4f   :  { %1727 = vmatmul.mubr.msk.bf16.vlgmr.msra.gmra.mrb[36].mxu1 %vm138_vm1, %v1257_v20 }
 0xf1a   :  { %v1249_v26 = vpop.f32.mrb[36].mxu0 }
 0xf1b   :  { %v1720_v27 = vpop.f32.mrb[37].mxu0 }
 0xf1c   :  { %v1252_v19 = vpop.f32.mrb[38].mxu0 }
 0xf1d   :  { %v1721_v33 = vpop.f32.mrb[39].mxu0 }
 0xf22   :  { %v1295_v34 = vpop.f32.mrb[36].mxu1 }
 0xf23   :  { %v1296_v32 = vadd.f32 %v1295_v34, %v1249_v26  ;;  %v1728_v35 = vpop.f32.mrb[37].mxu1 }
 0xf24   :  { %v1298_v36 = vpop.f32.mrb[38].mxu1 }
 0xf25   :  { %v1301_v24 = vadd.f32 %v2214_v42, %v1296_v32  ;;  %v1729_v1 = vpop.f32.mrb[39].mxu1  ;;  %v1762_v42 = vld [vmem:[#allocation10] sm:$0xff]  }
 0xf26   :  { %1731 = vmatpush3.bf16.msra.mxu0 %v1762_v42 }
 0xf27   :  { %1836 = vtanh.f32 %v1301_v24  ;;  %v1499_v3 = vmul.f32 -1.442695, %v1301_v24  ;;  %1732 = vmatprep.subr.bf16.mxu0 %v1993_v0  ;;  %v1500_v0 = vld [vmem:[%s2413_s8] ss:$0 sm:$0xff] }
 0xf29   :  { %1838 = vpow2.f32 %v1499_v3 }
 0xf2a   :  { %1733 = vmatpush3.bf16.msra.mxu0 %v1763_v41 }
 0xf31   :  { %v1837_v2 = vpop.eup %1836 }
 0xf32   :  { %1311 = vrot.lane.b32.xlu0 %v1837_v2, %s1985_s19 }
 0xf33   :  { %v1839_v4 = vpop.eup %1838 }
 0xf34   :  { %v1305_v28 = vadd.f32 1.0, %v1839_v4 }
 0xf36   :  { %1840 = vrcp.f32 %v1305_v28 }
 0xf40   :  { %v1841_v30 = vpop.eup %1840 }
 0xf41   :  { %v1309_v38 = vmul.f32 %v1841_v30, %v1090_v6 }
 0xfa4   :  { %v1312_v17 = vpop.permute.xlu0 %1311 }
 0xfa5   :  { %v1314_v37 = vmul.f32 %v1841_v30, %v1312_v17 }
 0xfa7   :  { %1316 = vrot.lane.b32.xlu1 %v1314_v37, %s1996_s3 }
0x1019   :  { %v1317_v39 = vpop.permute.xlu1 %1316 }
0x101a   :  { %v1319_v40 = vadd.f32 %v1317_v39, %v1309_v38 }
0x101c   :  { %1842 = vtanh.f32 %v1319_v40 }
0x1026   :  { %v1843_v29 = vpop.eup %1842 }
0x1027   :  { %1322 = vrot.lane.b32.xlu0 %v1843_v29, %s1985_s19  ;;  %s1998_s19 = smov [#allocation11]  }
0x1028   :  { %s1448_s15 = sshll.u32 %s1998_s19, 4  ;;  %s1449_s15 = int_to_ptr.vmem [resolvable:$true] %s1448_s15 }
0x1029   :  { %s1954_s8 = scalar_lea.vmem %s1449_s15, 160  ;;  %p1959_p13 = scmp.lt.s32.totalorder %s1449_s15, %s1449_s15 }
0x102a   :  { %p1955_p12 = scmp.ne.s32.totalorder %s1449_s15, %s1954_s8  ;;  %p1960_p0 = scmp.lt.s32.totalorder %s1954_s8, %s1954_s8 }
0x102c   :  { %p1961_p1 = por %p1960_p0, %p1959_p13 }
0x102e   :  { %p1962_p2 = pnand %p1961_p1, %p1955_p12 }
0x1099   :  { %v1323_v43 = vpop.permute.xlu0 %1322 }
0x109a   :  { %v1325_v44 = vmul.f32 %v1841_v30, %v1323_v43 }
0x109c   :  { %v1341_v45 = vpack.c.bf16 %v1325_v44, %v1340_v14 }
0x109e   :  { %1349 = vrot.lane.b32.xlu1 %v1341_v45, %s1996_s3 }
0x1110   :  { %v1350_v46 = vpop.permute.xlu1 %1349 }
0x1111   :  { %1735 = vmatmul.mubr.msk.bf16.vlgmr.msra.gmra.mrb[40].mxu0 %vm138_vm1, %v1350_v46 }
0x11e4   :  { %v1400_v52 = vpop.f32.mrb[40].mxu0 }
0x11e5   :  { %v1401_v53 = vadd.f32 %v1500_v0, %v1400_v52  ;;  %v1736_v54 = vpop.f32.mrb[41].mxu0 }
0x11e6   :  { %v1403_v55 = vpop.f32.mrb[42].mxu0 }
0x11e7   :  { %v1409_v56 = vcombine.high %v1401_v53, %v1401_v53  ;;  %v1416_v57 = vrot.slane %v1401_v53, %v1415_v51  ;;  %1504 = vst.sshfl [vmem:[#allocation11] sm:$0x3 pattern:$0x76325410] %v1401_v53  ;;  %v1404_v58 = vadd.f32 %v1500_v0, %v1403_v55  ;;  %v1737_v8 = vpop.f32.mrb[43].mxu0 }
0x11e9   :  { %v1423_v59 = vrot.slane %v1409_v56, %v1415_v51  ;;  %v1424_v60 = vcombine.high %v1416_v57, %v1416_v57  ;;  %1505 = vst.sshfl [vmem:[#allocation11 + $0x4] sm:$0x3 pattern:$0x76325410] %v1409_v56 }
0x11ea   :  { %1506 = vst.sshfl [vmem:[#allocation11 + $0x8] sm:$0x3 pattern:$0x76325410] %v1404_v58 }
0x11eb   :  { %v1425_v61 = vcombine.high %v1423_v59, %v1423_v59  ;;  %1439 = vst [vmem:[#allocation11 + $0x2] sm:$0x3] %v1424_v60 }
0x11ed   :  { %1441 = vst [vmem:[#allocation11 + $0x6] sm:$0x3] %v1425_v61 }
0x11ee   :  { %1965 = shalt.err (!%p1962_p2)
}
0x11ef   :  { %s1966_s18 = scalar_lea.hbm %s2414_s9, 160 }
0x11f0   :  { %p1967_p3 = scmp.ne.s32.totalorder %s2414_s9, %s1966_s18  ;;  %p1970_p4 = scmp.lt.u32.totalorder %s1966_s18, %s2414_s9 }
0x11f2   :  { %p1972_p5 = pnand %p1970_p4, %p1967_p3 }
0x11f4   :  { %1975 = shalt.err (!%p1972_p5)
}
0x11f5   :  { %s1999_s23 = smov 2  }
0x11f6   :  { %1454 = dma.vmem_to_hbm [thread:$0]  %s1449_s15, 160, %s2414_s9, [#allocation4], %s1996_s3, %s1996_s3, %s1999_s23  }
0x11f7   :  { %1982 = dma.done.wait [#allocation4], 160  }
0x11f8   :  { %1983 = vsyncadd [#allocation4], 4294967136 }
0x11f9   :  { %1458 = vsyncpa [#allocation3], 1 }
0x11fa   :  { %1459 = vsyncpa [#allocation6], 1 }
0x11fb   :  { %1460 = vsyncpa [#allocation9], 1 }
0x11fc   :  { %1461 = vsyncpa [#allocation4], 1 }

</bundles_post_ra>
